<compile_context>
chip_gen: v7x
topology: tpu7x:2x2x1
jax: 0.10.0
libtpu: 0.0.40
codegen_flags: <defaults>
</compile_context>

<pallas_src>
import math

import jax
import jax.numpy as jnp
from jax.experimental import pallas as pl
from jax.experimental.pallas import tpu as pltpu


def _round_up(x, m):
    return ((x + m - 1) // m) * m


# ----------------------------- Pallas kernel -------------------------------
def _stft_mag_kernel(chunk_ref, basis_ref, out_ref, frames_ref):
    # chunk_ref : (1, 1, TM + n_q - 1, hop) f32  hop-strided signal rows
    # basis_ref : (K_pad, 2*F_pad)         bf16  windowed fused cos|sin basis
    # out_ref   : (1, n_freq, TM)          f32   torch-layout output tile
    # frames_ref: (TM, K_pad)              bf16  VMEM scratch (frame tile)
    tm = out_ref.shape[2]
    n_freq = out_ref.shape[1]
    hop = chunk_ref.shape[3]
    k_pad = basis_ref.shape[0]
    two_fpad = basis_ref.shape[1]
    f_pad = two_fpad // 2
    n_q = k_pad // hop

    # frames[t, q*hop + r] = chunk[t + q, r]  (window is folded into basis)
    for q in range(n_q):
        frames_ref[:, q * hop:(q + 1) * hop] = (
            chunk_ref[0, 0, q:q + tm, :].astype(jnp.bfloat16))

    # One lane-dense bf16 MXU matmul, f32 accumulation.
    acc = jnp.dot(frames_ref[...], basis_ref[...],
                  preferred_element_type=jnp.float32)      # (TM, 2*F_pad)

    real = acc[:, :f_pad]
    imag = acc[:, f_pad:]
    mag = jnp.sqrt(jnp.maximum(real * real + imag * imag, 1e-7))  # (TM, F_pad)

    # Torch layout (n_freq, n_frames): transpose the tile in-register so the
    # frame axis (multiple of 128) is the lane dim -> dense stores.
    out_ref[0] = mag.T[:n_freq, :]


def _stft_mag_pallas(chunks, basis, n_freq, n_frames_pad, tm):
    B, n_tiles, tmq, hop = chunks.shape
    k_pad, two_fpad = basis.shape
    return pl.pallas_call(
        _stft_mag_kernel,
        out_shape=jax.ShapeDtypeStruct((B, n_freq, n_frames_pad), jnp.float32),
        grid_spec=pltpu.PrefetchScalarGridSpec(
            num_scalar_prefetch=0,
            grid=(B, n_tiles),
            in_specs=[
                pl.BlockSpec((1, 1, tmq, hop), lambda b, j: (b, j, 0, 0)),
                pl.BlockSpec((k_pad, two_fpad), lambda b, j: (0, 0)),
            ],
            out_specs=pl.BlockSpec((1, n_freq, tm), lambda b, j: (b, 0, j)),
            scratch_shapes=[pltpu.VMEM((tm, k_pad), jnp.bfloat16)],
        ),
        compiler_params=pltpu.CompilerParams(
            dimension_semantics=("parallel", "parallel"),
            vmem_limit_bytes=48 * 1024 * 1024,
        ),
    )(chunks, basis)


# ------------------------------ STFT module ---------------------------------
class STFT:
    """JAX/Pallas port of the PyTorch STFT magnitude module."""

    def __init__(self, fft_size, hop_size, win_length, frame_tile=256):
        assert frame_tile % 128 == 0
        self.fft_size = fft_size
        self.hop_size = hop_size
        self.win_length = win_length
        self.frame_tile = frame_tile

        n_freq = fft_size // 2 + 1
        self.n_freq = n_freq
        self.n_q = -(-fft_size // hop_size)          # ceil(fft / hop)
        self.k_pad = self.n_q * hop_size             # padded contraction dim
        self.f_pad = _round_up(n_freq, 128)          # lane-dense freq padding

        # torch.hann_window(win_length): periodic hann, then zero-padded
        # (centered) to fft_size exactly like torch.stft does.
        n = jnp.arange(win_length, dtype=jnp.float32)
        win = 0.5 * (1.0 - jnp.cos(2.0 * math.pi * n / win_length))
        lpad = (fft_size - win_length) // 2
        win_full = jnp.pad(win, (lpad, fft_size - win_length - lpad))

        # Fused, windowed, zero-padded one-sided DFT basis (bf16):
        #   basis[n, f]         = win[n] * cos(2*pi*n*f/fft)   for f < n_freq
        #   basis[n, F_pad + f] = win[n] * sin(2*pi*n*f/fft)   for f < n_freq
        # zero in the freq padding and for samples n in [fft, n_q*hop).
        t = jnp.arange(fft_size, dtype=jnp.float32)[:, None]
        k = jnp.arange(n_freq, dtype=jnp.float32)[None, :]
        ang = 2.0 * math.pi * t * k / fft_size
        cosb = jnp.zeros((fft_size, self.f_pad), jnp.float32)
        cosb = cosb.at[:, :n_freq].set(jnp.cos(ang))
        sinb = jnp.zeros((fft_size, self.f_pad), jnp.float32)
        sinb = sinb.at[:, :n_freq].set(jnp.sin(ang))
        fused = jnp.concatenate([cosb, sinb], axis=1) * win_full[:, None]
        fused = jnp.pad(fused, ((0, self.k_pad - fft_size), (0, 0)))
        self.basis = fused.astype(jnp.bfloat16)       # (K_pad, 2*F_pad)

    def __call__(self, x):
        # x: (B, 1, T) float32
        fft, hop = self.fft_size, self.hop_size
        B = x.shape[0]
        x = x.astype(jnp.float32)

        # F.pad(x, (p, p), 'reflect').squeeze(1)
        p = (fft - hop) // 2
        x = jnp.pad(x, ((0, 0), (0, 0), (p, p)), mode="reflect")[:, 0, :]
        # torch.stft defaults: center=True, pad_mode='reflect'
        c = fft // 2
        x = jnp.pad(x, ((0, 0), (c, c)), mode="reflect")
        L0 = x.shape[1]
        n_frames = (L0 - fft) // hop + 1

        # Frame tiling (TM multiple of 128 -> lane-dense output stores).
        tm = min(self.frame_tile, _round_up(n_frames, 128))
        n_frames_pad = _round_up(n_frames, tm)
        n_tiles = n_frames_pad // tm
        n_rows = n_frames_pad + self.n_q - 1

        # Zero-pad / trim so the signal is exactly n_rows * hop samples
        # (real frames never read past (n_frames-1)*hop + fft - 1).
        target = n_rows * hop
        if target >= L0:
            x = jnp.pad(x, ((0, 0), (0, target - L0)))
        else:
            x = x[:, :target]
        s = x.reshape(B, n_rows, hop)                 # hop-strided rows

        # Overlapping per-tile chunks (~(n_q-1)/TM extra samples, i.e. a few %
        # duplication vs. the n_fft/hop x blow-up of materializing frames).
        tmq = tm + self.n_q - 1
        rows = (jnp.arange(n_tiles)[:, None] * tm
                + jnp.arange(tmq)[None, :])           # (n_tiles, TM+n_q-1)
        chunks = s[:, rows, :].astype(jnp.float32)    # (B, n_tiles, TMq, hop)

        mag = _stft_mag_pallas(chunks, self.basis, self.n_freq,
                               n_frames_pad, tm)      # (B, n_freq, n_frames_pad)
        # Drop padded tail frames (no-op when n_frames is a tile multiple).
        return mag[:, :, :n_frames]


# ------------------------------ reference -----------------------------------
def _stft_ref(x, fft_size, hop, win_length):
    """Pure-JAX f32 reference mirroring torch.stft semantics."""
    p = (fft_size - hop) // 2
    xp = jnp.pad(x, ((0, 0), (0, 0), (p, p)), mode="reflect")[:, 0, :]
    c = fft_size // 2
    xp = jnp.pad(xp, ((0, 0), (c, c)), mode="reflect")
    n = jnp.arange(win_length, dtype=jnp.float32)
    win = 0.5 * (1.0 - jnp.cos(2.0 * math.pi * n / win_length))
    lpad = (fft_size - win_length) // 2
    win = jnp.pad(win, (lpad, fft_size - win_length - lpad))
    L = xp.shape[1]
    n_frames = (L - fft_size) // hop + 1
    idx = jnp.arange(n_frames)[:, None] * hop + jnp.arange(fft_size)[None, :]
    frames = xp[:, idx] * win[None, None, :]
    spec = jnp.fft.rfft(frames, n=fft_size, axis=-1)   # (B, n_frames, n_freq)
    mag = jnp.sqrt(jnp.clip(jnp.real(spec) ** 2 + jnp.imag(spec) ** 2,
                            1e-7, None))
    return jnp.transpose(mag, (0, 2, 1))


# -------------------------------- main ---------------------------------------
if __name__ == "__main__":
    key = jax.random.PRNGKey(0)
    configs = [
        # (fft_size, hop_size, win_length, T)
        (512, 128, 400, 32256),   # n_frames = 256 -> one exact 256-frame tile
        (256, 32, 256, 16384),    # n_frames = 520 -> 3 tiles, padded tail
    ]
    for i, (fft, hop, win, T) in enumerate(configs):
        k = jax.random.fold_in(key, i)
        x = jax.random.normal(k, (2, 1, T), dtype=jnp.float32)

        stft = STFT(fft, hop, win)
        mag = jax.block_until_ready(stft(x))

        ref = _stft_ref(x, fft, hop, win)
        assert mag.shape == ref.shape, (mag.shape, ref.shape)
        max_err = float(jnp.max(jnp.abs(mag - ref)))
        # bf16 MXU path -> relaxed tolerance (f32 accumulate, f32 epilogue).
        assert jnp.allclose(mag, ref, rtol=5e-2, atol=5e-1), (i, max_err)

    print("KERNEL_OK")
</pallas_src>

<mosaic_0001>
module attributes {stable_mosaic.version = 11 : i64} {
  func.func @_stft_mag_kernel(%arg0: i32, %arg1: i32, %arg2: memref<1x1x259x128xf32, #tpu.memory_space<vmem>>, %arg3: memref<512x768xbf16, #tpu.memory_space<vmem>>, %arg4: memref<1x257x256xf32, #tpu.memory_space<vmem>>, %arg5: memref<256x512xbf16, #tpu.memory_space<vmem>>) attributes {dimension_semantics = [#tpu.dimension_semantics<parallel>, #tpu.dimension_semantics<parallel>], iteration_bounds = array<i64: 2, 1>, scalar_prefetch = 0 : i64, scratch_operands = 1 : i64, tpu.core_type = #tpu.core_type<tc>, window_params = [{transform_indices = @transform_0, window_bounds = array<i64: 1, 1, 259, 128>}, {pipeline_mode = #tpu.pipeline_mode<synchronous>, transform_indices = @transform_1, window_bounds = array<i64: 512, 768>}, {transform_indices = @transform_2, window_bounds = array<i64: 1, 257, 256>}]} {
    %c0 = arith.constant 0 : index
    %c0_0 = arith.constant 0 : index
    %c0_1 = arith.constant 0 : index
    %c0_2 = arith.constant 0 : index
    %0 = vector.load %arg2[%c0, %c0_0, %c0_1, %c0_2] : memref<1x1x259x128xf32, #tpu.memory_space<vmem>>, vector<1x1x256x128xf32>
    %1 = vector.shape_cast %0 : vector<1x1x256x128xf32> to vector<256x128xf32>
    %2 = arith.truncf %1 : vector<256x128xf32> to vector<256x128xbf16>
    %c0_3 = arith.constant 0 : index
    %c0_4 = arith.constant 0 : index
    %3 = vector.load %arg5[%c0_3, %c0_4] : memref<256x512xbf16, #tpu.memory_space<vmem>>, vector<256x128xbf16>
    tpu.vector_store %arg5[%c0_3, %c0_4], %2 {strides = array<i32>} : memref<256x512xbf16, #tpu.memory_space<vmem>>, vector<256x128xbf16>,
    %c0_5 = arith.constant 0 : index
    %c0_6 = arith.constant 0 : index
    %c1 = arith.constant 1 : index
    %c0_7 = arith.constant 0 : index
    %4 = vector.load %arg2[%c0_5, %c0_6, %c1, %c0_7] : memref<1x1x259x128xf32, #tpu.memory_space<vmem>>, vector<1x1x256x128xf32>
    %5 = vector.shape_cast %4 : vector<1x1x256x128xf32> to vector<256x128xf32>
    %6 = arith.truncf %5 : vector<256x128xf32> to vector<256x128xbf16>
    %c0_8 = arith.constant 0 : index
    %c128 = arith.constant 128 : index
    %7 = vector.load %arg5[%c0_8, %c128] : memref<256x512xbf16, #tpu.memory_space<vmem>>, vector<256x128xbf16>
    tpu.vector_store %arg5[%c0_8, %c128], %6 {strides = array<i32>} : memref<256x512xbf16, #tpu.memory_space<vmem>>, vector<256x128xbf16>,
    %c0_9 = arith.constant 0 : index
    %c0_10 = arith.constant 0 : index
    %c2 = arith.constant 2 : index
    %c0_11 = arith.constant 0 : index
    %8 = vector.load %arg2[%c0_9, %c0_10, %c2, %c0_11] : memref<1x1x259x128xf32, #tpu.memory_space<vmem>>, vector<1x1x256x128xf32>
    %9 = vector.shape_cast %8 : vector<1x1x256x128xf32> to vector<256x128xf32>
    %10 = arith.truncf %9 : vector<256x128xf32> to vector<256x128xbf16>
    %c0_12 = arith.constant 0 : index
    %c256 = arith.constant 256 : index
    %11 = vector.load %arg5[%c0_12, %c256] : memref<256x512xbf16, #tpu.memory_space<vmem>>, vector<256x128xbf16>
    tpu.vector_store %arg5[%c0_12, %c256], %10 {strides = array<i32>} : memref<256x512xbf16, #tpu.memory_space<vmem>>, vector<256x128xbf16>,
    %c0_13 = arith.constant 0 : index
    %c0_14 = arith.constant 0 : index
    %c3 = arith.constant 3 : index
    %c0_15 = arith.constant 0 : index
    %12 = vector.load %arg2[%c0_13, %c0_14, %c3, %c0_15] : memref<1x1x259x128xf32, #tpu.memory_space<vmem>>, vector<1x1x256x128xf32>
    %13 = vector.shape_cast %12 : vector<1x1x256x128xf32> to vector<256x128xf32>
    %14 = arith.truncf %13 : vector<256x128xf32> to vector<256x128xbf16>
    %c0_16 = arith.constant 0 : index
    %c384 = arith.constant 384 : index
    %15 = vector.load %arg5[%c0_16, %c384] : memref<256x512xbf16, #tpu.memory_space<vmem>>, vector<256x128xbf16>
    tpu.vector_store %arg5[%c0_16, %c384], %14 {strides = array<i32>} : memref<256x512xbf16, #tpu.memory_space<vmem>>, vector<256x128xbf16>,
    %c0_17 = arith.constant 0 : index
    %c0_18 = arith.constant 0 : index
    %16 = vector.load %arg5[%c0_17, %c0_18] : memref<256x512xbf16, #tpu.memory_space<vmem>>, vector<256x512xbf16>
    %c0_19 = arith.constant 0 : index
    %c0_20 = arith.constant 0 : index
    %17 = vector.load %arg3[%c0_19, %c0_20] : memref<512x768xbf16, #tpu.memory_space<vmem>>, vector<512x768xbf16>
    %cst = arith.constant dense<0.000000e+00> : vector<256x768xf32>
    %18 = tpu.matmul %16, %17, %cst {dimension_numbers = #tpu.dot_dimension_numbers<[1], [0], [0], [1], [0, 0, 1, 1], [], []>} : vector<256x512xbf16>, vector<512x768xbf16>, vector<256x768xf32> -> vector<256x768xf32>
    %19 = vector.extract_strided_slice %18 {offsets = [0, 0], sizes = [256, 384], strides = [1, 1]} : vector<256x768xf32> to vector<256x384xf32>
    %20 = vector.extract_strided_slice %18 {offsets = [0, 384], sizes = [256, 384], strides = [1, 1]} : vector<256x768xf32> to vector<256x384xf32>
    %21 = arith.mulf %19, %19 : vector<256x384xf32>
    %22 = arith.mulf %20, %20 : vector<256x384xf32>
    %23 = arith.addf %21, %22 : vector<256x384xf32>
    %cst_21 = arith.constant 1.000000e-07 : f32
    %24 = vector.broadcast %cst_21 : f32 to vector<256x384xf32>
    %25 = arith.maximumf %23, %24 : vector<256x384xf32>
    %26 = math.sqrt %25 : vector<256x384xf32>
    %27 = tpu.transpose %26, [1, 0] : vector<256x384xf32> -> vector<384x256xf32>
    %28 = vector.extract_strided_slice %27 {offsets = [0, 0], sizes = [257, 256], strides = [1, 1]} : vector<384x256xf32> to vector<257x256xf32>
    %c0_22 = arith.constant 0 : index
    %c0_23 = arith.constant 0 : index
    %c0_24 = arith.constant 0 : index
    %29 = vector.load %arg4[%c0_22, %c0_23, %c0_24] : memref<1x257x256xf32, #tpu.memory_space<vmem>>, vector<1x257x256xf32>
    %30 = vector.shape_cast %29 : vector<1x257x256xf32> to vector<257x256xf32>
    %31 = vector.shape_cast %28 : vector<257x256xf32> to vector<1x257x256xf32>
    tpu.vector_store %arg4[%c0_22, %c0_23, %c0_24], %31 {strides = array<i32>} : memref<1x257x256xf32, #tpu.memory_space<vmem>>, vector<1x257x256xf32>,
    return
  }
  func.func @transform_0(%arg0: i32, %arg1: i32) -> (i32, i32, i32, i32) {
    %c0_i32 = arith.constant 0 : i32
    %c0_i32_0 = arith.constant 0 : i32
    %c0_i32_1 = arith.constant 0 : i32
    return %arg0, %arg1, %c0_i32, %c0_i32_0 : i32, i32, i32, i32
  }
  func.func @transform_1(%arg0: i32, %arg1: i32) -> (i32, i32) {
    %c0_i32 = arith.constant 0 : i32
    %c0_i32_0 = arith.constant 0 : i32
    %c0_i32_1 = arith.constant 0 : i32
    return %c0_i32, %c0_i32_0 : i32, i32
  }
  func.func @transform_2(%arg0: i32, %arg1: i32) -> (i32, i32, i32) {
    %c0_i32 = arith.constant 0 : i32
    %c0_i32_0 = arith.constant 0 : i32
    return %arg0, %c0_i32, %arg1 : i32, i32, i32
  }
}

</mosaic_0001>

<bundles_post_ra>
// kernel: tpu_custom_call.1
= control target key start
LH: loop header
LB: loop body
LE: loop exit
PB: predicated region body
PF: predicated region fallthrough
CT: control target
= control target key end

     0   :  { %7 = vsyncpa [#allocation4], 0  ;;  %s5230_s9 = smov 0   ;;  %s5232_s10 = smov 0   ;;  %s7586_s0 = inlined_call_operand.vmem [shape: f32[2,1,259,128], index: 0, kind: input, shape index: {}]   ;;  %s7587_s1 = inlined_call_operand.hbm [shape: bf16[512,768], index: 1, kind: input, shape index: {}]   ;;  %s7588_s2 = inlined_call_operand.vmem [shape: f32[2,257,256], index: 2, kind: output, shape index: {}]  }
   0x1   :  { %s5234_s11 = smov 0  }
   0x2 LB: > { %s4242_s12 = sadd.s32 4294967295, %s5210_s11   ;;  %s25_s13 = sadd.s32 1, %s5206_s10  ;;  %s5210_s11 = sphi %s5234_s11, %s13_s11   ;;  %s5206_s10 = sphi %s5232_s10, %s7750_s10   ;;  %s5202_s9 = sphi %s5230_s9, %s7749_s9  }
   0x3   : > { %p27_p0 = scmp.ge.s32.totalorder %s25_s13, 2  ;;  %p4244_p1 = scmp.ge.s32.totalorder %s5210_s11, 1 }
   0x4   : > { %p107_p2 = scmp.lt.s32.totalorder %s5210_s11, 3  ;;  %p5255_p4 = scmp.eq.s32.totalorder %s4242_s12, 0 }
   0x5   : > { %s7752_s13 = smov (%p27_p0, %s25_s13), 0  ;;  %s5212_s16 = smov [#allocation3]  }
   0x6   : > { %p5251_p3 = pnand %p4244_p1, %p107_p2  ;;  %s119_s17 = sshll.u32 %s5212_s16, 4  ;;  %s120_s17 = int_to_ptr.vmem [resolvable:$true] %s119_s17 }
   0x7   : > { %s7613_s15 = scalar_select %p5255_p4, 1, 0 }
   0x8   : > { %s7612_s14 = scalar_select %p5251_p3, 1, 0 }
   0x9   : > { %p4643_p5 = pneg %p5251_p3  ;;  %s5156_s21 = scalar_lea.hbm %s7587_s1, 24576 }
   0xa   : > { %p5157_p7 = scmp.ne.s32.totalorder %s7587_s1, %s5156_s21  ;;  %p5163_p11 = scmp.lt.u32.totalorder %s5156_s21, %s7587_s1 }
   0xb   : > { %p5263_p6 = pnand %p5255_p4, %p4643_p5 }
   0xd   : > { %p5158_p8 = pneg %p5263_p6 }
   0xf   : > { %p5159_p9 = pnand %p5158_p8, %p5157_p7 }
  0x11   : > { %p5160_p10 = pneg %p5159_p9 }
  0x13   : > { %p5165_p12 = pnand %p5163_p11, %p5160_p10 }
  0x15   : > { %5168 = shalt.err (!%p5165_p12)
}
  0x16   : > { %s5169_s26 = scalar_lea.vmem %s120_s17, 24576  ;;  %p5177_p2 = scmp.lt.s32.totalorder %s120_s17, %s120_s17 }
  0x17   : > { %p5170_p13 = scmp.ne.s32.totalorder %s120_s17, %s5169_s26  ;;  %p5178_p5 = scmp.lt.s32.totalorder %s5169_s26, %s5169_s26 }
  0x19   : > { %p5172_p0 = pnand %p5170_p13, %p5158_p8  ;;  %p5179_p4 = por %p5178_p5, %p5177_p2 }
  0x1b   : > { %p5173_p1 = pneg %p5172_p0 }
  0x1d   : > { %p5180_p3 = pnand %p5179_p4, %p5173_p1 }
  0x1f   : > { %5183 = shalt.err (!%p5180_p3)
}
  0x20   : > { %s5213_s27 = smov 384   ;;  %s5214_s28 = smov 24  }
  0x21   : > { %4646 = dma.hbm_to_vmem [thread:$0]  (!%p5263_p6), %s7587_s1, 24576, %s120_s17, [#allocation4], %s5213_s27, %s5213_s27, %s5214_s28  }
  0x22   : > { %p7615_p7 = scmp.ne.s32.totalorder %s7612_s14, 0 }
  0x24   : > { %147 = sbr.rel (%p7615_p7) target bundleno = 977 (0x3d1), region = 28 }
  0x2b   : > { %p7616_p9 = scmp.ne.s32.totalorder %s7613_s15, 0 }
  0x2d   : > { %5197 = dma.done.wait (%p7616_p9), [#allocation4], 24576  }
  0x2e   : > { %5199 = vsyncadd (%p7616_p9), [#allocation4], 4294942720  ;;  %v4676_v0 = vld [vmem:[#allocation3 + $0x4] ss:$24 sps:$4 sm:$0xff]   ;;  %v4680_v2 = vld [vmem:[#allocation3] ss:$24 sps:$4 sm:$0xff]  }
  0x2f   : > { %v4678_v1 = vld [vmem:[#allocation3 + $0x304] ss:$24 sps:$4 sm:$0xff]   ;;  %1668 = vmatprep.subr.bf16.mxu1 %v4676_v0  ;;  %v4681_v3 = vld [vmem:[#allocation3 + $0x300] ss:$24 sps:$4 sm:$0xff]   ;;  %v4682_v4 = vld [vmem:[#allocation3 + $0x34] ss:$24 sps:$4 sm:$0xff]  }
  0x30   : > { %1861 = vmatprep.subr.bf16.mxu0 %v4678_v1  ;;  %1669 = vmatpush1.bf16.msra.mxu1 %v4680_v2  ;;  %v4684_v5 = vld [vmem:[#allocation3 + $0x334] ss:$24 sps:$4 sm:$0xff]   ;;  %v4686_v6 = vld [vmem:[#allocation3 + $0x30] ss:$24 sps:$4 sm:$0xff]   ;;  %v4688_v8 = vld [vmem:[#allocation3 + $0x64] ss:$24 sps:$4 sm:$0xff]  }
  0x31   : > { %1862 = vmatpush1.bf16.msra.mxu0 %v4681_v3  ;;  %1670 = vmatprep.subr.bf16.mxu1 %v4682_v4  ;;  %v4687_v7 = vld [vmem:[#allocation3 + $0x330] ss:$24 sps:$4 sm:$0xff]   ;;  %v4690_v9 = vld [vmem:[#allocation3 + $0x364] ss:$24 sps:$4 sm:$0xff]   ;;  %v4692_v10 = vld [vmem:[#allocation3 + $0x60] ss:$24 sps:$4 sm:$0xff]  }
  0x32   : > { %1863 = vmatprep.subr.bf16.mxu0 %v4684_v5  ;;  %v4693_v11 = vld [vmem:[#allocation3 + $0x360] ss:$24 sps:$4 sm:$0xff]   ;;  %v4694_v12 = vld [vmem:[#allocation3 + $0x94] ss:$24 sps:$4 sm:$0xff]   ;;  %v4698_v14 = vld [vmem:[#allocation3 + $0x90] ss:$24 sps:$4 sm:$0xff]  }
  0x33   : > { %v4696_v13 = vld [vmem:[#allocation3 + $0x394] ss:$24 sps:$4 sm:$0xff]   ;;  %v4699_v15 = vld [vmem:[#allocation3 + $0x390] ss:$24 sps:$4 sm:$0xff]   ;;  %v4700_v16 = vld [vmem:[#allocation3 + $0xc4] ss:$24 sps:$4 sm:$0xff]  }
  0x34   : > { %1671 = vmatpush1.bf16.msra.mxu1 %v4686_v6  ;;  %v4702_v17 = vld [vmem:[#allocation3 + $0x3c4] ss:$24 sps:$4 sm:$0xff]   ;;  %v4704_v18 = vld [vmem:[#allocation3 + $0xc0] ss:$24 sps:$4 sm:$0xff]   ;;  %v4706_v20 = vld [vmem:[#allocation3 + $0xf4] ss:$24 sps:$4 sm:$0xff]  }
  0x35   : > { %1864 = vmatpush1.bf16.msra.mxu0 %v4687_v7  ;;  %1672 = vmatprep.subr.bf16.mxu1 %v4688_v8  ;;  %v4705_v19 = vld [vmem:[#allocation3 + $0x3c0] ss:$24 sps:$4 sm:$0xff]   ;;  %v4708_v21 = vld [vmem:[#allocation3 + $0x3f4] ss:$24 sps:$4 sm:$0xff]   ;;  %v4710_v22 = vld [vmem:[#allocation3 + $0xf0] ss:$24 sps:$4 sm:$0xff]  }
  0x36   : > { %1865 = vmatprep.subr.bf16.mxu0 %v4690_v9  ;;  %v4711_v23 = vld [vmem:[#allocation3 + $0x3f0] ss:$24 sps:$4 sm:$0xff]   ;;  %v4712_v24 = vld [vmem:[#allocation3 + $0x124] ss:$24 sps:$4 sm:$0xff]   ;;  %v4716_v26 = vld [vmem:[#allocation3 + $0x120] ss:$24 sps:$4 sm:$0xff]  }
  0x37   : > { %v4714_v25 = vld [vmem:[#allocation3 + $0x424] ss:$24 sps:$4 sm:$0xff]   ;;  %v4717_v27 = vld [vmem:[#allocation3 + $0x420] ss:$24 sps:$4 sm:$0xff]   ;;  %v4718_v28 = vld [vmem:[#allocation3 + $0x154] ss:$24 sps:$4 sm:$0xff]  }
  0x38   : > { %1673 = vmatpush1.bf16.msra.mxu1 %v4692_v10  ;;  %v4720_v29 = vld [vmem:[#allocation3 + $0x454] ss:$24 sps:$4 sm:$0xff]   ;;  %v4722_v30 = vld [vmem:[#allocation3 + $0x150] ss:$24 sps:$4 sm:$0xff]   ;;  %p177_p3 = scmp.lt.s32.totalorder %s5202_s9, 1 }
  0x39   : > { %1866 = vmatpush1.bf16.msra.mxu0 %v4693_v11  ;;  %1674 = vmatprep.subr.bf16.mxu1 %v4694_v12  ;;  %v4723_v31 = vld [vmem:[#allocation3 + $0x450] ss:$24 sps:$4 sm:$0xff]   ;;  %v4724_v32 = vld [vmem:[#allocation3 + $0x184] ss:$24 sps:$4 sm:$0xff]   ;;  %v4728_v34 = vld [vmem:[#allocation3 + $0x180] ss:$24 sps:$4 sm:$0xff]  }
  0x3a   : > { %1867 = vmatprep.subr.bf16.mxu0 %v4696_v13  ;;  %v4726_v33 = vld [vmem:[#allocation3 + $0x484] ss:$24 sps:$4 sm:$0xff]   ;;  %v4729_v35 = vld [vmem:[#allocation3 + $0x480] ss:$24 sps:$4 sm:$0xff]   ;;  %s7754_s9 = smov (!%p177_p3, %s5202_s9), 1 }
  0x3b   : > { %v4730_v36 = vld [vmem:[#allocation3 + $0x1b4] ss:$24 sps:$4 sm:$0xff]   ;;  %v4734_v38 = vld [vmem:[#allocation3 + $0x1b0] ss:$24 sps:$4 sm:$0xff]   ;;  %s4637_s3 = smul.u32 264, %s7754_s9 }
  0x3c   : > { %1675 = vmatpush1.bf16.msra.mxu1 %v4698_v14  ;;  %v4732_v37 = vld [vmem:[#allocation3 + $0x4b4] ss:$24 sps:$4 sm:$0xff]   ;;  %v4735_v39 = vld [vmem:[#allocation3 + $0x4b0] ss:$24 sps:$4 sm:$0xff]   ;;  %v4736_v40 = vld [vmem:[#allocation3 + $0x1e4] ss:$24 sps:$4 sm:$0xff]  }
  0x3d   : > { %1868 = vmatpush1.bf16.msra.mxu0 %v4699_v15  ;;  %1676 = vmatprep.subr.bf16.mxu1 %v4700_v16  ;;  %v4738_v41 = vld [vmem:[#allocation3 + $0x4e4] ss:$24 sps:$4 sm:$0xff]   ;;  %v4740_v42 = vld [vmem:[#allocation3 + $0x1e0] ss:$24 sps:$4 sm:$0xff]   ;;  %s5297_s6 = scalar_lea.vmem %s7586_s0, %s4637_s3  ;;  %v4742_v44 = vld [vmem:[#allocation3 + $0x214] ss:$24 sps:$4 sm:$0xff]  }
  0x3e   : > { %1869 = vmatprep.subr.bf16.mxu0 %v4702_v17  ;;  %v4741_v43 = vld [vmem:[#allocation3 + $0x4e0] ss:$24 sps:$4 sm:$0xff]   ;;  %v4744_v45 = vld [vmem:[#allocation3 + $0x514] ss:$24 sps:$4 sm:$0xff]   ;;  %v4746_v50 = vld [vmem:[#allocation3 + $0x210] ss:$24 sps:$4 sm:$0xff]  }
  0x3f   : > { %v260_v46 = vld [vmem:[%s5297_s6 + $0x1] sm:$0xff]  ;;  %v261_v47 = vld [vmem:[%s5297_s6 + $0x9] sm:$0xff]  ;;  %v262_v11 = vld [vmem:[%s5297_s6 + $0x11] sm:$0xff]  ;;  %s4638_s7 = smul.u32 528, %s7754_s9 }
  0x40   : > { %1677 = vmatpush1.bf16.msra.mxu1 %v4704_v18  ;;  %v388_v48 = vld [vmem:[%s5297_s6 + $0x3] sm:$0xff]  ;;  %v389_v49 = vld [vmem:[%s5297_s6 + $0xb] sm:$0xff]  ;;  %v5303_v53 = vpack.c.bf16 %v261_v47, %v260_v46  ;;  %v263_v12 = vld [vmem:[%s5297_s6 + $0x19] sm:$0xff] }
  0x41   : > { %1870 = vmatpush1.bf16.msra.mxu0 %v4705_v19  ;;  %1678 = vmatprep.subr.bf16.mxu1 %v4706_v20  ;;  %v4747_v51 = vld [vmem:[#allocation3 + $0x510] ss:$24 sps:$4 sm:$0xff]   ;;  %v4748_v52 = vld [vmem:[#allocation3 + $0x244] ss:$24 sps:$4 sm:$0xff]   ;;  %v5305_v54 = vpack.c.bf16 %v389_v49, %v388_v48  ;;  %v4752_v56 = vld [vmem:[#allocation3 + $0x240] ss:$24 sps:$4 sm:$0xff]   ;;  %v5321_v18 = vpack.c.bf16 %v263_v12, %v262_v11  ;;  %s7181_s12 = scalar_lea.vmem %s7588_s2, %s4638_s7 }
  0x42   : > { %1871 = vmatprep.subr.bf16.mxu0 %v4708_v21  ;;  %v4750_v55 = vld [vmem:[#allocation3 + $0x544] ss:$24 sps:$4 sm:$0xff]   ;;  %1700 = vmatprep.mubr.bf16.mxu1 %v5303_v53  ;;  %v4753_v57 = vld [vmem:[#allocation3 + $0x540] ss:$24 sps:$4 sm:$0xff]   ;;  %v4754_v58 = vld [vmem:[#allocation3 + $0x274] ss:$24 sps:$4 sm:$0xff]  }
  0x43   : > { %1893 = vmatprep.mubr.bf16.mxu0 %v5305_v54  ;;  %v4756_v59 = vld [vmem:[#allocation3 + $0x574] ss:$24 sps:$4 sm:$0xff]   ;;  %v4758_v60 = vld [vmem:[#allocation3 + $0x270] ss:$24 sps:$4 sm:$0xff]   ;;  %v4760_v62 = vld [vmem:[#allocation3 + $0x2a4] ss:$24 sps:$4 sm:$0xff]  }
  0x44   : > { %1679 = vmatpush1.bf16.msra.mxu1 %v4710_v22  ;;  %v4759_v61 = vld [vmem:[#allocation3 + $0x570] ss:$24 sps:$4 sm:$0xff]   ;;  %v4762_v63 = vld [vmem:[#allocation3 + $0x5a4] ss:$24 sps:$4 sm:$0xff]   ;;  %v4764_v0 = vld [vmem:[#allocation3 + $0x2a0] ss:$24 sps:$4 sm:$0xff]  }
  0x45   : > { %1872 = vmatpush1.bf16.msra.mxu0 %v4711_v23  ;;  %1680 = vmatprep.subr.bf16.mxu1 %v4712_v24  ;;  %v4765_v1 = vld [vmem:[#allocation3 + $0x5a0] ss:$24 sps:$4 sm:$0xff]   ;;  %v4766_v2 = vld [vmem:[#allocation3 + $0x2d4] ss:$24 sps:$4 sm:$0xff]   ;;  %v4770_v4 = vld [vmem:[#allocation3 + $0x2d0] ss:$24 sps:$4 sm:$0xff]  }
  0x46   : > { %1873 = vmatprep.subr.bf16.mxu0 %v4714_v25  ;;  %v4768_v3 = vld [vmem:[#allocation3 + $0x5d4] ss:$24 sps:$4 sm:$0xff]   ;;  %v4771_v5 = vld [vmem:[#allocation3 + $0x5d0] ss:$24 sps:$4 sm:$0xff]   ;;  %v196_v6 = vld [vmem:[%s5297_s6] sm:$0xff] }
  0x47   : > { %v197_v7 = vld [vmem:[%s5297_s6 + $0x8] sm:$0xff]  ;;  %v390_v13 = vld [vmem:[%s5297_s6 + $0x13] sm:$0xff]  ;;  %v391_v14 = vld [vmem:[%s5297_s6 + $0x1b] sm:$0xff] }
  0x48   : > { %1681 = vmatpush1.bf16.msra.mxu1 %v4716_v26  ;;  %v324_v8 = vld [vmem:[%s5297_s6 + $0x2] sm:$0xff]  ;;  %v325_v9 = vld [vmem:[%s5297_s6 + $0xa] sm:$0xff]  ;;  %v5317_v15 = vpack.c.bf16 %v197_v7, %v196_v6  ;;  %v5323_v19 = vpack.c.bf16 %v391_v14, %v390_v13  ;;  %v4777_v20 = vld [vmem:[#allocation3 + $0x3c] ss:$24 sps:$4 sm:$0xff]  }
  0x49   : > { %1874 = vmatpush1.bf16.msra.mxu0 %v4717_v27  ;;  %1682 = vmatprep.subr.bf16.mxu1 %v4718_v28  ;;  %v4774_v10 = vld [vmem:[#allocation3 + $0xc] ss:$24 sps:$4 sm:$0xff]   ;;  %v5319_v16 = vpack.c.bf16 %v325_v9, %v324_v8  ;;  %v4772_v17 = vld [vmem:[#allocation3 + $0x8] ss:$24 sps:$4 sm:$0xff]   ;;  %v198_v21 = vld [vmem:[%s5297_s6 + $0x10] sm:$0xff] }
  0x4a   : > { %1875 = vmatprep.subr.bf16.mxu0 %v4720_v29  ;;  %v199_v22 = vld [vmem:[%s5297_s6 + $0x18] sm:$0xff]  ;;  %v264_v26 = vld [vmem:[%s5297_s6 + $0x21] sm:$0xff]  ;;  %v265_v27 = vld [vmem:[%s5297_s6 + $0x29] sm:$0xff] }
  0x4b   : > { %v326_v23 = vld [vmem:[%s5297_s6 + $0x12] sm:$0xff]  ;;  %v327_v24 = vld [vmem:[%s5297_s6 + $0x1a] sm:$0xff]  ;;  %v392_v28 = vld [vmem:[%s5297_s6 + $0x23] sm:$0xff] }
  0x4c   : > { %1683 = vmatpush1.bf16.msra.mxu1 %v4722_v30  ;;  %v4775_v25 = vld [vmem:[#allocation3 + $0x38] ss:$24 sps:$4 sm:$0xff]   ;;  %v4780_v30 = vld [vmem:[#allocation3 + $0x6c] ss:$24 sps:$4 sm:$0xff]   ;;  %v4790_v11 = vld [vmem:[#allocation3 + $0x128] ss:$24 sps:$4 sm:$0xff]  }
  0x4d   : > { %1876 = vmatpush1.bf16.msra.mxu0 %v4723_v31  ;;  %1684 = vmatprep.subr.bf16.mxu1 %v4724_v32  ;;  %v393_v29 = vld [vmem:[%s5297_s6 + $0x2b] sm:$0xff]  ;;  %v5337_v31 = vpack.c.bf16 %v199_v22, %v198_v21  ;;  %v5339_v32 = vpack.c.bf16 %v327_v24, %v326_v23  ;;  %v395_v46 = vld [vmem:[%s5297_s6 + $0x3b] sm:$0xff] }
  0x4e   : > { %1877 = vmatprep.subr.bf16.mxu0 %v4726_v33  ;;  %v5341_v33 = vpack.c.bf16 %v265_v27, %v264_v26  ;;  %v4781_v47 = vld [vmem:[#allocation3 + $0x98] ss:$24 sps:$4 sm:$0xff]   ;;  %v4786_v48 = vld [vmem:[#allocation3 + $0xcc] ss:$24 sps:$4 sm:$0xff]   ;;  %v4795_v21 = vld [vmem:[#allocation3 + $0x15c] ss:$24 sps:$4 sm:$0xff]  }
  0x4f   : > { %v4810_v6 = vld [vmem:[#allocation3 + $0x74] ss:$24 sps:$4 sm:$0xff]   ;;  %v4813_v12 = vld [vmem:[#allocation3 + $0xa4] ss:$24 sps:$4 sm:$0xff]   ;;  %v4811_v22 = vld [vmem:[#allocation3 + $0xa0] ss:$24 sps:$4 sm:$0xff]  }
  0x50   : > { %1685 = vmatpush1.bf16.msra.mxu1 %v4728_v34  ;;  %v5343_v34 = vpack.c.bf16 %v393_v29, %v392_v28  ;;  %v204_v13 = vld [vmem:[%s5297_s6 + $0x40] sm:$0xff]  ;;  %v205_v14 = vld [vmem:[%s5297_s6 + $0x48] sm:$0xff]  ;;  %v270_v23 = vld [vmem:[%s5297_s6 + $0x51] sm:$0xff] }
  0x51   : > { %1878 = vmatpush1.bf16.msra.mxu0 %v4729_v35  ;;  %1686 = vmatprep.subr.bf16.mxu1 %v4730_v36  ;;  %v4778_v35 = vld [vmem:[#allocation3 + $0x68] ss:$24 sps:$4 sm:$0xff]   ;;  %v4793_v27 = vld [vmem:[#allocation3 + $0x158] ss:$24 sps:$4 sm:$0xff]   ;;  %v4819_v28 = vld [vmem:[#allocation3 + $0xd4] ss:$24 sps:$4 sm:$0xff]  }
  0x52   : > { %1879 = vmatprep.subr.bf16.mxu0 %v4732_v37  ;;  %v200_v36 = vld [vmem:[%s5297_s6 + $0x20] sm:$0xff]  ;;  %v201_v37 = vld [vmem:[%s5297_s6 + $0x28] sm:$0xff] }
  0x53   : > { %v5357_v49 = vpack.c.bf16 %v201_v37, %v200_v36  ;;  %v271_v24 = vld [vmem:[%s5297_s6 + $0x59] sm:$0xff]  ;;  %v4801_v29 = vld [vmem:[#allocation3 + $0x18c] ss:$24 sps:$4 sm:$0xff]  }
  0x54   : > { %1687 = vmatpush1.bf16.msra.mxu1 %v4734_v38  ;;  %v328_v38 = vld [vmem:[%s5297_s6 + $0x22] sm:$0xff]  ;;  %v5401_v37 = vpack.c.bf16 %v271_v24, %v270_v23 }
  0x55   : > { %1880 = vmatpush1.bf16.msra.mxu0 %v4735_v39  ;;  %1688 = vmatprep.subr.bf16.mxu1 %v4736_v40  ;;  %v4783_v39 = vld [vmem:[#allocation3 + $0x9c] ss:$24 sps:$4 sm:$0xff]   ;;  %v4796_v40 = vld [vmem:[#allocation3 + $0x10] ss:$24 sps:$4 sm:$0xff]   ;;  %v4834_v23 = vld [vmem:[#allocation3 + $0x24c] ss:$24 sps:$4 sm:$0xff]  }
  0x56   : > { %1881 = vmatprep.subr.bf16.mxu0 %v4738_v41  ;;  %v4798_v41 = vld [vmem:[#allocation3 + $0x14] ss:$24 sps:$4 sm:$0xff]   ;;  %v399_v26 = vld [vmem:[%s5297_s6 + $0x5b] sm:$0xff]  ;;  %v4835_v24 = vld [vmem:[#allocation3 + $0x190] ss:$24 sps:$4 sm:$0xff]  }
  0x58   : > { %1689 = vmatpush1.bf16.msra.mxu1 %v4740_v42  ;;  %v329_v42 = vld [vmem:[%s5297_s6 + $0x2a] sm:$0xff] }
  0x59   : > { %1882 = vmatpush1.bf16.msra.mxu0 %v4741_v43  ;;  %1690 = vmatprep.subr.bf16.mxu1 %v4742_v44  ;;  %v266_v43 = vld [vmem:[%s5297_s6 + $0x31] sm:$0xff]  ;;  %v267_v44 = vld [vmem:[%s5297_s6 + $0x39] sm:$0xff] }
  0x5a   : > { %1883 = vmatprep.subr.bf16.mxu0 %v4744_v45  ;;  %v394_v45 = vld [vmem:[%s5297_s6 + $0x33] sm:$0xff] }
  0x5c   : > { %1691 = vmatpush1.bf16.msra.mxu1 %v4746_v50  ;;  %v5359_v50 = vpack.c.bf16 %v329_v42, %v328_v38  ;;  %v207_v42 = vld [vmem:[%s5297_s6 + $0x58] sm:$0xff] }
  0x5d   : > { %1884 = vmatpush1.bf16.msra.mxu0 %v4747_v51  ;;  %1692 = vmatprep.subr.bf16.mxu1 %v4748_v52  ;;  %v5361_v51 = vpack.c.bf16 %v267_v44, %v266_v43  ;;  %v5363_v52 = vpack.c.bf16 %v395_v46, %v394_v45  ;;  %v334_v43 = vld [vmem:[%s5297_s6 + $0x52] sm:$0xff]  ;;  %v335_v44 = vld [vmem:[%s5297_s6 + $0x5a] sm:$0xff] }
  0x5e   : > { %1885 = vmatprep.subr.bf16.mxu0 %v4750_v55  ;;  %v4784_v55 = vld [vmem:[#allocation3 + $0xc8] ss:$24 sps:$4 sm:$0xff]   ;;  %v4807_v45 = vld [vmem:[#allocation3 + $0x1bc] ss:$24 sps:$4 sm:$0xff]  }
  0x5f   : > { %v4820_v46 = vld [vmem:[#allocation3 + $0x100] ss:$24 sps:$4 sm:$0xff]  }
  0x60   : > { %1693 = vmatpush1.bf16.msra.mxu1 %v4752_v56  ;;  %v4804_v56 = vld [vmem:[#allocation3 + $0x44] ss:$24 sps:$4 sm:$0xff]  }
  0x61   : > { %1886 = vmatpush1.bf16.msra.mxu0 %v4753_v57  ;;  %1694 = vmatprep.subr.bf16.mxu1 %v4754_v58  ;;  %v202_v57 = vld [vmem:[%s5297_s6 + $0x30] sm:$0xff]  ;;  %v203_v58 = vld [vmem:[%s5297_s6 + $0x38] sm:$0xff] }
  0x62   : > { %1887 = vmatprep.subr.bf16.mxu0 %v4756_v59  ;;  %v330_v59 = vld [vmem:[%s5297_s6 + $0x32] sm:$0xff]  ;;  %v5377_v7 = vpack.c.bf16 %v203_v58, %v202_v57 }
  0x63   : > { %v401_v57 = vld [vmem:[%s5297_s6 + $0x6b] sm:$0xff] }
  0x64   : > { %1695 = vmatpush1.bf16.msra.mxu1 %v4758_v60  ;;  %v331_v60 = vld [vmem:[%s5297_s6 + $0x3a] sm:$0xff] }
  0x65   : > { %1888 = vmatpush1.bf16.msra.mxu0 %v4759_v61  ;;  %1696 = vmatprep.subr.bf16.mxu1 %v4760_v62  ;;  %v4789_v61 = vld [vmem:[#allocation3 + $0xfc] ss:$24 sps:$4 sm:$0xff]   ;;  %v4802_v62 = vld [vmem:[#allocation3 + $0x40] ss:$24 sps:$4 sm:$0xff]   ;;  %v5379_v8 = vpack.c.bf16 %v331_v60, %v330_v59  ;;  %v4816_v59 = vld [vmem:[#allocation3 + $0x1ec] ss:$24 sps:$4 sm:$0xff]  }
  0x66   : > { %1889 = vmatprep.subr.bf16.mxu0 %v4762_v63  ;;  %v268_v63 = vld [vmem:[%s5297_s6 + $0x41] sm:$0xff]  ;;  %v4805_v58 = vld [vmem:[#allocation3 + $0x1b8] ss:$24 sps:$4 sm:$0xff]  }
  0x67   : > { %v4826_v60 = vld [vmem:[#allocation3 + $0x130] ss:$24 sps:$4 sm:$0xff]  }
  0x68   : > { %1697 = vmatpush1.bf16.msra.mxu1 %v4764_v0  ;;  %v269_v0 = vld [vmem:[%s5297_s6 + $0x49] sm:$0xff] }
  0x69   : > { %1890 = vmatpush1.bf16.msra.mxu0 %v4765_v1  ;;  %1698 = vmatprep.subr.bf16.mxu1 %v4766_v2  ;;  %v396_v1 = vld [vmem:[%s5297_s6 + $0x43] sm:$0xff]  ;;  %v397_v2 = vld [vmem:[%s5297_s6 + $0x4b] sm:$0xff]  ;;  %v5381_v9 = vpack.c.bf16 %v269_v0, %v268_v63 }
  0x6a   : > { %1891 = vmatprep.subr.bf16.mxu0 %v4768_v3  ;;  %v4787_v3 = vld [vmem:[#allocation3 + $0xf8] ss:$24 sps:$4 sm:$0xff]  }
  0x6c   : > { %1699 = vmatpush1.bf16.msra.mxu1 %v4770_v4  ;;  %v4792_v4 = vld [vmem:[#allocation3 + $0x12c] ss:$24 sps:$4 sm:$0xff]  }
  0x6d   : > { %1892 = vmatpush1.bf16.msra.mxu0 %v4771_v5  ;;  %2054 = vmatprep.subr.bf16.mxu1 %v4774_v10  ;;  %v4808_v5 = vld [vmem:[#allocation3 + $0x70] ss:$24 sps:$4 sm:$0xff]   ;;  %v5383_v10 = vpack.c.bf16 %v397_v2, %v396_v1  ;;  %v4831_v2 = vld [vmem:[#allocation3 + $0x164] ss:$24 sps:$4 sm:$0xff]  }
  0x6e   : > { %2440 = vmatprep.subr.bf16.mxu0 %v4798_v41  ;;  %v206_v41 = vld [vmem:[%s5297_s6 + $0x50] sm:$0xff]  ;;  %v4814_v1 = vld [vmem:[#allocation3 + $0x1e8] ss:$24 sps:$4 sm:$0xff]  }
  0x6f   : > { %1701 = vmatmul.mubr.bf16.vlgmr.msra.gmra.mrb[0].mxu1 %v5317_v15 }
  0x70   : > { %1894 = vmatmul.mubr.bf16.vlgmr.msra.gmra.mrb[0].mxu0 %v5319_v16  ;;  %2055 = vmatpush1.bf16.msra.mxu1 %v4772_v17  ;;  %v332_v17 = vld [vmem:[%s5297_s6 + $0x42] sm:$0xff] }
  0x71   : > { %1710 = vmatprep.mubr.bf16.mxu1 %v5321_v18  ;;  %1903 = vmatprep.mubr.bf16.mxu0 %v5323_v19 }
  0x72   : > { %2056 = vmatprep.subr.bf16.mxu1 %v4777_v20  ;;  %2441 = vmatpush1.bf16.msra.mxu0 %v4796_v40  ;;  %v333_v20 = vld [vmem:[%s5297_s6 + $0x4a] sm:$0xff]  ;;  %v4822_v40 = vld [vmem:[#allocation3 + $0x104] ss:$24 sps:$4 sm:$0xff]  }
  0x73   : > { %2442 = vmatprep.subr.bf16.mxu0 %v4804_v56  ;;  %v5399_v36 = vpack.c.bf16 %v333_v20, %v332_v17  ;;  %v400_v56 = vld [vmem:[%s5297_s6 + $0x63] sm:$0xff]  ;;  %v275_v17 = vld [vmem:[%s5297_s6 + $0x79] sm:$0xff] }
  0x74   : > { %2057 = vmatpush1.bf16.msra.mxu1 %v4775_v25  ;;  %v398_v25 = vld [vmem:[%s5297_s6 + $0x53] sm:$0xff]  ;;  %v5423_v0 = vpack.c.bf16 %v401_v57, %v400_v56 }
  0x75   : > { %2058 = vmatprep.subr.bf16.mxu1 %v4780_v30  ;;  %v4817_v30 = vld [vmem:[#allocation3 + $0xd0] ss:$24 sps:$4 sm:$0xff]   ;;  %v5403_v38 = vpack.c.bf16 %v399_v26, %v398_v25 }
  0x76   : > { %2443 = vmatpush1.bf16.msra.mxu0 %v4802_v62  ;;  %v5419_v62 = vpack.c.bf16 %v335_v44, %v334_v43  ;;  %v402_v20 = vld [vmem:[%s5297_s6 + $0x73] sm:$0xff] }
  0x77   : > { %1711 = vmatmul.mubr.bf16.gmra.mrb[4].mxu1 %v5337_v31  ;;  %2444 = vmatprep.subr.bf16.mxu0 %v4810_v6  ;;  %v4829_v6 = vld [vmem:[#allocation3 + $0x160] ss:$24 sps:$4 sm:$0xff]   ;;  %v4843_v43 = vld [vmem:[#allocation3 + $0x27c] ss:$24 sps:$4 sm:$0xff]   ;;  %v4844_v57 = vld [vmem:[#allocation3 + $0x1f0] ss:$24 sps:$4 sm:$0xff]  }
  0x78   : > { %1904 = vmatmul.mubr.bf16.gmra.mrb[4].mxu0 %v5339_v32  ;;  %1720 = vmatprep.mubr.bf16.mxu1 %v5341_v33  ;;  %v339_v44 = vld [vmem:[%s5297_s6 + $0x7a] sm:$0xff] }
  0x79   : > { %1913 = vmatprep.mubr.bf16.mxu0 %v5343_v34  ;;  %2059 = vmatpush1.bf16.msra.mxu1 %v4778_v35  ;;  %v5397_v35 = vpack.c.bf16 %v205_v14, %v204_v13  ;;  %v337_v13 = vld [vmem:[%s5297_s6 + $0x6a] sm:$0xff] }
  0x7a   : > { %2060 = vmatprep.subr.bf16.mxu1 %v4783_v39  ;;  %2445 = vmatpush1.bf16.msra.mxu0 %v4808_v5  ;;  %v4799_v39 = vld [vmem:[#allocation3 + $0x188] ss:$24 sps:$4 sm:$0xff]   ;;  %v4825_v5 = vld [vmem:[#allocation3 + $0x21c] ss:$24 sps:$4 sm:$0xff]   ;;  %v4841_v56 = vld [vmem:[#allocation3 + $0x278] ss:$24 sps:$4 sm:$0xff]  }
  0x7b   : > { %2446 = vmatprep.subr.bf16.mxu0 %v4813_v12  ;;  %v4837_v12 = vld [vmem:[#allocation3 + $0x194] ss:$24 sps:$4 sm:$0xff]  }
  0x7c   : > { %v274_v14 = vld [vmem:[%s5297_s6 + $0x71] sm:$0xff] }
  0x7d   : > { %2061 = vmatpush1.bf16.msra.mxu1 %v4781_v47  ;;  %v272_v47 = vld [vmem:[%s5297_s6 + $0x61] sm:$0xff] }
  0x7e   : > { %2062 = vmatprep.subr.bf16.mxu1 %v4786_v48  ;;  %2447 = vmatpush1.bf16.msra.mxu0 %v4811_v22  ;;  %v4828_v48 = vld [vmem:[#allocation3 + $0x134] ss:$24 sps:$4 sm:$0xff]   ;;  %v4823_v22 = vld [vmem:[#allocation3 + $0x218] ss:$24 sps:$4 sm:$0xff]  }
  0x7f   : > { %1721 = vmatmul.mubr.bf16.gmra.mrb[8].mxu1 %v5357_v49  ;;  %2448 = vmatprep.subr.bf16.mxu0 %v4819_v28 }
  0x80   : > { %1914 = vmatmul.mubr.bf16.gmra.mrb[8].mxu0 %v5359_v50  ;;  %1730 = vmatprep.mubr.bf16.mxu1 %v5361_v51 }
  0x81   : > { %1923 = vmatprep.mubr.bf16.mxu0 %v5363_v52  ;;  %2063 = vmatpush1.bf16.msra.mxu1 %v4784_v55  ;;  %v273_v55 = vld [vmem:[%s5297_s6 + $0x69] sm:$0xff] }
  0x82   : > { %2064 = vmatprep.subr.bf16.mxu1 %v4789_v61  ;;  %2449 = vmatpush1.bf16.msra.mxu0 %v4817_v30  ;;  %v5417_v61 = vpack.c.bf16 %v207_v42, %v206_v41  ;;  %v5421_v63 = vpack.c.bf16 %v273_v55, %v272_v47  ;;  %v4840_v30 = vld [vmem:[#allocation3 + $0x1c4] ss:$24 sps:$4 sm:$0xff]   ;;  %v338_v41 = vld [vmem:[%s5297_s6 + $0x72] sm:$0xff]  ;;  %v277_v47 = vld [vmem:[%s5297_s6 + $0x89] sm:$0xff] }
  0x83   : > { %2450 = vmatprep.subr.bf16.mxu0 %v4822_v40  ;;  %v211_v40 = vld [vmem:[%s5297_s6 + $0x78] sm:$0xff]  ;;  %v405_v55 = vld [vmem:[%s5297_s6 + $0x8b] sm:$0xff] }
  0x84   : > { %v4838_v42 = vld [vmem:[#allocation3 + $0x1c0] ss:$24 sps:$4 sm:$0xff]  }
  0x85   : > { %2065 = vmatpush1.bf16.msra.mxu1 %v4787_v3  ;;  %v208_v3 = vld [vmem:[%s5297_s6 + $0x60] sm:$0xff] }
  0x86   : > { %2066 = vmatprep.subr.bf16.mxu1 %v4792_v4  ;;  %2451 = vmatpush1.bf16.msra.mxu0 %v4820_v46  ;;  %v209_v4 = vld [vmem:[%s5297_s6 + $0x68] sm:$0xff] }
  0x87   : > { %1731 = vmatmul.mubr.bf16.gmra.mrb[12].mxu1 %v5377_v7  ;;  %2452 = vmatprep.subr.bf16.mxu0 %v4828_v48  ;;  %v5437_v25 = vpack.c.bf16 %v209_v4, %v208_v3  ;;  %v4846_v46 = vld [vmem:[#allocation3 + $0x1f4] ss:$24 sps:$4 sm:$0xff]   ;;  %v404_v48 = vld [vmem:[%s5297_s6 + $0x83] sm:$0xff] }
  0x88   : > { %1924 = vmatmul.mubr.bf16.gmra.mrb[12].mxu0 %v5379_v8  ;;  %1740 = vmatprep.mubr.bf16.mxu1 %v5381_v9  ;;  %v4849_v3 = vld [vmem:[#allocation3 + $0x224] ss:$24 sps:$4 sm:$0xff]   ;;  %v4850_v4 = vld [vmem:[#allocation3 + $0x2a8] ss:$24 sps:$4 sm:$0xff]  }
  0x89   : > { %1933 = vmatprep.mubr.bf16.mxu0 %v5383_v10  ;;  %2067 = vmatpush1.bf16.msra.mxu1 %v4790_v11  ;;  %v336_v11 = vld [vmem:[%s5297_s6 + $0x62] sm:$0xff] }
  0x8a   : > { %2068 = vmatprep.subr.bf16.mxu1 %v4795_v21  ;;  %2453 = vmatpush1.bf16.msra.mxu0 %v4826_v60  ;;  %v403_v21 = vld [vmem:[%s5297_s6 + $0x7b] sm:$0xff]  ;;  %v5439_v26 = vpack.c.bf16 %v337_v13, %v336_v11  ;;  %v5459_v60 = vpack.c.bf16 %v339_v44, %v338_v41  ;;  %v214_v44 = vld [vmem:[%s5297_s6 + $0x90] sm:$0xff] }
  0x8b   : > { %2454 = vmatprep.subr.bf16.mxu0 %v4831_v2  ;;  %v5443_v28 = vpack.c.bf16 %v403_v21, %v402_v20  ;;  %v5463_v2 = vpack.c.bf16 %v405_v55, %v404_v48  ;;  %v340_v11 = vld [vmem:[%s5297_s6 + $0x82] sm:$0xff]  ;;  %v406_v20 = vld [vmem:[%s5297_s6 + $0x93] sm:$0xff] }
  0x8c   : > { %v4847_v13 = vld [vmem:[#allocation3 + $0x220] ss:$24 sps:$4 sm:$0xff]  }
  0x8d   : > { %2069 = vmatpush1.bf16.msra.mxu1 %v4793_v27  ;;  %v5441_v27 = vpack.c.bf16 %v275_v17, %v274_v14  ;;  %v278_v14 = vld [vmem:[%s5297_s6 + $0x91] sm:$0xff]  ;;  %v279_v17 = vld [vmem:[%s5297_s6 + $0x99] sm:$0xff]  ;;  %v280_v55 = vld [vmem:[%s5297_s6 + $0xa1] sm:$0xff] }
  0x8e   : > { %2070 = vmatprep.subr.bf16.mxu1 %v4801_v29  ;;  %2455 = vmatpush1.bf16.msra.mxu0 %v4829_v6  ;;  %v4832_v29 = vld [vmem:[#allocation3 + $0x248] ss:$24 sps:$4 sm:$0xff]  }
  0x8f   : > { %1741 = vmatmul.mubr.bf16.gmra.mrb[16].mxu1 %v5397_v35  ;;  %2456 = vmatprep.subr.bf16.mxu0 %v4837_v12  ;;  %v213_v6 = vld [vmem:[%s5297_s6 + $0x88] sm:$0xff]  ;;  %v407_v21 = vld [vmem:[%s5297_s6 + $0x9b] sm:$0xff] }
  0x90   : > { %1934 = vmatmul.mubr.bf16.gmra.mrb[16].mxu0 %v5399_v36  ;;  %1750 = vmatprep.mubr.bf16.mxu1 %v5401_v37  ;;  %v341_v12 = vld [vmem:[%s5297_s6 + $0x8a] sm:$0xff]  ;;  %v5483_v41 = vpack.c.bf16 %v407_v21, %v406_v20  ;;  %v4856_v48 = vld [vmem:[#allocation3 + $0x280] ss:$24 sps:$4 sm:$0xff]  }
  0x91   : > { %1943 = vmatprep.mubr.bf16.mxu0 %v5403_v38  ;;  %2071 = vmatpush1.bf16.msra.mxu1 %v4799_v39  ;;  %v210_v39 = vld [vmem:[%s5297_s6 + $0x70] sm:$0xff]  ;;  %v344_v20 = vld [vmem:[%s5297_s6 + $0xa2] sm:$0xff] }
  0x92   : > { %2072 = vmatprep.subr.bf16.mxu1 %v4807_v45  ;;  %2457 = vmatpush1.bf16.msra.mxu0 %v4835_v24  ;;  %v276_v45 = vld [vmem:[%s5297_s6 + $0x81] sm:$0xff]  ;;  %v4861_v24 = vld [vmem:[#allocation3 + $0x2dc] ss:$24 sps:$4 sm:$0xff]   ;;  %v345_v21 = vld [vmem:[%s5297_s6 + $0xaa] sm:$0xff] }
  0x93   : > { %2458 = vmatprep.subr.bf16.mxu0 %v4840_v30 }
  0x95   : > { %2073 = vmatpush1.bf16.msra.mxu1 %v4805_v58  ;;  %v4852_v58 = vld [vmem:[#allocation3 + $0x2ac] ss:$24 sps:$4 sm:$0xff]  }
  0x96   : > { %2074 = vmatprep.subr.bf16.mxu1 %v4816_v59  ;;  %2459 = vmatpush1.bf16.msra.mxu0 %v4838_v42  ;;  %v5457_v59 = vpack.c.bf16 %v211_v40, %v210_v39  ;;  %v5479_v39 = vpack.c.bf16 %v341_v12, %v340_v11  ;;  %v5481_v40 = vpack.c.bf16 %v279_v17, %v278_v14  ;;  %v4858_v42 = vld [vmem:[#allocation3 + $0x284] ss:$24 sps:$4 sm:$0xff]   ;;  %v217_v17 = vld [vmem:[%s5297_s6 + $0xa8] sm:$0xff] }
  0x97   : > { %1751 = vmatmul.mubr.bf16.gmra.mrb[20].mxu1 %v5417_v61  ;;  %2460 = vmatprep.subr.bf16.mxu0 %v4846_v46  ;;  %v342_v46 = vld [vmem:[%s5297_s6 + $0x92] sm:$0xff]  ;;  %v216_v14 = vld [vmem:[%s5297_s6 + $0xa0] sm:$0xff] }
  0x98   : > { %1944 = vmatmul.mubr.bf16.gmra.mrb[20].mxu0 %v5419_v62  ;;  %1760 = vmatprep.mubr.bf16.mxu1 %v5421_v63 }
  0x99   : > { %1953 = vmatprep.mubr.bf16.mxu0 %v5423_v0  ;;  %2075 = vmatpush1.bf16.msra.mxu1 %v4814_v1  ;;  %v5461_v1 = vpack.c.bf16 %v277_v47, %v276_v45  ;;  %v215_v45 = vld [vmem:[%s5297_s6 + $0x98] sm:$0xff] }
  0x9a   : > { %2076 = vmatprep.subr.bf16.mxu1 %v4825_v5  ;;  %v212_v5 = vld [vmem:[%s5297_s6 + $0x80] sm:$0xff]  ;;  %2461 = vmatpush1.bf16.msra.mxu0 %v4844_v57  ;;  %v4864_v57 = vld [vmem:[#allocation3 + $0x2b4] ss:$24 sps:$4 sm:$0xff]  }
  0x9b   : > { %2462 = vmatprep.subr.bf16.mxu0 %v4849_v3  ;;  %v5477_v30 = vpack.c.bf16 %v213_v6, %v212_v5  ;;  %v343_v47 = vld [vmem:[%s5297_s6 + $0x9a] sm:$0xff]  ;;  %v409_v3 = vld [vmem:[%s5297_s6 + $0xab] sm:$0xff]  ;;  %v5497_v5 = vpack.c.bf16 %v215_v45, %v214_v44  ;;  %v5517_v44 = vpack.c.bf16 %v217_v17, %v216_v14  ;;  %v5519_v45 = vpack.c.bf16 %v345_v21, %v344_v20 }
  0x9c   : > { %v5499_v6 = vpack.c.bf16 %v343_v47, %v342_v46 }
  0x9d   : > { %2077 = vmatpush1.bf16.msra.mxu1 %v4823_v22  ;;  %v4855_v22 = vld [vmem:[#allocation3 + $0x254] ss:$24 sps:$4 sm:$0xff]   ;;  %7619 = vst [vmem:[#allocation8_spill] sm:$0xff] %v5519_v45 }
  0x9e   : > { %2078 = vmatprep.subr.bf16.mxu1 %v4834_v23  ;;  %v4859_v23 = vld [vmem:[#allocation3 + $0x2d8] ss:$24 sps:$4 sm:$0xff]   ;;  %2463 = vmatpush1.bf16.msra.mxu0 %v4847_v13  ;;  %7617 = vst [vmem:[#allocation6_spill] sm:$0xff] %v5499_v6  ;;  %v4867_v13 = vld [vmem:[#allocation3 + $0x2e4] ss:$24 sps:$4 sm:$0xff]  }
  0x9f   : > { %1761 = vmatmul.mubr.bf16.gmra.mrb[24].mxu1 %v5437_v25  ;;  %2464 = vmatprep.subr.bf16.mxu0 %v4855_v22  ;;  %v4865_v22 = vld [vmem:[#allocation3 + $0x2e0] ss:$24 sps:$4 sm:$0xff]  }
  0xa0   : > { %1954 = vmatmul.mubr.bf16.gmra.mrb[24].mxu0 %v5439_v26  ;;  %1770 = vmatprep.mubr.bf16.mxu1 %v5441_v27 }
  0xa1   : > { %1963 = vmatprep.mubr.bf16.mxu0 %v5443_v28  ;;  %2079 = vmatpush1.bf16.msra.mxu1 %v4832_v29  ;;  %v4853_v29 = vld [vmem:[#allocation3 + $0x250] ss:$24 sps:$4 sm:$0xff]  }
  0xa2   : > { %2080 = vmatprep.subr.bf16.mxu1 %v4843_v43  ;;  %v4870_v43 = vld [vmem:[#allocation3 + $0x30c] ss:$24 sps:$4 sm:$0xff]   ;;  %2465 = vmatpush1.bf16.msra.mxu0 %v4853_v29 }
  0xa3   : > { %2466 = vmatprep.subr.bf16.mxu0 %v4858_v42  ;;  %v4894_v29 = vld [vmem:[#allocation3 + $0x314] ss:$24 sps:$4 sm:$0xff]  }
  0xa4   : > { %v410_v42 = vld [vmem:[%s5297_s6 + $0xb3] sm:$0xff] }
  0xa5   : > { %2081 = vmatpush1.bf16.msra.mxu1 %v4841_v56  ;;  %v281_v56 = vld [vmem:[%s5297_s6 + $0xa9] sm:$0xff] }
  0xa6   : > { %2082 = vmatprep.subr.bf16.mxu1 %v4852_v58  ;;  %v408_v58 = vld [vmem:[%s5297_s6 + $0xa3] sm:$0xff]  ;;  %2467 = vmatpush1.bf16.msra.mxu0 %v4856_v48  ;;  %v5501_v11 = vpack.c.bf16 %v281_v56, %v280_v55  ;;  %v218_v48 = vld [vmem:[%s5297_s6 + $0xb0] sm:$0xff]  ;;  %v219_v55 = vld [vmem:[%s5297_s6 + $0xb8] sm:$0xff] }
  0xa7   : > { %1771 = vmatmul.mubr.bf16.gmra.mrb[28].mxu1 %v5457_v59  ;;  %2468 = vmatprep.subr.bf16.mxu0 %v4864_v57  ;;  %v5503_v12 = vpack.c.bf16 %v409_v3, %v408_v58  ;;  %v346_v56 = vld [vmem:[%s5297_s6 + $0xb2] sm:$0xff]  ;;  %v347_v57 = vld [vmem:[%s5297_s6 + $0xba] sm:$0xff]  ;;  %v285_v3 = vld [vmem:[%s5297_s6 + $0xc9] sm:$0xff]  ;;  %v5537_v14 = vpack.c.bf16 %v219_v55, %v218_v48 }
  0xa8   : > { %1964 = vmatmul.mubr.bf16.gmra.mrb[28].mxu0 %v5459_v60  ;;  %1780 = vmatprep.mubr.bf16.mxu1 %v5461_v1  ;;  %v284_v58 = vld [vmem:[%s5297_s6 + $0xc1] sm:$0xff]  ;;  %v5539_v17 = vpack.c.bf16 %v347_v57, %v346_v56  ;;  %v414_v48 = vld [vmem:[%s5297_s6 + $0xd3] sm:$0xff] }
  0xa9   : > { %1973 = vmatprep.mubr.bf16.mxu0 %v5463_v2  ;;  %2083 = vmatpush1.bf16.msra.mxu1 %v4850_v4  ;;  %v4862_v4 = vld [vmem:[#allocation3 + $0x2b0] ss:$24 sps:$4 sm:$0xff]   ;;  %7618 = vst [vmem:[#allocation7_spill] sm:$0xff] %v5503_v12  ;;  %v5541_v20 = vpack.c.bf16 %v285_v3, %v284_v58  ;;  %v415_v55 = vld [vmem:[%s5297_s6 + $0xdb] sm:$0xff] }
  0xaa   : > { %2084 = vmatprep.subr.bf16.mxu1 %v4861_v24  ;;  %2469 = vmatpush1.bf16.msra.mxu0 %v4862_v4  ;;  %v283_v24 = vld [vmem:[%s5297_s6 + $0xb9] sm:$0xff]  ;;  %v412_v4 = vld [vmem:[%s5297_s6 + $0xc3] sm:$0xff]  ;;  %7621 = vst [vmem:[#allocation10_spill] sm:$0xff] %v5539_v17  ;;  %v5563_v3 = vpack.c.bf16 %v415_v55, %v414_v48 }
  0xab   : > { %2470 = vmatprep.subr.bf16.mxu0 %v4867_v13  ;;  %v413_v13 = vld [vmem:[%s5297_s6 + $0xcb] sm:$0xff] }
  0xac   : > { %v5543_v21 = vpack.c.bf16 %v413_v13, %v412_v4  ;;  %7624 = vst [vmem:[#allocation13_spill] sm:$0xff] %v5563_v3  ;;  %v222_v4 = vld [vmem:[%s5297_s6 + $0xd0] sm:$0xff]  ;;  %v223_v13 = vld [vmem:[%s5297_s6 + $0xd8] sm:$0xff] }
  0xad   : > { %2085 = vmatpush1.bf16.msra.mxu1 %v4859_v23  ;;  %v282_v23 = vld [vmem:[%s5297_s6 + $0xb1] sm:$0xff]  ;;  %v5577_v48 = vpack.c.bf16 %v223_v13, %v222_v4  ;;  %v352_v4 = vld [vmem:[%s5297_s6 + $0xe2] sm:$0xff] }
  0xae   : > { %2247 = vmatprep.subr.bf16.mxu1 %v4870_v43  ;;  %v411_v43 = vld [vmem:[%s5297_s6 + $0xbb] sm:$0xff]  ;;  %2471 = vmatpush1.bf16.msra.mxu0 %v4865_v22  ;;  %v5521_v46 = vpack.c.bf16 %v283_v24, %v282_v23  ;;  %7622 = vst [vmem:[#allocation11_spill] sm:$0xff] %v5543_v21  ;;  %v221_v23 = vld [vmem:[%s5297_s6 + $0xc8] sm:$0xff] }
  0xaf   : > { %1781 = vmatmul.mubr.bf16.gmra.mrb[32].mxu1 %v5477_v30  ;;  %2633 = vmatprep.subr.bf16.mxu0 %v4894_v29  ;;  %v5523_v47 = vpack.c.bf16 %v411_v43, %v410_v42  ;;  %v220_v22 = vld [vmem:[%s5297_s6 + $0xc0] sm:$0xff]  ;;  %v349_v29 = vld [vmem:[%s5297_s6 + $0xca] sm:$0xff] }
  0xb0   : > { %1974 = vmatmul.mubr.bf16.gmra.mrb[32].mxu0 %v5479_v39  ;;  %1790 = vmatprep.mubr.bf16.mxu1 %v5481_v40  ;;  %v348_v24 = vld [vmem:[%s5297_s6 + $0xc2] sm:$0xff]  ;;  %v286_v42 = vld [vmem:[%s5297_s6 + $0xd1] sm:$0xff]  ;;  %v287_v43 = vld [vmem:[%s5297_s6 + $0xd9] sm:$0xff]  ;;  %v5557_v56 = vpack.c.bf16 %v221_v23, %v220_v22 }
  0xb1   : > { %1983 = vmatprep.mubr.bf16.mxu0 %v5483_v41  ;;  %7620 = vst [vmem:[#allocation9_spill] sm:$0xff] %v5523_v47  ;;  %v5559_v57 = vpack.c.bf16 %v349_v29, %v348_v24  ;;  %v5561_v58 = vpack.c.bf16 %v287_v43, %v286_v42  ;;  %v350_v22 = vld [vmem:[%s5297_s6 + $0xd2] sm:$0xff]  ;;  %v351_v23 = vld [vmem:[%s5297_s6 + $0xda] sm:$0xff]  ;;  %v289_v29 = vld [vmem:[%s5297_s6 + $0xe9] sm:$0xff] }
  0xb2   : > { %v288_v24 = vld [vmem:[%s5297_s6 + $0xe1] sm:$0xff]  ;;  %v417_v43 = vld [vmem:[%s5297_s6 + $0xeb] sm:$0xff]  ;;  %v5579_v55 = vpack.c.bf16 %v351_v23, %v350_v22  ;;  %v291_v23 = vld [vmem:[%s5297_s6 + $0xf9] sm:$0xff] }
  0xb3   : > { %7623 = vst [vmem:[#allocation12_spill] sm:$0xff] %v5559_v57  ;;  %v416_v42 = vld [vmem:[%s5297_s6 + $0xe3] sm:$0xff]  ;;  %v290_v22 = vld [vmem:[%s5297_s6 + $0xf1] sm:$0xff] }
  0xb4   : > { %7625 = vst [vmem:[#allocation14_spill] sm:$0xff] %v5579_v55  ;;  %v353_v13 = vld [vmem:[%s5297_s6 + $0xea] sm:$0xff] }
  0xb7   : > { %1791 = vmatmul.mubr.bf16.gmra.mrb[36].mxu1 %v5497_v5 }
  0xb8   : > { %1984 = vmatmul.mubr.bf16.gmra.mrb[36].mxu0 %v5499_v6  ;;  %1800 = vmatprep.mubr.bf16.mxu1 %v5501_v11  ;;  %v355_v6 = vld [vmem:[%s5297_s6 + $0xfa] sm:$0xff] }
  0xb9   : > { %1993 = vmatprep.mubr.bf16.mxu0 %v5503_v12  ;;  %v354_v12 = vld [vmem:[%s5297_s6 + $0xf2] sm:$0xff] }
  0xbf   : > { %1801 = vmatmul.mubr.bf16.gmra.mrb[40].mxu1 %v5517_v44 }
  0xc0   : > { %1994 = vmatmul.mubr.bf16.gmra.mrb[40].mxu0 %v5519_v45  ;;  %1810 = vmatprep.mubr.bf16.mxu1 %v5521_v46  ;;  %v227_v45 = vld [vmem:[%s5297_s6 + $0xf8] sm:$0xff] }
  0xc1   : > { %2003 = vmatprep.mubr.bf16.mxu0 %v5523_v47 }
  0xc7   : > { %1811 = vmatmul.mubr.bf16.gmra.mrb[44].mxu1 %v5537_v14 }
  0xc8   : > { %2004 = vmatmul.mubr.bf16.gmra.mrb[44].mxu0 %v5539_v17  ;;  %1820 = vmatprep.mubr.bf16.mxu1 %v5541_v20  ;;  %v225_v17 = vld [vmem:[%s5297_s6 + $0xe8] sm:$0xff] }
  0xc9   : > { %2013 = vmatprep.mubr.bf16.mxu0 %v5543_v21  ;;  %v5583_v21 = vpack.c.bf16 %v417_v43, %v416_v42  ;;  %v5599_v43 = vpack.c.bf16 %v353_v13, %v352_v4  ;;  %v4868_v4 = vld [vmem:[#allocation3 + $0x308] ss:$24 sps:$4 sm:$0xff]   ;;  %v4873_v13 = vld [vmem:[#allocation3 + $0x33c] ss:$24 sps:$4 sm:$0xff]  }
  0xcb   : > { %7626 = vst [vmem:[#allocation15_spill] sm:$0xff] %v5583_v21 }
  0xcf   : > { %1821 = vmatmul.mubr.bf16.gmra.mrb[48].mxu1 %v5557_v56 }
  0xd0   : > { %2014 = vmatmul.mubr.bf16.gmra.mrb[48].mxu0 %v5559_v57  ;;  %1830 = vmatprep.mubr.bf16.mxu1 %v5561_v58  ;;  %v5581_v57 = vpack.c.bf16 %v289_v29, %v288_v24  ;;  %v418_v24 = vld [vmem:[%s5297_s6 + $0xf3] sm:$0xff]  ;;  %v419_v29 = vld [vmem:[%s5297_s6 + $0xfb] sm:$0xff] }
  0xd1   : > { %2023 = vmatprep.mubr.bf16.mxu0 %v5563_v3  ;;  %v224_v3 = vld [vmem:[%s5297_s6 + $0xe0] sm:$0xff]  ;;  %v5603_v47 = vpack.c.bf16 %v419_v29, %v418_v24  ;;  %v4879_v24 = vld [vmem:[#allocation3 + $0x39c] ss:$24 sps:$4 sm:$0xff]   ;;  %v4904_v29 = vld [vmem:[#allocation3 + $0x370] ss:$24 sps:$4 sm:$0xff]  }
  0xd2   : > { %v5597_v42 = vpack.c.bf16 %v225_v17, %v224_v3  ;;  %v5615_v3 = vpack.c.bf16 %v355_v6, %v354_v12  ;;  %v4871_v6 = vld [vmem:[#allocation3 + $0x338] ss:$24 sps:$4 sm:$0xff]   ;;  %v4876_v12 = vld [vmem:[#allocation3 + $0x36c] ss:$24 sps:$4 sm:$0xff]  }
  0xd7   : > { %1831 = vmatmul.mubr.bf16.gmra.mrb[52].mxu1 %v5577_v48 }
  0xd8   : > { %2024 = vmatmul.mubr.bf16.gmra.mrb[52].mxu0 %v5579_v55  ;;  %1840 = vmatprep.mubr.bf16.mxu1 %v5581_v57  ;;  %v5601_v55 = vpack.c.bf16 %v291_v23, %v290_v22  ;;  %v4892_v22 = vld [vmem:[#allocation3 + $0x310] ss:$24 sps:$4 sm:$0xff]   ;;  %v4900_v23 = vld [vmem:[#allocation3 + $0x344] ss:$24 sps:$4 sm:$0xff]  }
  0xd9   : > { %2033 = vmatprep.mubr.bf16.mxu0 %v5583_v21  ;;  %v226_v21 = vld [vmem:[%s5297_s6 + $0xf0] sm:$0xff] }
  0xda   : > { %v5613_v17 = vpack.c.bf16 %v227_v45, %v226_v21  ;;  %v4898_v45 = vld [vmem:[#allocation3 + $0x340] ss:$24 sps:$4 sm:$0xff]   ;;  %v4906_v21 = vld [vmem:[#allocation3 + $0x374] ss:$24 sps:$4 sm:$0xff]  }
  0xdf   : > { %1841 = vmatmul.mubr.bf16.gmra.mrb[56].mxu1 %v5597_v42 }
  0xe0   : > { %2034 = vmatmul.mubr.bf16.gmra.mrb[56].mxu0 %v5599_v43  ;;  %1850 = vmatprep.mubr.bf16.mxu1 %v5601_v55 }
  0xe1   : > { %2043 = vmatprep.mubr.bf16.mxu0 %v5603_v47 }
  0xe7   : > { %1851 = vmatmul.mubr.bf16.gmra.mrb[60].mxu1 %v5613_v17 }
  0xe8   : > { %2044 = vmatmul.mubr.bf16.gmra.mrb[60].mxu0 %v5615_v3  ;;  %2086 = vmatprep.mubr.bf16.mxu1 %v5303_v53 }
  0xe9   : > { %2472 = vmatprep.mubr.bf16.mxu0 %v5303_v53  ;;  %v4874_v53 = vld [vmem:[#allocation3 + $0x368] ss:$24 sps:$4 sm:$0xff]  }
  0xef   : > { %2087 = vmatmul.mubr.bf16.vlgmr.msra.gmra.mrb[64].mxu1 %v5317_v15 }
  0xf0   : > { %2473 = vmatmul.mubr.bf16.vlgmr.msra.gmra.mrb[64].mxu0 %v5317_v15  ;;  %2248 = vmatpush1.bf16.msra.mxu1 %v4868_v4  ;;  %v4909_v15 = vld [vmem:[#allocation3 + $0x3a4] ss:$24 sps:$4 sm:$0xff]  }
  0xf1   : > { %2096 = vmatprep.mubr.bf16.mxu1 %v5321_v18  ;;  %2482 = vmatprep.mubr.bf16.mxu0 %v5321_v18  ;;  %v4877_v18 = vld [vmem:[#allocation3 + $0x398] ss:$24 sps:$4 sm:$0xff]   ;;  %v4882_v4 = vld [vmem:[#allocation3 + $0x3cc] ss:$24 sps:$4 sm:$0xff]  }
  0xf2   : > { %2249 = vmatprep.subr.bf16.mxu1 %v4873_v13  ;;  %2634 = vmatpush1.bf16.msra.mxu0 %v4892_v22  ;;  %v4907_v13 = vld [vmem:[#allocation3 + $0x3a0] ss:$24 sps:$4 sm:$0xff]  }
  0xf3   : > { %2635 = vmatprep.subr.bf16.mxu0 %v4900_v23  ;;  %v4880_v22 = vld [vmem:[#allocation3 + $0x3c8] ss:$24 sps:$4 sm:$0xff]   ;;  %v4915_v23 = vld [vmem:[#allocation3 + $0x3d4] ss:$24 sps:$4 sm:$0xff]  }
  0xf4   : > { %2250 = vmatpush1.bf16.msra.mxu1 %v4871_v6  ;;  %v4885_v6 = vld [vmem:[#allocation3 + $0x3fc] ss:$24 sps:$4 sm:$0xff]  }
  0xf5   : > { %2251 = vmatprep.subr.bf16.mxu1 %v4876_v12  ;;  %v4883_v12 = vld [vmem:[#allocation3 + $0x3f8] ss:$24 sps:$4 sm:$0xff]  }
  0xf6   : > { %2636 = vmatpush1.bf16.msra.mxu0 %v4898_v45  ;;  %v4888_v45 = vld [vmem:[#allocation3 + $0x42c] ss:$24 sps:$4 sm:$0xff]  }
  0xf7   : > { %2097 = vmatmul.mubr.bf16.gmra.mrb[68].mxu1 %v5337_v31  ;;  %2637 = vmatprep.subr.bf16.mxu0 %v4906_v21  ;;  %v4886_v21 = vld [vmem:[#allocation3 + $0x428] ss:$24 sps:$4 sm:$0xff]  }
  0xf8   : > { %2483 = vmatmul.mubr.bf16.gmra.mrb[68].mxu0 %v5337_v31  ;;  %2106 = vmatprep.mubr.bf16.mxu1 %v5341_v33  ;;  %v4913_v31 = vld [vmem:[#allocation3 + $0x3d0] ss:$24 sps:$4 sm:$0xff]  }
  0xf9   : > { %2492 = vmatprep.mubr.bf16.mxu0 %v5341_v33  ;;  %2252 = vmatpush1.bf16.msra.mxu1 %v4874_v53  ;;  %v4918_v33 = vld [vmem:[#allocation3 + $0x404] ss:$24 sps:$4 sm:$0xff]   ;;  %v4916_v53 = vld [vmem:[#allocation3 + $0x400] ss:$24 sps:$4 sm:$0xff]  }
  0xfa   : > { %2253 = vmatprep.subr.bf16.mxu1 %v4879_v24  ;;  %2638 = vmatpush1.bf16.msra.mxu0 %v4904_v29  ;;  %v4924_v24 = vld [vmem:[#allocation3 + $0x434] ss:$24 sps:$4 sm:$0xff]  }
  0xfb   : > { %2639 = vmatprep.subr.bf16.mxu0 %v4909_v15  ;;  %v4891_v29 = vld [vmem:[#allocation3 + $0x45c] ss:$24 sps:$4 sm:$0xff]   ;;  %v4889_v15 = vld [vmem:[#allocation3 + $0x458] ss:$24 sps:$4 sm:$0xff]  }
  0xfd   : > { %2254 = vmatpush1.bf16.msra.mxu1 %v4877_v18  ;;  %v4897_v18 = vld [vmem:[#allocation3 + $0x48c] ss:$24 sps:$4 sm:$0xff]  }
  0xfe   : > { %2255 = vmatprep.subr.bf16.mxu1 %v4882_v4  ;;  %2640 = vmatpush1.bf16.msra.mxu0 %v4907_v13  ;;  %v4925_v4 = vld [vmem:[#allocation3 + $0x460] ss:$24 sps:$4 sm:$0xff]  }
  0xff   : > { %2107 = vmatmul.mubr.bf16.gmra.mrb[72].mxu1 %v5357_v49  ;;  %2641 = vmatprep.subr.bf16.mxu0 %v4915_v23  ;;  %v4895_v13 = vld [vmem:[#allocation3 + $0x488] ss:$24 sps:$4 sm:$0xff]   ;;  %v4903_v23 = vld [vmem:[#allocation3 + $0x4bc] ss:$24 sps:$4 sm:$0xff]  }
 0x100   : > { %2493 = vmatmul.mubr.bf16.gmra.mrb[72].mxu0 %v5357_v49  ;;  %2116 = vmatprep.mubr.bf16.mxu1 %v5361_v51  ;;  %v4922_v49 = vld [vmem:[#allocation3 + $0x430] ss:$24 sps:$4 sm:$0xff]  }
 0x101   : > { %2502 = vmatprep.mubr.bf16.mxu0 %v5361_v51  ;;  %2256 = vmatpush1.bf16.msra.mxu1 %v4880_v22  ;;  %v4927_v51 = vld [vmem:[#allocation3 + $0x464] ss:$24 sps:$4 sm:$0xff]   ;;  %v4933_v22 = vld [vmem:[#allocation3 + $0x494] ss:$24 sps:$4 sm:$0xff]  }
 0x102   : > { %2257 = vmatprep.subr.bf16.mxu1 %v4885_v6  ;;  %2642 = vmatpush1.bf16.msra.mxu0 %v4913_v31  ;;  %v4901_v6 = vld [vmem:[#allocation3 + $0x4b8] ss:$24 sps:$4 sm:$0xff]   ;;  %v4912_v31 = vld [vmem:[#allocation3 + $0x4ec] ss:$24 sps:$4 sm:$0xff]  }
 0x103   : > { %2643 = vmatprep.subr.bf16.mxu0 %v4918_v33  ;;  %v4934_v33 = vld [vmem:[#allocation3 + $0x4c0] ss:$24 sps:$4 sm:$0xff]  }
 0x105   : > { %2258 = vmatpush1.bf16.msra.mxu1 %v4883_v12  ;;  %v4910_v12 = vld [vmem:[#allocation3 + $0x4e8] ss:$24 sps:$4 sm:$0xff]  }
 0x106   : > { %2259 = vmatprep.subr.bf16.mxu1 %v4888_v45  ;;  %2644 = vmatpush1.bf16.msra.mxu0 %v4916_v53  ;;  %v4942_v45 = vld [vmem:[#allocation3 + $0x4f4] ss:$24 sps:$4 sm:$0xff]  }
 0x107   : > { %2117 = vmatmul.mubr.bf16.gmra.mrb[76].mxu1 %v5377_v7  ;;  %2645 = vmatprep.subr.bf16.mxu0 %v4924_v24  ;;  %v4921_v53 = vld [vmem:[#allocation3 + $0x51c] ss:$24 sps:$4 sm:$0xff]   ;;  %v4930_v24 = vld [vmem:[#allocation3 + $0x54c] ss:$24 sps:$4 sm:$0xff]  }
 0x108   : > { %2503 = vmatmul.mubr.bf16.gmra.mrb[76].mxu0 %v5377_v7  ;;  %2126 = vmatprep.mubr.bf16.mxu1 %v5381_v9  ;;  %v4931_v7 = vld [vmem:[#allocation3 + $0x490] ss:$24 sps:$4 sm:$0xff]  }
 0x109   : > { %2512 = vmatprep.mubr.bf16.mxu0 %v5381_v9  ;;  %2260 = vmatpush1.bf16.msra.mxu1 %v4886_v21  ;;  %v4936_v9 = vld [vmem:[#allocation3 + $0x4c4] ss:$24 sps:$4 sm:$0xff]   ;;  %v4919_v21 = vld [vmem:[#allocation3 + $0x518] ss:$24 sps:$4 sm:$0xff]  }
 0x10a   : > { %2261 = vmatprep.subr.bf16.mxu1 %v4891_v29  ;;  %2646 = vmatpush1.bf16.msra.mxu0 %v4922_v49  ;;  %v4943_v29 = vld [vmem:[#allocation3 + $0x520] ss:$24 sps:$4 sm:$0xff]  }
 0x10b   : > { %2647 = vmatprep.subr.bf16.mxu0 %v4927_v51  ;;  %v4928_v49 = vld [vmem:[#allocation3 + $0x548] ss:$24 sps:$4 sm:$0xff]   ;;  %v4951_v51 = vld [vmem:[#allocation3 + $0x554] ss:$24 sps:$4 sm:$0xff]  }
 0x10d   : > { %2262 = vmatpush1.bf16.msra.mxu1 %v4889_v15  ;;  %v4939_v15 = vld [vmem:[#allocation3 + $0x57c] ss:$24 sps:$4 sm:$0xff]  }
 0x10e   : > { %2263 = vmatprep.subr.bf16.mxu1 %v4897_v18  ;;  %2648 = vmatpush1.bf16.msra.mxu0 %v4925_v4  ;;  %v4937_v18 = vld [vmem:[#allocation3 + $0x578] ss:$24 sps:$4 sm:$0xff]   ;;  %v4948_v4 = vld [vmem:[#allocation3 + $0x5ac] ss:$24 sps:$4 sm:$0xff]  }
 0x10f   : > { %2127 = vmatmul.mubr.bf16.gmra.mrb[80].mxu1 %v5397_v35  ;;  %2649 = vmatprep.subr.bf16.mxu0 %v4933_v22  ;;  %v4946_v22 = vld [vmem:[#allocation3 + $0x5a8] ss:$24 sps:$4 sm:$0xff]  }
 0x110   : > { %2513 = vmatmul.mubr.bf16.gmra.mrb[80].mxu0 %v5397_v35  ;;  %2136 = vmatprep.mubr.bf16.mxu1 %v5401_v37  ;;  %v4940_v35 = vld [vmem:[#allocation3 + $0x4f0] ss:$24 sps:$4 sm:$0xff]  }
 0x111   : > { %2522 = vmatprep.mubr.bf16.mxu0 %v5401_v37  ;;  %2264 = vmatpush1.bf16.msra.mxu1 %v4895_v13  ;;  %v4945_v37 = vld [vmem:[#allocation3 + $0x524] ss:$24 sps:$4 sm:$0xff]   ;;  %v4952_v13 = vld [vmem:[#allocation3 + $0x580] ss:$24 sps:$4 sm:$0xff]  }
 0x112   : > { %2265 = vmatprep.subr.bf16.mxu1 %v4903_v23  ;;  %2650 = vmatpush1.bf16.msra.mxu0 %v4931_v7  ;;  %v4960_v23 = vld [vmem:[#allocation3 + $0x5b4] ss:$24 sps:$4 sm:$0xff]  }
 0x113   : > { %2651 = vmatprep.subr.bf16.mxu0 %v4936_v9  ;;  %v4957_v7 = vld [vmem:[#allocation3 + $0x5dc] ss:$24 sps:$4 sm:$0xff]   ;;  %v4955_v9 = vld [vmem:[#allocation3 + $0x5d8] ss:$24 sps:$4 sm:$0xff]  }
 0x115   : > { %2266 = vmatpush1.bf16.msra.mxu1 %v4901_v6  ;;  %v4961_v6 = vld [vmem:[#allocation3 + $0x5e0] ss:$24 sps:$4 sm:$0xff]  }
 0x116   : > { %2267 = vmatprep.subr.bf16.mxu1 %v4912_v31  ;;  %2652 = vmatpush1.bf16.msra.mxu0 %v4934_v33 }
 0x117   : > { %2137 = vmatmul.mubr.bf16.gmra.mrb[84].mxu1 %v5417_v61  ;;  %2653 = vmatprep.subr.bf16.mxu0 %v4942_v45 }
 0x118   : > { %2523 = vmatmul.mubr.bf16.gmra.mrb[84].mxu0 %v5417_v61  ;;  %2146 = vmatprep.mubr.bf16.mxu1 %v5421_v63  ;;  %v4949_v61 = vld [vmem:[#allocation3 + $0x550] ss:$24 sps:$4 sm:$0xff]  }
 0x119   : > { %2532 = vmatprep.mubr.bf16.mxu0 %v5421_v63  ;;  %2268 = vmatpush1.bf16.msra.mxu1 %v4910_v12  ;;  %v4954_v63 = vld [vmem:[#allocation3 + $0x584] ss:$24 sps:$4 sm:$0xff]  }
 0x11a   : > { %2269 = vmatprep.subr.bf16.mxu1 %v4921_v53  ;;  %2654 = vmatpush1.bf16.msra.mxu0 %v4940_v35 }
 0x11b   : > { %2655 = vmatprep.subr.bf16.mxu0 %v4945_v37 }
 0x11d   : > { %2270 = vmatpush1.bf16.msra.mxu1 %v4919_v21 }
 0x11e   : > { %2271 = vmatprep.subr.bf16.mxu1 %v4930_v24  ;;  %2656 = vmatpush1.bf16.msra.mxu0 %v4943_v29 }
 0x11f   : > { %2147 = vmatmul.mubr.bf16.gmra.mrb[88].mxu1 %v5437_v25  ;;  %2657 = vmatprep.subr.bf16.mxu0 %v4951_v51 }
 0x120   : > { %2533 = vmatmul.mubr.bf16.gmra.mrb[88].mxu0 %v5437_v25  ;;  %2156 = vmatprep.mubr.bf16.mxu1 %v5441_v27  ;;  %v4958_v25 = vld [vmem:[#allocation3 + $0x5b0] ss:$24 sps:$4 sm:$0xff]  }
 0x121   : > { %2542 = vmatprep.mubr.bf16.mxu0 %v5441_v27  ;;  %2272 = vmatpush1.bf16.msra.mxu1 %v4928_v49  ;;  %v4963_v27 = vld [vmem:[#allocation3 + $0x5e4] ss:$24 sps:$4 sm:$0xff]  }
 0x122   : > { %2273 = vmatprep.subr.bf16.mxu1 %v4939_v15  ;;  %2658 = vmatpush1.bf16.msra.mxu0 %v4949_v61 }
 0x123   : > { %2659 = vmatprep.subr.bf16.mxu0 %v4954_v63 }
 0x125   : > { %2274 = vmatpush1.bf16.msra.mxu1 %v4937_v18 }
 0x126   : > { %2275 = vmatprep.subr.bf16.mxu1 %v4948_v4  ;;  %2660 = vmatpush1.bf16.msra.mxu0 %v4952_v13 }
 0x127   : > { %2157 = vmatmul.mubr.bf16.gmra.mrb[92].mxu1 %v5457_v59  ;;  %2661 = vmatprep.subr.bf16.mxu0 %v4960_v23 }
 0x128   : > { %2543 = vmatmul.mubr.bf16.gmra.mrb[92].mxu0 %v5457_v59  ;;  %2166 = vmatprep.mubr.bf16.mxu1 %v5461_v1 }
 0x129   : > { %2552 = vmatprep.mubr.bf16.mxu0 %v5461_v1  ;;  %2276 = vmatpush1.bf16.msra.mxu1 %v4946_v22 }
 0x12a   : > { %2277 = vmatprep.subr.bf16.mxu1 %v4957_v7  ;;  %2662 = vmatpush1.bf16.msra.mxu0 %v4958_v25 }
 0x12b   : > { %2663 = vmatprep.subr.bf16.mxu0 %v4963_v27 }
 0x12d   : > { %2278 = vmatpush1.bf16.msra.mxu1 %v4955_v9 }
 0x12e   : > { %2664 = vmatpush1.bf16.msra.mxu0 %v4961_v6 }
 0x12f   : > { %2167 = vmatmul.mubr.bf16.gmra.mrb[96].mxu1 %v5477_v30 }
 0x130   : > { %2553 = vmatmul.mubr.bf16.gmra.mrb[96].mxu0 %v5477_v30  ;;  %2176 = vmatprep.mubr.bf16.mxu1 %v5481_v40 }
 0x131   : > { %2562 = vmatprep.mubr.bf16.mxu0 %v5481_v40 }
 0x137   : > { %2177 = vmatmul.mubr.bf16.gmra.mrb[100].mxu1 %v5497_v5 }
 0x138   : > { %2563 = vmatmul.mubr.bf16.gmra.mrb[100].mxu0 %v5497_v5  ;;  %2186 = vmatprep.mubr.bf16.mxu1 %v5501_v11 }
 0x139   : > { %2572 = vmatprep.mubr.bf16.mxu0 %v5501_v11 }
 0x13f   : > { %2187 = vmatmul.mubr.bf16.gmra.mrb[104].mxu1 %v5517_v44 }
 0x140   : > { %2573 = vmatmul.mubr.bf16.gmra.mrb[104].mxu0 %v5517_v44  ;;  %2196 = vmatprep.mubr.bf16.mxu1 %v5521_v46 }
 0x141   : > { %2582 = vmatprep.mubr.bf16.mxu0 %v5521_v46 }
 0x142   : > { %v1702_v59 = vpop.f32.mrb[0].mxu1 }
 0x143   : > { %v1895_v1 = vpop.f32.mrb[0].mxu0  ;;  %v1704_v40 = vpop.f32.mrb[1].mxu1 }
 0x144   : > { %v5665_v30 = vadd.f32 %v1895_v1, %v1702_v59  ;;  %v1897_v31 = vpop.f32.mrb[1].mxu0  ;;  %v1706_v5 = vpop.f32.mrb[2].mxu1 }
 0x145   : > { %v5667_v33 = vadd.f32 %v1897_v31, %v1704_v40  ;;  %v1899_v12 = vpop.f32.mrb[2].mxu0  ;;  %v1708_v11 = vpop.f32.mrb[3].mxu1 }
 0x146   : > { %v5669_v45 = vadd.f32 %v1899_v12, %v1706_v5  ;;  %v1901_v53 = vpop.f32.mrb[3].mxu0 }
 0x147   : > { %v5671_v35 = vadd.f32 %v1901_v53, %v1708_v11  ;;  %2197 = vmatmul.mubr.bf16.gmra.mrb[108].mxu1 %v5537_v14 }
 0x148   : > { %2583 = vmatmul.mubr.bf16.gmra.mrb[108].mxu0 %v5537_v14  ;;  %2206 = vmatprep.mubr.bf16.mxu1 %v5541_v20 }
 0x149   : > { %2592 = vmatprep.mubr.bf16.mxu0 %v5541_v20 }
 0x14a   : > { %v1712_v44 = vpop.f32.mrb[4].mxu1 }
 0x14b   : > { %v1905_v46 = vpop.f32.mrb[4].mxu0  ;;  %v1714_v21 = vpop.f32.mrb[5].mxu1 }
 0x14c   : > { %v5677_v37 = vadd.f32 %v1905_v46, %v1712_v44  ;;  %v1907_v24 = vpop.f32.mrb[5].mxu0  ;;  %v1716_v49 = vpop.f32.mrb[6].mxu1 }
 0x14d   : > { %v5679_v29 = vadd.f32 %v1907_v24, %v1714_v21  ;;  %v1909_v51 = vpop.f32.mrb[6].mxu0  ;;  %v1718_v61 = vpop.f32.mrb[7].mxu1 }
 0x14e   : > { %v5681_v15 = vadd.f32 %v1909_v51, %v1716_v49  ;;  %v1911_v63 = vpop.f32.mrb[7].mxu0 }
 0x14f   : > { %v5683_v18 = vadd.f32 %v1911_v63, %v1718_v61  ;;  %2207 = vmatmul.mubr.bf16.gmra.mrb[112].mxu1 %v5557_v56 }
 0x150   : > { %2593 = vmatmul.mubr.bf16.gmra.mrb[112].mxu0 %v5557_v56  ;;  %2216 = vmatprep.mubr.bf16.mxu1 %v5561_v58 }
 0x151   : > { %2602 = vmatprep.mubr.bf16.mxu0 %v5561_v58 }
 0x152   : > { %v1722_v14 = vpop.f32.mrb[8].mxu1 }
 0x153   : > { %v1915_v20 = vpop.f32.mrb[8].mxu0  ;;  %v1724_v13 = vpop.f32.mrb[9].mxu1 }
 0x154   : > { %v5689_v4 = vadd.f32 %v1915_v20, %v1722_v14  ;;  %v1917_v22 = vpop.f32.mrb[9].mxu0  ;;  %v1726_v7 = vpop.f32.mrb[10].mxu1 }
 0x155   : > { %v5691_v23 = vadd.f32 %v1917_v22, %v1724_v13  ;;  %v1919_v25 = vpop.f32.mrb[10].mxu0  ;;  %v1728_v9 = vpop.f32.mrb[11].mxu1 }
 0x156   : > { %v5693_v27 = vadd.f32 %v1919_v25, %v1726_v7  ;;  %v1921_v6 = vpop.f32.mrb[11].mxu0 }
 0x157   : > { %v5695_v59 = vadd.f32 %v1921_v6, %v1728_v9  ;;  %2217 = vmatmul.mubr.bf16.gmra.mrb[116].mxu1 %v5577_v48 }
 0x158   : > { %2603 = vmatmul.mubr.bf16.gmra.mrb[116].mxu0 %v5577_v48  ;;  %2226 = vmatprep.mubr.bf16.mxu1 %v5581_v57 }
 0x159   : > { %2612 = vmatprep.mubr.bf16.mxu0 %v5581_v57 }
 0x15a   : > { %v1732_v56 = vpop.f32.mrb[12].mxu1 }
 0x15b   : > { %v1925_v58 = vpop.f32.mrb[12].mxu0  ;;  %v1734_v40 = vpop.f32.mrb[13].mxu1 }
 0x15c   : > { %v5701_v1 = vadd.f32 %v1925_v58, %v1732_v56  ;;  %v1927_v31 = vpop.f32.mrb[13].mxu0  ;;  %v1736_v12 = vpop.f32.mrb[14].mxu1 }
 0x15d   : > { %v5703_v5 = vadd.f32 %v1927_v31, %v1734_v40  ;;  %v1929_v11 = vpop.f32.mrb[14].mxu0  ;;  %v1738_v44 = vpop.f32.mrb[15].mxu1 }
 0x15e   : > { %v5705_v53 = vadd.f32 %v1929_v11, %v1736_v12  ;;  %v1931_v46 = vpop.f32.mrb[15].mxu0 }
 0x15f   : > { %v5707_v21 = vadd.f32 %v1931_v46, %v1738_v44  ;;  %2227 = vmatmul.mubr.bf16.gmra.mrb[120].mxu1 %v5597_v42 }
 0x160   : > { %2613 = vmatmul.mubr.bf16.gmra.mrb[120].mxu0 %v5597_v42  ;;  %2236 = vmatprep.mubr.bf16.mxu1 %v5601_v55 }
 0x161   : > { %2622 = vmatprep.mubr.bf16.mxu0 %v5601_v55 }
 0x162   : > { %v1742_v57 = vpop.f32.mrb[16].mxu1 }
 0x163   : > { %v1935_v48 = vpop.f32.mrb[16].mxu0  ;;  %v1744_v49 = vpop.f32.mrb[17].mxu1 }
 0x164   : > { %v5713_v24 = vadd.f32 %v1935_v48, %v1742_v57  ;;  %v1937_v51 = vpop.f32.mrb[17].mxu0  ;;  %v1746_v63 = vpop.f32.mrb[18].mxu1 }
 0x165   : > { %v5715_v61 = vadd.f32 %v1937_v51, %v1744_v49  ;;  %v1939_v14 = vpop.f32.mrb[18].mxu0  ;;  %v1748_v13 = vpop.f32.mrb[19].mxu1 }
 0x166   : > { %v5717_v20 = vadd.f32 %v1939_v14, %v1746_v63  ;;  %v1941_v22 = vpop.f32.mrb[19].mxu0 }
 0x167   : > { %v5719_v7 = vadd.f32 %v1941_v22, %v1748_v13  ;;  %2237 = vmatmul.mubr.bf16.gmra.mrb[124].mxu1 %v5613_v17 }
 0x168   : > { %2623 = vmatmul.mubr.bf16.gmra.mrb[124].mxu0 %v5613_v17  ;;  %2279 = vmatprep.mubr.bf16.mxu1 %v5305_v54 }
 0x169   : > { %2665 = vmatprep.mubr.bf16.mxu0 %v5305_v54 }
 0x16a   : > { %v1752_v55 = vpop.f32.mrb[20].mxu1 }
 0x16b   : > { %v1945_v42 = vpop.f32.mrb[20].mxu0  ;;  %v1754_v9 = vpop.f32.mrb[21].mxu1 }
 0x16c   : > { %v5725_v25 = vadd.f32 %v1945_v42, %v1752_v55  ;;  %v1947_v6 = vpop.f32.mrb[21].mxu0  ;;  %v1756_v58 = vpop.f32.mrb[22].mxu1 }
 0x16d   : > { %v5727_v56 = vadd.f32 %v1947_v6, %v1754_v9  ;;  %v1949_v40 = vpop.f32.mrb[22].mxu0  ;;  %v1758_v12 = vpop.f32.mrb[23].mxu1 }
 0x16e   : > { %v5729_v31 = vadd.f32 %v1949_v40, %v1756_v58  ;;  %v1951_v11 = vpop.f32.mrb[23].mxu0 }
 0x16f   : > { %v5731_v44 = vadd.f32 %v1951_v11, %v1758_v12  ;;  %2280 = vmatmul.mubr.bf16.vlgmr.msra.gmra.mrb[64].mxu1 %v5319_v16 }
 0x170   : > { %2666 = vmatmul.mubr.bf16.vlgmr.msra.gmra.mrb[64].mxu0 %v5319_v16  ;;  %2289 = vmatprep.mubr.bf16.mxu1 %v5323_v19 }
 0x171   : > { %2675 = vmatprep.mubr.bf16.mxu0 %v5323_v19 }
 0x172   : > { %v1762_v54 = vpop.f32.mrb[24].mxu1 }
 0x173   : > { %v1955_v17 = vpop.f32.mrb[24].mxu0  ;;  %v1764_v57 = vpop.f32.mrb[25].mxu1 }
 0x174   : > { %v5737_v46 = vadd.f32 %v1955_v17, %v1762_v54  ;;  %v1957_v48 = vpop.f32.mrb[25].mxu0  ;;  %v1766_v51 = vpop.f32.mrb[26].mxu1 }
 0x175   : > { %v5739_v49 = vadd.f32 %v1957_v48, %v1764_v57  ;;  %v1959_v63 = vpop.f32.mrb[26].mxu0  ;;  %v1768_v13 = vpop.f32.mrb[27].mxu1 }
 0x176   : > { %v5741_v14 = vadd.f32 %v1959_v63, %v1766_v51  ;;  %v1961_v22 = vpop.f32.mrb[27].mxu0 }
 0x177   : > { %v5743_v55 = vadd.f32 %v1961_v22, %v1768_v13  ;;  %2290 = vmatmul.mubr.bf16.gmra.mrb[68].mxu1 %v5339_v32 }
 0x178   : > { %2676 = vmatmul.mubr.bf16.gmra.mrb[68].mxu0 %v5339_v32  ;;  %2299 = vmatprep.mubr.bf16.mxu1 %v5343_v34 }
 0x179   : > { %2685 = vmatprep.mubr.bf16.mxu0 %v5343_v34 }
 0x17a   : > { %v1772_v16 = vpop.f32.mrb[28].mxu1 }
 0x17b   : > { %v1965_v19 = vpop.f32.mrb[28].mxu0  ;;  %v1774_v9 = vpop.f32.mrb[29].mxu1 }
 0x17c   : > { %v5749_v42 = vadd.f32 %v1965_v19, %v1772_v16  ;;  %v1967_v6 = vpop.f32.mrb[29].mxu0  ;;  %v1776_v40 = vpop.f32.mrb[30].mxu1 }
 0x17d   : > { %v5751_v58 = vadd.f32 %v1967_v6, %v1774_v9  ;;  %v1969_v12 = vpop.f32.mrb[30].mxu0  ;;  %v1778_v54 = vpop.f32.mrb[31].mxu1 }
 0x17e   : > { %v5753_v11 = vadd.f32 %v1969_v12, %v1776_v40  ;;  %v1971_v17 = vpop.f32.mrb[31].mxu0 }
 0x17f   : > { %v5755_v57 = vadd.f32 %v1971_v17, %v1778_v54  ;;  %2300 = vmatmul.mubr.bf16.gmra.mrb[72].mxu1 %v5359_v50 }
 0x180   : > { %2686 = vmatmul.mubr.bf16.gmra.mrb[72].mxu0 %v5359_v50  ;;  %2309 = vmatprep.mubr.bf16.mxu1 %v5363_v52 }
 0x181   : > { %2695 = vmatprep.mubr.bf16.mxu0 %v5363_v52 }
 0x182   : > { %v1782_v32 = vpop.f32.mrb[32].mxu1 }
 0x183   : > { %v1975_v34 = vpop.f32.mrb[32].mxu0  ;;  %v1784_v51 = vpop.f32.mrb[33].mxu1 }
 0x184   : > { %v5761_v48 = vadd.f32 %v1975_v34, %v1782_v32  ;;  %v1977_v63 = vpop.f32.mrb[33].mxu0  ;;  %v1786_v22 = vpop.f32.mrb[34].mxu1 }
 0x185   : > { %v5763_v13 = vadd.f32 %v1977_v63, %v1784_v51  ;;  %v1979_v16 = vpop.f32.mrb[34].mxu0  ;;  %v1788_v9 = vpop.f32.mrb[35].mxu1 }
 0x186   : > { %v5765_v19 = vadd.f32 %v1979_v16, %v1786_v22  ;;  %v1981_v6 = vpop.f32.mrb[35].mxu0 }
 0x187   : > { %v5767_v40 = vadd.f32 %v1981_v6, %v1788_v9  ;;  %2310 = vmatmul.mubr.bf16.gmra.mrb[76].mxu1 %v5379_v8 }
 0x188   : > { %2696 = vmatmul.mubr.bf16.gmra.mrb[76].mxu0 %v5379_v8  ;;  %2319 = vmatprep.mubr.bf16.mxu1 %v5383_v10 }
 0x189   : > { %2705 = vmatprep.mubr.bf16.mxu0 %v5383_v10 }
 0x18a   : > { %v1792_v50 = vpop.f32.mrb[36].mxu1 }
 0x18b   : > { %v1985_v52 = vpop.f32.mrb[36].mxu0  ;;  %v1794_v54 = vpop.f32.mrb[37].mxu1 }
 0x18c   : > { %v5773_v12 = vadd.f32 %v1985_v52, %v1792_v50  ;;  %v1987_v17 = vpop.f32.mrb[37].mxu0  ;;  %v1796_v34 = vpop.f32.mrb[38].mxu1 }
 0x18d   : > { %v5775_v32 = vadd.f32 %v1987_v17, %v1794_v54  ;;  %v1989_v51 = vpop.f32.mrb[38].mxu0  ;;  %v1798_v22 = vpop.f32.mrb[39].mxu1 }
 0x18e   : > { %v5777_v63 = vadd.f32 %v1989_v51, %v1796_v34  ;;  %v1991_v16 = vpop.f32.mrb[39].mxu0 }
 0x18f   : > { %v5779_v9 = vadd.f32 %v1991_v16, %v1798_v22  ;;  %2320 = vmatmul.mubr.bf16.gmra.mrb[80].mxu1 %v5399_v36 }
 0x190   : > { %2706 = vmatmul.mubr.bf16.gmra.mrb[80].mxu0 %v5399_v36  ;;  %2329 = vmatprep.mubr.bf16.mxu1 %v5403_v38 }
 0x191   : > { %7627 = vst [vmem:[#allocation16_spill] sm:$0xff] %v5779_v9  ;;  %2715 = vmatprep.mubr.bf16.mxu0 %v5403_v38 }
 0x192   : > { %v1802_v8 = vpop.f32.mrb[40].mxu1 }
 0x193   : > { %v1995_v10 = vpop.f32.mrb[40].mxu0  ;;  %v1804_v50 = vpop.f32.mrb[41].mxu1 }
 0x194   : > { %v5785_v6 = vadd.f32 %v1995_v10, %v1802_v8  ;;  %v1997_v52 = vpop.f32.mrb[41].mxu0  ;;  %v1806_v17 = vpop.f32.mrb[42].mxu1 }
 0x195   : > { %v5787_v54 = vadd.f32 %v1997_v52, %v1804_v50  ;;  %v1999_v34 = vpop.f32.mrb[42].mxu0  ;;  %v1808_v22 = vpop.f32.mrb[43].mxu1 }
 0x196   : > { %v5789_v51 = vadd.f32 %v1999_v34, %v1806_v17  ;;  %v2001_v16 = vpop.f32.mrb[43].mxu0 }
 0x197   : > { %v5791_v9 = vadd.f32 %v2001_v16, %v1808_v22  ;;  %2330 = vmatmul.mubr.bf16.gmra.mrb[84].mxu1 %v5419_v62 }
 0x198   : > { %7628 = vst [vmem:[#allocation17_spill] sm:$0xff] %v5789_v51  ;;  %2716 = vmatmul.mubr.bf16.gmra.mrb[84].mxu0 %v5419_v62  ;;  %2339 = vmatprep.mubr.bf16.mxu1 %v5423_v0 }
 0x199   : > { %7629 = vst [vmem:[#allocation18_spill] sm:$0xff] %v5791_v9  ;;  %2725 = vmatprep.mubr.bf16.mxu0 %v5423_v0 }
 0x19a   : > { %v1812_v36 = vpop.f32.mrb[44].mxu1 }
 0x19b   : > { %v2005_v38 = vpop.f32.mrb[44].mxu0  ;;  %v1814_v10 = vpop.f32.mrb[45].mxu1 }
 0x19c   : > { %v5797_v8 = vadd.f32 %v2005_v38, %v1812_v36  ;;  %v2007_v50 = vpop.f32.mrb[45].mxu0  ;;  %v1816_v17 = vpop.f32.mrb[46].mxu1 }
 0x19d   : > { %v5799_v52 = vadd.f32 %v2007_v50, %v1814_v10  ;;  %v2009_v34 = vpop.f32.mrb[46].mxu0  ;;  %v1818_v16 = vpop.f32.mrb[47].mxu1 }
 0x19e   : > { %v5801_v22 = vadd.f32 %v2009_v34, %v1816_v17  ;;  %v2011_v9 = vpop.f32.mrb[47].mxu0 }
 0x19f   : > { %v5803_v51 = vadd.f32 %v2011_v9, %v1818_v16  ;;  %2340 = vmatmul.mubr.bf16.gmra.mrb[88].mxu1 %v5439_v26 }
 0x1a0   : > { %7630 = vst [vmem:[#allocation19_spill] sm:$0xff] %v5801_v22  ;;  %2726 = vmatmul.mubr.bf16.gmra.mrb[88].mxu0 %v5439_v26  ;;  %2349 = vmatprep.mubr.bf16.mxu1 %v5443_v28 }
 0x1a1   : > { %7631 = vst [vmem:[#allocation20_spill] sm:$0xff] %v5803_v51  ;;  %2735 = vmatprep.mubr.bf16.mxu0 %v5443_v28 }
 0x1a2   : > { %v1822_v62 = vpop.f32.mrb[48].mxu1 }
 0x1a3   : > { %v2015_v0 = vpop.f32.mrb[48].mxu0  ;;  %v1824_v38 = vpop.f32.mrb[49].mxu1 }
 0x1a4   : > { %v5809_v36 = vadd.f32 %v2015_v0, %v1822_v62  ;;  %v2017_v10 = vpop.f32.mrb[49].mxu0  ;;  %v1826_v17 = vpop.f32.mrb[50].mxu1 }
 0x1a5   : > { %v5811_v50 = vadd.f32 %v2017_v10, %v1824_v38  ;;  %v2019_v34 = vpop.f32.mrb[50].mxu0  ;;  %v1828_v16 = vpop.f32.mrb[51].mxu1 }
 0x1a6   : > { %7632 = vst [vmem:[#allocation21_spill] sm:$0xff] %v5809_v36  ;;  %v5813_v9 = vadd.f32 %v2019_v34, %v1826_v17  ;;  %v2021_v51 = vpop.f32.mrb[51].mxu0 }
 0x1a7   : > { %7633 = vst [vmem:[#allocation22_spill] sm:$0xff] %v5811_v50  ;;  %v5815_v22 = vadd.f32 %v2021_v51, %v1828_v16  ;;  %2350 = vmatmul.mubr.bf16.gmra.mrb[92].mxu1 %v5459_v60 }
 0x1a8   : > { %7634 = vst [vmem:[#allocation23_spill] sm:$0xff] %v5813_v9  ;;  %2736 = vmatmul.mubr.bf16.gmra.mrb[92].mxu0 %v5459_v60  ;;  %2359 = vmatprep.mubr.bf16.mxu1 %v5463_v2 }
 0x1a9   : > { %7635 = vst [vmem:[#allocation24_spill] sm:$0xff] %v5815_v22  ;;  %2745 = vmatprep.mubr.bf16.mxu0 %v5463_v2 }
 0x1aa   : > { %v1832_v26 = vpop.f32.mrb[52].mxu1 }
 0x1ab   : > { %v2025_v28 = vpop.f32.mrb[52].mxu0  ;;  %v1834_v0 = vpop.f32.mrb[53].mxu1 }
 0x1ac   : > { %v5821_v62 = vadd.f32 %v2025_v28, %v1832_v26  ;;  %v2027_v38 = vpop.f32.mrb[53].mxu0  ;;  %v1836_v17 = vpop.f32.mrb[54].mxu1 }
 0x1ad   : > { %v5823_v10 = vadd.f32 %v2027_v38, %v1834_v0  ;;  %v2029_v34 = vpop.f32.mrb[54].mxu0  ;;  %v1838_v16 = vpop.f32.mrb[55].mxu1 }
 0x1ae   : > { %7636 = vst [vmem:[#allocation25_spill] sm:$0xff] %v5821_v62  ;;  %v5825_v51 = vadd.f32 %v2029_v34, %v1836_v17  ;;  %v2031_v22 = vpop.f32.mrb[55].mxu0 }
 0x1af   : > { %7637 = vst [vmem:[#allocation26_spill] sm:$0xff] %v5823_v10  ;;  %v5827_v9 = vadd.f32 %v2031_v22, %v1838_v16  ;;  %2360 = vmatmul.mubr.bf16.gmra.mrb[96].mxu1 %v5479_v39 }
 0x1b0   : > { %7638 = vst [vmem:[#allocation27_spill] sm:$0xff] %v5825_v51  ;;  %2746 = vmatmul.mubr.bf16.gmra.mrb[96].mxu0 %v5479_v39  ;;  %2369 = vmatprep.mubr.bf16.mxu1 %v5483_v41  ;;  %v7644_v39 = vld [vmem:[#allocation6_spill] sm:$0xff] }
 0x1b1   : > { %7639 = vst [vmem:[#allocation28_spill] sm:$0xff] %v5827_v9  ;;  %2755 = vmatprep.mubr.bf16.mxu0 %v5483_v41  ;;  %v7645_v41 = vld [vmem:[#allocation7_spill] sm:$0xff] }
 0x1b2   : > { %v1842_v60 = vpop.f32.mrb[56].mxu1 }
 0x1b3   : > { %v2035_v2 = vpop.f32.mrb[56].mxu0  ;;  %v1844_v28 = vpop.f32.mrb[57].mxu1 }
 0x1b4   : > { %v5833_v26 = vadd.f32 %v2035_v2, %v1842_v60  ;;  %v2037_v0 = vpop.f32.mrb[57].mxu0  ;;  %v1846_v17 = vpop.f32.mrb[58].mxu1 }
 0x1b5   : > { %v5835_v38 = vadd.f32 %v2037_v0, %v1844_v28  ;;  %v2039_v34 = vpop.f32.mrb[58].mxu0  ;;  %v1848_v16 = vpop.f32.mrb[59].mxu1 }
 0x1b6   : > { %7640 = vst [vmem:[#allocation29_spill] sm:$0xff] %v5833_v26  ;;  %v5837_v22 = vadd.f32 %v2039_v34, %v1846_v17  ;;  %v2041_v9 = vpop.f32.mrb[59].mxu0 }
 0x1b7   : > { %7641 = vst [vmem:[#allocation30_spill] sm:$0xff] %v5835_v38  ;;  %v5839_v51 = vadd.f32 %v2041_v9, %v1848_v16  ;;  %2370 = vmatmul.mubr.bf16.gmra.mrb[100].mxu1 %v7644_v39 }
 0x1b8   : > { %7642 = vst [vmem:[#allocation31_spill] sm:$0xff] %v5837_v22  ;;  %2756 = vmatmul.mubr.bf16.gmra.mrb[100].mxu0 %v7644_v39  ;;  %2379 = vmatprep.mubr.bf16.mxu1 %v7645_v41  ;;  %v7650_v39 = vld [vmem:[#allocation8_spill] sm:$0xff] }
 0x1b9   : > { %7643 = vst [vmem:[#allocation32_spill] sm:$0xff] %v5839_v51  ;;  %2765 = vmatprep.mubr.bf16.mxu0 %v7645_v41  ;;  %v7651_v41 = vld [vmem:[#allocation9_spill] sm:$0xff] }
 0x1ba   : > { %v1852_v60 = vpop.f32.mrb[60].mxu1 }
 0x1bb   : > { %v2045_v2 = vpop.f32.mrb[60].mxu0  ;;  %v1854_v0 = vpop.f32.mrb[61].mxu1 }
 0x1bc   : > { %v5845_v28 = vadd.f32 %v2045_v2, %v1852_v60  ;;  %v2047_v38 = vpop.f32.mrb[61].mxu0  ;;  %v1856_v34 = vpop.f32.mrb[62].mxu1  ;;  %v7652_v60 = vld [vmem:[#allocation10_spill] sm:$0xff] }
 0x1bd   : > { %v5847_v17 = vadd.f32 %v2047_v38, %v1854_v0  ;;  %v2049_v22 = vpop.f32.mrb[62].mxu0  ;;  %v1858_v16 = vpop.f32.mrb[63].mxu1  ;;  %v7653_v38 = vld [vmem:[#allocation11_spill] sm:$0xff]  ;;  %v7656_v2 = vld [vmem:[#allocation14_spill] sm:$0xff] }
 0x1be   : > { %7646 = vst [vmem:[#allocation6_spill] sm:$0xff] %v5845_v28  ;;  %v5849_v9 = vadd.f32 %v2049_v22, %v1856_v34  ;;  %v2051_v51 = vpop.f32.mrb[63].mxu0  ;;  %v7654_v22 = vld [vmem:[#allocation12_spill] sm:$0xff]  ;;  %v7657_v0 = vld [vmem:[#allocation15_spill] sm:$0xff]  ;;  %v2826_v34 = vmul.f32 %v5665_v30, %v5665_v30  ;;  %v5889_v30 = vmul.f32 %v5681_v15, %v5681_v15 }
 0x1bf   : > { %7647 = vst [vmem:[#allocation7_spill] sm:$0xff] %v5847_v17  ;;  %v5851_v26 = vadd.f32 %v2051_v51, %v1858_v16  ;;  %2380 = vmatmul.mubr.bf16.gmra.mrb[104].mxu1 %v7650_v39  ;;  %v7655_v51 = vld [vmem:[#allocation13_spill] sm:$0xff]  ;;  %v2827_v16 = vmul.f32 %v5667_v33, %v5667_v33 }
 0x1c0   : > { %7648 = vst [vmem:[#allocation33_spill] sm:$0xff] %v5849_v9  ;;  %2766 = vmatmul.mubr.bf16.gmra.mrb[104].mxu0 %v7650_v39  ;;  %2389 = vmatprep.mubr.bf16.mxu1 %v7651_v41  ;;  %v2829_v39 = vmul.f32 %v5669_v45, %v5669_v45  ;;  %v2836_v45 = vmul.f32 %v5683_v18, %v5683_v18 }
 0x1c1   : > { %7649 = vst [vmem:[#allocation34_spill] sm:$0xff] %v5851_v26  ;;  %2775 = vmatprep.mubr.bf16.mxu0 %v7651_v41  ;;  %v2832_v41 = vmul.f32 %v5677_v37, %v5677_v37 }
 0x1c7   : > { %2390 = vmatmul.mubr.bf16.gmra.mrb[108].mxu1 %v7652_v60 }
 0x1c8   : > { %2776 = vmatmul.mubr.bf16.gmra.mrb[108].mxu0 %v7652_v60  ;;  %2399 = vmatprep.mubr.bf16.mxu1 %v7653_v38 }
 0x1c9   : > { %2785 = vmatprep.mubr.bf16.mxu0 %v7653_v38 }
 0x1cf   : > { %2400 = vmatmul.mubr.bf16.gmra.mrb[112].mxu1 %v7654_v22 }
 0x1d0   : > { %2786 = vmatmul.mubr.bf16.gmra.mrb[112].mxu0 %v7654_v22  ;;  %2409 = vmatprep.mubr.bf16.mxu1 %v7655_v51 }
 0x1d1   : > { %2795 = vmatprep.mubr.bf16.mxu0 %v7655_v51 }
 0x1d7   : > { %2410 = vmatmul.mubr.bf16.gmra.mrb[116].mxu1 %v7656_v2 }
 0x1d8   : > { %2796 = vmatmul.mubr.bf16.gmra.mrb[116].mxu0 %v7656_v2  ;;  %2419 = vmatprep.mubr.bf16.mxu1 %v7657_v0 }
 0x1d9   : > { %2805 = vmatprep.mubr.bf16.mxu0 %v7657_v0 }
 0x1df   : > { %2420 = vmatmul.mubr.bf16.gmra.mrb[120].mxu1 %v5599_v43 }
 0x1e0   : > { %2806 = vmatmul.mubr.bf16.gmra.mrb[120].mxu0 %v5599_v43  ;;  %2429 = vmatprep.mubr.bf16.mxu1 %v5603_v47  ;;  %v2830_v43 = vmul.f32 %v5671_v35, %v5671_v35  ;;  %v5895_v35 = vmul.f32 %v5689_v4, %v5689_v4  ;;  %v5905_v4 = vmul.f32 %v5693_v27, %v5693_v27 }
 0x1e1   : > { %2815 = vmatprep.mubr.bf16.mxu0 %v5603_v47  ;;  %v5923_v27 = vmul.f32 %v5703_v5, %v5703_v5  ;;  %v5942_v5 = vmul.f32 %v5715_v61, %v5715_v61  ;;  %v5955_v61 = vmul.f32 %v5725_v25, %v5725_v25  ;;  %v5964_v25 = vmul.f32 %v5727_v56, %v5727_v56 }
 0x1e7   : > { %2430 = vmatmul.mubr.bf16.gmra.mrb[124].mxu1 %v5615_v3 }
 0x1e8   : > { %2816 = vmatmul.mubr.bf16.gmra.mrb[124].mxu0 %v5615_v3  ;;  %v2833_v3 = vmul.f32 %v5679_v29, %v5679_v29  ;;  %v5899_v29 = vmul.f32 %v5691_v23, %v5691_v23 }
 0x242   : > { %v2281_v47 = vpop.f32.mrb[64].mxu1 }
 0x243   : > { %v2667_v60 = vpop.f32.mrb[64].mxu0  ;;  %v2828_v38 = vmul.f32 %v2281_v47, %v2281_v47  ;;  %v2283_v22 = vpop.f32.mrb[65].mxu1 }
 0x244   : > { %v2923_v33 = vmul.f32 %v2667_v60, %v2667_v60  ;;  %v2669_v51 = vpop.f32.mrb[65].mxu0  ;;  %v2922_v37 = vmul.f32 %v2283_v22, %v2283_v22  ;;  %v2285_v0 = vpop.f32.mrb[66].mxu1  ;;  %v5909_v22 = vmul.f32 %v5695_v59, %v5695_v59  ;;  %v5927_v59 = vmul.f32 %v5705_v53, %v5705_v53 }
 0x245   : > { %v2924_v2 = vmul.f32 %v2669_v51, %v2669_v51  ;;  %v2671_v9 = vpop.f32.mrb[66].mxu0  ;;  %v2831_v47 = vmul.f32 %v2285_v0, %v2285_v0  ;;  %v2287_v26 = vpop.f32.mrb[67].mxu1  ;;  %v5947_v53 = vmul.f32 %v5717_v20, %v5717_v20 }
 0x246   : > { %v3019_v15 = vadd.f32 %v2923_v33, %v2827_v16  ;;  %v2926_v60 = vmul.f32 %v2671_v9, %v2671_v9  ;;  %v2673_v17 = vpop.f32.mrb[67].mxu0  ;;  %v3018_v28 = vadd.f32 %v2922_v37, %v2826_v34  ;;  %v2925_v18 = vmul.f32 %v2287_v26, %v2287_v26 }
 0x247   : > { %v5901_v10 = vadd.f32 %v2924_v2, %v2828_v38  ;;  %v2927_v62 = vmul.f32 %v2673_v17, %v2673_v17  ;;  %v5915_v9 = vmul.f32 %v5701_v1, %v5701_v1  ;;  %v5934_v1 = vmul.f32 %v5707_v21, %v5707_v21 }
 0x248   : > { %v5911_v23 = vmax.f32 %v3019_v15, 1e-07  ;;  %v3022_v16 = vadd.f32 %v2926_v60, %v2830_v43  ;;  %v5917_v34 = vmax.f32 %v3018_v28, 1e-07  ;;  %v3021_v38 = vadd.f32 %v2925_v18, %v2829_v39 }
 0x249   : > { %7658 = vst [vmem:[#allocation8_spill] sm:$0xff] %v5901_v10  ;;  %v5919_v26 = vadd.f32 %v2927_v62, %v2831_v47  ;;  %v5938_v62 = vmul.f32 %v5713_v24, %v5713_v24  ;;  %v5951_v21 = vmul.f32 %v5719_v7, %v5719_v7 }
 0x24a   : > { %v5929_v17 = vmax.f32 %v3022_v16, 1e-07  ;;  %4964 = vrsqrt.f32 %v5911_v23  ;;  %v2291_v28 = vpop.f32.mrb[68].mxu1  ;;  %v5957_v37 = vmax.f32 %v3021_v38, 1e-07  ;;  %v5968_v38 = vmul.f32 %v5729_v31, %v5729_v31 }
 0x24b   : > { %7659 = vst [vmem:[#allocation9_spill] sm:$0xff] %v5919_v26  ;;  %v2677_v39 = vpop.f32.mrb[68].mxu0  ;;  %4966 = vrsqrt.f32 %v5917_v34  ;;  %v2834_v43 = vmul.f32 %v2291_v28, %v2291_v28  ;;  %v2293_v24 = vpop.f32.mrb[69].mxu1  ;;  %v5987_v31 = vmul.f32 %v5739_v49, %v5739_v49  ;;  %vm3219_vm0 = vcmp.eq.f32.partialorder %v5911_v23, inf }
 0x24c   : > { %v2929_v33 = vmul.f32 %v2677_v39, %v2677_v39  ;;  %v2679_v51 = vpop.f32.mrb[69].mxu0  ;;  %v2928_v2 = vmul.f32 %v2293_v24, %v2293_v24  ;;  %v2295_v15 = vpop.f32.mrb[70].mxu1  ;;  %4968 = vrsqrt.f32 %v5929_v17  ;;  %v5974_v24 = vmul.f32 %v5731_v44, %v5731_v44 }
 0x24d   : > { %v2930_v0 = vmul.f32 %v2679_v51, %v2679_v51  ;;  %v2681_v47 = vpop.f32.mrb[70].mxu0  ;;  %v2837_v60 = vmul.f32 %v2295_v15, %v2295_v15  ;;  %v2297_v16 = vpop.f32.mrb[71].mxu1  ;;  %v5995_v44 = vmul.f32 %v5743_v55, %v5743_v55  ;;  %4970 = vrsqrt.f32 %v5957_v37 }
 0x24e   : > { %v3025_v20 = vadd.f32 %v2929_v33, %v2833_v3  ;;  %v2932_v18 = vmul.f32 %v2681_v47, %v2681_v47  ;;  %v2683_v7 = vpop.f32.mrb[71].mxu0  ;;  %v3024_v28 = vadd.f32 %v2928_v2, %v2832_v41  ;;  %v2931_v26 = vmul.f32 %v2297_v16, %v2297_v16 }
 0x24f   : > { %v5960_v39 = vadd.f32 %v2930_v0, %v2834_v43  ;;  %v2933_v10 = vmul.f32 %v2683_v7, %v2683_v7  ;;  %v5978_v41 = vmul.f32 %v5737_v46, %v5737_v46  ;;  %vm3221_vm1 = vcmp.eq.f32.partialorder %v5911_v23, 0.0 }
 0x250   : > { %v5970_v3 = vmax.f32 %v3025_v20, 1e-07  ;;  %v3028_v33 = vadd.f32 %v2932_v18, %v2836_v45  ;;  %v5981_v43 = vadd.f32 %v2931_v26, %v5889_v30  ;;  %v5991_v45 = vmul.f32 %v5741_v14, %v5741_v14 }
 0x251   : > { %7660 = vst [vmem:[#allocation10_spill] sm:$0xff] %v5960_v39  ;;  %v5983_v56 = vadd.f32 %v2933_v10, %v2837_v60  ;;  %v3222_v10 = vand.u32 2147483648, %v5911_v23  ;;  %vm3212_vm2 = vcmp.eq.f32.partialorder %v5917_v34, inf  ;;  %vm3214_vm3 = vcmp.eq.f32.partialorder %v5917_v34, 0.0 }
 0x252   : > { %7662 = vst [vmem:[#allocation12_spill] sm:$0xff] %v5991_v45  ;;  %v2301_v46 = vpop.f32.mrb[72].mxu1  ;;  %4972 = vrsqrt.f32 %v5970_v3  ;;  %v6004_v0 = vmax.f32 %v3024_v28, 1e-07  ;;  %vm3240_vm4 = vcmp.eq.f32.partialorder %v5929_v17, inf  ;;  %vm3242_vm5 = vcmp.eq.f32.partialorder %v5929_v17, 0.0 }
 0x253   : > { %7661 = vst [vmem:[#allocation11_spill] sm:$0xff] %v5983_v56  ;;  %v2687_v51 = vpop.f32.mrb[72].mxu0  ;;  %v2840_v30 = vmul.f32 %v2301_v46, %v2301_v46  ;;  %v2303_v26 = vpop.f32.mrb[73].mxu1  ;;  %vm3233_vm6 = vcmp.eq.f32.partialorder %v5957_v37, inf  ;;  %vm3235_vm7 = vcmp.eq.f32.partialorder %v5957_v37, 0.0  ;;  %vm3261_vm8 = vcmp.eq.f32.partialorder %v5970_v3, inf }
 0x254   : > { %v4965_v49 = vpop.eup %4964  ;;  %v2935_v14 = vmul.f32 %v2687_v51, %v2687_v51  ;;  %v2689_v2 = vpop.f32.mrb[73].mxu0  ;;  %v2934_v15 = vmul.f32 %v2303_v26, %v2303_v26  ;;  %4974 = vrsqrt.f32 %v6004_v0  ;;  %vm3263_vm9 = vcmp.eq.f32.partialorder %v5970_v3, 0.0 }
 0x255   : > { %v4967_v55 = vpop.eup %4966  ;;  %v2936_v47 = vmul.f32 %v2689_v2, %v2689_v2  ;;  %v2305_v20 = vpop.f32.mrb[74].mxu1  ;;  %v3218_v18 = vmul.f32 %v4965_v49, %v5911_v23  ;;  %vm3254_vm10 = vcmp.eq.f32.partialorder %v6004_v0, inf  ;;  %vm3256_vm11 = vcmp.eq.f32.partialorder %v6004_v0, 0.0 }
 0x256   : > { %v2691_v60 = vpop.f32.mrb[74].mxu0  ;;  %v6008_v16 = vadd.f32 %v2935_v14, %v5899_v29  ;;  %v2843_v7 = vmul.f32 %v2305_v20, %v2305_v20  ;;  %v2307_v51 = vpop.f32.mrb[75].mxu1  ;;  %v3211_v39 = vmul.f32 %v4967_v55, %v5917_v34  ;;  %v6012_v50 = vadd.f32 %v2934_v15, %v5895_v35 }
 0x257   : > { %v2938_v46 = vmul.f32 %v2691_v60, %v2691_v60  ;;  %v2693_v56 = vpop.f32.mrb[75].mxu0  ;;  %v6014_v28 = vadd.f32 %v2936_v47, %v2840_v30  ;;  %v2937_v26 = vmul.f32 %v2307_v51, %v2307_v51  ;;  %v4969_v36 = vpop.eup %4968  ;;  %v3220_v29 = vsel %vm3219_vm0, %v5911_v23, %v3218_v18 }
 0x258   : > { %v2939_v2 = vmul.f32 %v2693_v56, %v2693_v56  ;;  %v3213_v49 = vsel %vm3212_vm2, %v5917_v34, %v3211_v39  ;;  %v3215_v14 = vand.u32 2147483648, %v5917_v34  ;;  %v3223_v56 = vsel %vm3221_vm1, %v3222_v10, %v3220_v29 }
 0x259   : > { %v6017_v45 = vadd.f32 %v2938_v46, %v5909_v22  ;;  %v6027_v35 = vadd.f32 %v2937_v26, %v5905_v4  ;;  %v6033_v22 = vmax.f32 %v3028_v33, 1e-07  ;;  %v3239_v39 = vmul.f32 %v4969_v36, %v5929_v17  ;;  %3914 = vxpose.xlu1.b32.start [1/16] %v3223_v56, 128  ;;  %v4971_v33 = vpop.eup %4970 }
 0x25a   : > { %v6029_v30 = vadd.f32 %v2939_v2, %v2843_v7  ;;  %v3216_v55 = vsel %vm3214_vm3, %v3215_v14, %v3213_v49  ;;  %v2311_v4 = vpop.f32.mrb[76].mxu1  ;;  %v3243_v47 = vand.u32 2147483648, %v5929_v17  ;;  %v3236_v60 = vand.u32 2147483648, %v5957_v37 }
 0x25b   : > { %3882 = vxpose.xlu0.b32.start [1/16] %v3216_v55, 128  ;;  %v2697_v15 = vpop.f32.mrb[76].mxu0  ;;  %v2846_v23 = vmul.f32 %v2311_v4, %v2311_v4  ;;  %v2313_v20 = vpop.f32.mrb[77].mxu1  ;;  %v3241_v36 = vsel %vm3240_vm4, %v5929_v17, %v3239_v39  ;;  %v3232_v29 = vmul.f32 %v4971_v33, %v5957_v37  ;;  %4976 = vrsqrt.f32 %v6033_v22 }
 0x25c   : > { %v2941_v10 = vmul.f32 %v2697_v15, %v2697_v15  ;;  %v2699_v34 = vpop.f32.mrb[77].mxu0  ;;  %v4973_v18 = vpop.eup %4972  ;;  %v2940_v7 = vmul.f32 %v2313_v20, %v2313_v20  ;;  %v3244_v26 = vsel %vm3242_vm5, %v3243_v47, %v3241_v36  ;;  %v6086_v36 = vmul.f32 %v5755_v57, %v5755_v57 }
 0x25d   : > { %v2942_v46 = vmul.f32 %v2699_v34, %v2699_v34  ;;  %v2701_v51 = vpop.f32.mrb[78].mxu0  ;;  %v2315_v2 = vpop.f32.mrb[78].mxu1  ;;  %v3260_v39 = vmul.f32 %v4973_v18, %v5970_v3  ;;  %3915 = vxpose.xlu1.b32.cont [2/16] %v3244_v26, 128  ;;  %v3234_v47 = vsel %vm3233_vm6, %v5957_v37, %v3232_v29  ;;  %v6082_v37 = vmul.f32 %v5753_v11, %v5753_v11 }
 0x25e   : > { %v6052_v49 = vadd.f32 %v2941_v10, %v5923_v27  ;;  %v2944_v14 = vmul.f32 %v2701_v51, %v2701_v51  ;;  %v2849_v56 = vmul.f32 %v2315_v2, %v2315_v2  ;;  %v2703_v55 = vpop.f32.mrb[79].mxu0  ;;  %v2317_v4 = vpop.f32.mrb[79].mxu1  ;;  %v6056_v15 = vadd.f32 %v2940_v7, %v5915_v9 }
 0x25f   : > { %v6058_v20 = vadd.f32 %v2942_v46, %v2846_v23  ;;  %v2945_v17 = vmul.f32 %v2703_v55, %v2703_v55  ;;  %v3237_v33 = vsel %vm3235_vm7, %v3236_v60, %v3234_v47  ;;  %v2943_v10 = vmul.f32 %v2317_v4, %v2317_v4  ;;  %v4975_v29 = vpop.eup %4974 }
 0x260   : > { %v6064_v27 = vadd.f32 %v2944_v14, %v5934_v1  ;;  %v6071_v9 = vmul.f32 %v5749_v42, %v5749_v42  ;;  %v6075_v23 = vmul.f32 %v5751_v58, %v5751_v58  ;;  %3883 = vxpose.xlu0.b32.cont [2/16] %v3237_v33, 128  ;;  %v3262_v1 = vsel %vm3261_vm8, %v5970_v3, %v3260_v39 }
 0x261   : > { %7663 = vst [vmem:[#allocation13_spill] sm:$0xff] %v6058_v20  ;;  %v6077_v34 = vadd.f32 %v2945_v17, %v2849_v56  ;;  %v6089_v42 = vadd.f32 %v2943_v10, %v5927_v59  ;;  %v3264_v60 = vand.u32 2147483648, %v5970_v3  ;;  %v6094_v58 = vmul.f32 %v5761_v48, %v5761_v48 }
 0x262   : > { %v6097_v18 = vmax.f32 %v5981_v43, 1e-07  ;;  %v2321_v11 = vpop.f32.mrb[80].mxu1  ;;  %v6102_v57 = vmax.f32 %v6008_v16, 1e-07  ;;  %v3253_v55 = vmul.f32 %v4975_v29, %v6004_v0  ;;  %v3257_v16 = vand.u32 2147483648, %v6004_v0 }
 0x263   : > { %7664 = vst [vmem:[#allocation14_spill] sm:$0xff] %v6077_v34  ;;  %v2707_v7 = vpop.f32.mrb[80].mxu0  ;;  %v3265_v59 = vsel %vm3263_vm9, %v3264_v60, %v3262_v1  ;;  %v2852_v46 = vmul.f32 %v2321_v11, %v2321_v11  ;;  %v2323_v26 = vpop.f32.mrb[81].mxu1  ;;  %v6105_v48 = vmax.f32 %v6012_v50, 1e-07  ;;  %v7668_v29 = vld [vmem:[#allocation17_spill] sm:$0xff] }
 0x264   : > { %v2947_v51 = vmul.f32 %v2707_v7, %v2707_v7  ;;  %v2709_v2 = vpop.f32.mrb[81].mxu0  ;;  %3916 = vxpose.xlu1.b32.cont [3/16] %v3265_v59, 128  ;;  %v2946_v3 = vmul.f32 %v2323_v26, %v2323_v26  ;;  %v2325_v56 = vpop.f32.mrb[82].mxu1  ;;  %v3255_v60 = vsel %vm3254_vm10, %v6004_v0, %v3253_v55  ;;  %4978 = vrsqrt.f32 %v6097_v18 }
 0x265   : > { %v2948_v43 = vmul.f32 %v2709_v2, %v2709_v2  ;;  %v2711_v14 = vpop.f32.mrb[82].mxu0  ;;  %v2327_v47 = vpop.f32.mrb[83].mxu1  ;;  %v2855_v10 = vmul.f32 %v2325_v56, %v2325_v56  ;;  %v3258_v7 = vsel %vm3256_vm11, %v3257_v16, %v3255_v60  ;;  %v6144_v0 = vmul.f32 %v5775_v32, %v5775_v32 }
 0x266   : > { %v6111_v4 = vadd.f32 %v2947_v51, %v5942_v5  ;;  %v2950_v39 = vmul.f32 %v2711_v14, %v2711_v14  ;;  %v2713_v17 = vpop.f32.mrb[83].mxu0  ;;  %v6114_v50 = vadd.f32 %v2946_v3, %v5938_v62  ;;  %v6126_v5 = vmul.f32 %v5763_v13, %v5763_v13  ;;  %3884 = vxpose.xlu0.b32.cont [3/16] %v3258_v7, 128  ;;  %v4977_v14 = vpop.eup %4976 }
 0x267   : > { %v6116_v33 = vadd.f32 %v2948_v43, %v2852_v46  ;;  %v2951_v1 = vmul.f32 %v2713_v17, %v2713_v17  ;;  %v6130_v62 = vmul.f32 %v5765_v19, %v5765_v19  ;;  %v6136_v46 = vmul.f32 %v5767_v40, %v5767_v40  ;;  %v7667_v19 = vld [vmem:[#allocation16_spill] sm:$0xff] }
 0x268   : > { %v6121_v11 = vadd.f32 %v2950_v39, %v5951_v21  ;;  %v6140_v21 = vmul.f32 %v5773_v12, %v5773_v12  ;;  %v6148_v13 = vmul.f32 %v5777_v63, %v5777_v63  ;;  %v6152_v51 = vmul.f32 %v7667_v19, %v7667_v19 }
 0x269   : > { %7665 = vst [vmem:[#allocation15_spill] sm:$0xff] %v6116_v33  ;;  %v6132_v59 = vadd.f32 %v2951_v1, %v2855_v10  ;;  %v6155_v40 = vmax.f32 %v6017_v45, 1e-07  ;;  %v2949_v26 = vmul.f32 %v2327_v47, %v2327_v47  ;;  %4980 = vrsqrt.f32 %v6102_v57 }
 0x26a   : > { %v2331_v12 = vpop.f32.mrb[84].mxu1  ;;  %v6160_v32 = vmul.f32 %v5785_v6, %v5785_v6  ;;  %v6164_v63 = vmul.f32 %v5787_v54, %v5787_v54  ;;  %v6168_v3 = vmul.f32 %v7668_v29, %v7668_v29  ;;  %4982 = vrsqrt.f32 %v6105_v48 }
 0x26b   : > { %7666 = vst [vmem:[#allocation35_spill] sm:$0xff] %v6132_v59  ;;  %v2717_v2 = vpop.f32.mrb[84].mxu0  ;;  %v2333_v45 = vpop.f32.mrb[85].mxu1  ;;  %v6172_v56 = vmax.f32 %v6027_v35, 1e-07  ;;  %vm3282_vm12 = vcmp.eq.f32.partialorder %v6033_v22, inf  ;;  %v6176_v6 = vadd.f32 %v2949_v26, %v5947_v53  ;;  %v2858_v55 = vmul.f32 %v2331_v12, %v2331_v12 }
 0x26c   : > { %v2719_v43 = vpop.f32.mrb[85].mxu0  ;;  %v2335_v16 = vpop.f32.mrb[86].mxu1  ;;  %v3281_v39 = vmul.f32 %v4977_v14, %v6033_v22  ;;  %v2953_v17 = vmul.f32 %v2717_v2, %v2717_v2  ;;  %v2952_v47 = vmul.f32 %v2333_v45, %v2333_v45  ;;  %vm3284_vm13 = vcmp.eq.f32.partialorder %v6033_v22, 0.0  ;;  %v7670_v2 = vld [vmem:[#allocation18_spill] sm:$0xff] }
 0x26d   : > { %v2721_v54 = vpop.f32.mrb[86].mxu0  ;;  %v2954_v10 = vmul.f32 %v2719_v43, %v2719_v43  ;;  %v2337_v60 = vpop.f32.mrb[87].mxu1  ;;  %v3285_v35 = vand.u32 2147483648, %v6033_v22  ;;  %4984 = vrsqrt.f32 %v6155_v40  ;;  %v6193_v29 = vmul.f32 %v7670_v2, %v7670_v2 }
 0x26e   : > { %v2723_v1 = vpop.f32.mrb[87].mxu0  ;;  %v2956_v7 = vmul.f32 %v2721_v54, %v2721_v54  ;;  %v3283_v53 = vsel %vm3282_vm12, %v6033_v22, %v3281_v39  ;;  %v6184_v19 = vadd.f32 %v2953_v17, %v5964_v25  ;;  %v6187_v26 = vadd.f32 %v2952_v47, %v5955_v61  ;;  %v4979_v22 = vpop.eup %4978 }
 0x26f   : > { %v6189_v12 = vadd.f32 %v2954_v10, %v2858_v55  ;;  %v6196_v45 = vmax.f32 %v6052_v49, 1e-07  ;;  %v3286_v43 = vsel %vm3284_vm13, %v3285_v35, %v3283_v53  ;;  %v6203_v25 = vmul.f32 %v5797_v8, %v5797_v8 }
 0x270   : > { %v6199_v14 = vadd.f32 %v2956_v7, %v5974_v24  ;;  %v6207_v61 = vmul.f32 %v5799_v52, %v5799_v52  ;;  %v6210_v55 = vmax.f32 %v6056_v15, 1e-07  ;;  %3917 = vxpose.xlu1.b32.cont [4/16] %v3286_v43, 128  ;;  %v2861_v54 = vmul.f32 %v2335_v16, %v2335_v16 }
 0x271   : > { %7669 = vst [vmem:[#allocation16_spill] sm:$0xff] %v6189_v12  ;;  %v6213_v49 = vmax.f32 %v6064_v27, 1e-07  ;;  %v3274_v24 = vmul.f32 %v4979_v22, %v6097_v18  ;;  %v2957_v39 = vmul.f32 %v2723_v1, %v2723_v1  ;;  %4986 = vrsqrt.f32 %v6172_v56 }
 0x272   : > { %v2341_v17 = vpop.f32.mrb[88].mxu1  ;;  %v6218_v47 = vmax.f32 %v6089_v42, 1e-07  ;;  %vm3275_vm14 = vcmp.eq.f32.partialorder %v6097_v18, inf  ;;  %v3278_v52 = vand.u32 2147483648, %v6097_v18  ;;  %v2955_v15 = vmul.f32 %v2337_v60, %v2337_v60 }
 0x273   : > { %v2727_v8 = vpop.f32.mrb[88].mxu0  ;;  %v2343_v10 = vpop.f32.mrb[89].mxu1  ;;  %v3276_v27 = vsel %vm3275_vm14, %v6097_v18, %v3274_v24  ;;  %vm3277_vm15 = vcmp.eq.f32.partialorder %v6097_v18, 0.0  ;;  %v6224_v1 = vadd.f32 %v2957_v39, %v2861_v54  ;;  %4988 = vrsqrt.f32 %v6196_v45 }
 0x274   : > { %v2729_v16 = vpop.f32.mrb[89].mxu0  ;;  %v4981_v35 = vpop.eup %4980  ;;  %v3279_v2 = vsel %vm3277_vm15, %v3278_v52, %v3276_v27  ;;  %vm3303_vm0 = vcmp.eq.f32.partialorder %v6102_v57, inf  ;;  %v6230_v60 = vadd.f32 %v2955_v15, %v5968_v38  ;;  %vm3305_vm1 = vcmp.eq.f32.partialorder %v6102_v57, 0.0 }
 0x275   : > { %7671 = vst [vmem:[#allocation17_spill] sm:$0xff] %v6224_v1  ;;  %v2731_v7 = vpop.f32.mrb[90].mxu0  ;;  %v2345_v53 = vpop.f32.mrb[90].mxu1  ;;  %v3302_v43 = vmul.f32 %v4981_v35, %v6102_v57  ;;  %3885 = vxpose.xlu0.b32.cont [4/16] %v3279_v2, 128  ;;  %v3306_v18 = vand.u32 2147483648, %v6102_v57  ;;  %4990 = vrsqrt.f32 %v6210_v55  ;;  %vm3296_vm2 = vcmp.eq.f32.partialorder %v6105_v48, inf }
 0x276   : > { %v4983_v42 = vpop.eup %4982  ;;  %v2733_v22 = vpop.f32.mrb[91].mxu0  ;;  %vm3298_vm3 = vcmp.eq.f32.partialorder %v6105_v48, 0.0  ;;  %v3299_v38 = vand.u32 2147483648, %v6105_v48  ;;  %vm3324_vm4 = vcmp.eq.f32.partialorder %v6155_v40, inf  ;;  %v2864_v35 = vmul.f32 %v2341_v17, %v2341_v17 }
 0x277   : > { %v2347_v12 = vpop.f32.mrb[91].mxu1  ;;  %v3295_v54 = vmul.f32 %v4983_v42, %v6105_v48  ;;  %v3304_v24 = vsel %vm3303_vm0, %v6102_v57, %v3302_v43  ;;  %v4985_v39 = vpop.eup %4984  ;;  %v2959_v2 = vmul.f32 %v2727_v8, %v2727_v8  ;;  %v2958_v1 = vmul.f32 %v2343_v10, %v2343_v10 }
 0x278   : > { %v3307_v52 = vsel %vm3305_vm1, %v3306_v18, %v3304_v24  ;;  %v3323_v42 = vmul.f32 %v4985_v39, %v6155_v40  ;;  %v3327_v57 = vand.u32 2147483648, %v6155_v40  ;;  %v2960_v43 = vmul.f32 %v2729_v16, %v2729_v16 }
 0x279   : > { %v3297_v15 = vsel %vm3296_vm2, %v6105_v48, %v3295_v54  ;;  %3918 = vxpose.xlu1.b32.cont [5/16] %v3307_v52, 128  ;;  %v2962_v59 = vmul.f32 %v2731_v7, %v2731_v7  ;;  %4992 = vrsqrt.f32 %v6213_v49  ;;  %vm3326_vm5 = vcmp.eq.f32.partialorder %v6155_v40, 0.0 }
 0x27a   : > { %v3300_v27 = vsel %vm3298_vm3, %v3299_v38, %v3297_v15  ;;  %v6245_v33 = vpop.f32.mrb[92].mxu1  ;;  %v3325_v48 = vsel %vm3324_vm4, %v6155_v40, %v3323_v42  ;;  %v6252_v17 = vadd.f32 %v2959_v2, %v5987_v31  ;;  %v6255_v8 = vadd.f32 %v2958_v1, %v5978_v41 }
 0x27b   : > { %3886 = vxpose.xlu0.b32.cont [5/16] %v3300_v27, 128  ;;  %v6247_v18 = vpop.f32.mrb[92].mxu0  ;;  %v2353_v10 = vpop.f32.mrb[93].mxu1  ;;  %v6258_v7 = vmax.f32 %v6111_v4, 1e-07  ;;  %v3328_v24 = vsel %vm3326_vm5, %v3327_v57, %v3325_v48  ;;  %v6260_v38 = vadd.f32 %v2960_v43, %v2864_v35  ;;  %v6263_v39 = vadd.f32 %v2962_v59, %v5995_v44 }
 0x27c   : > { %v2739_v54 = vpop.f32.mrb[93].mxu0  ;;  %v4987_v16 = vpop.eup %4986  ;;  %v6268_v31 = vmax.f32 %v6114_v50, 1e-07  ;;  %v6271_v41 = vmax.f32 %v6121_v11, 1e-07  ;;  %v2867_v4 = vmul.f32 %v2345_v53, %v2345_v53  ;;  %vm3317_vm6 = vcmp.eq.f32.partialorder %v6172_v56, inf }
 0x27d   : > { %7672 = vst [vmem:[#allocation18_spill] sm:$0xff] %v6260_v38  ;;  %v2741_v52 = vpop.f32.mrb[94].mxu0  ;;  %v6265_v40 = vpop.f32.mrb[94].mxu1  ;;  %3919 = vxpose.xlu1.b32.cont [6/16] %v3328_v24, 128  ;;  %v3316_v1 = vmul.f32 %v4987_v16, %v6172_v56  ;;  %v3320_v44 = vand.u32 2147483648, %v6172_v56  ;;  %v2963_v59 = vmul.f32 %v2733_v22, %v2733_v22  ;;  %4994 = vrsqrt.f32 %v6218_v47  ;;  %v7674_v24 = vld [vmem:[#allocation12_spill] sm:$0xff] }
 0x27e   : > { %v6274_v15 = vpop.f32.mrb[95].mxu0  ;;  %v6276_v35 = vpop.f32.mrb[95].mxu1  ;;  %vm3319_vm7 = vcmp.eq.f32.partialorder %v6172_v56, 0.0  ;;  %vm3345_vm8 = vcmp.eq.f32.partialorder %v6196_v45, inf  ;;  %v3348_v2 = vand.u32 2147483648, %v6196_v45  ;;  %v2961_v43 = vmul.f32 %v2347_v12, %v2347_v12 }
 0x27f   : > { %v4989_v27 = vpop.eup %4988  ;;  %v3318_v50 = vsel %vm3317_vm6, %v6172_v56, %v3316_v1  ;;  %v6286_v57 = vadd.f32 %v2963_v59, %v2867_v4  ;;  %vm3347_vm9 = vcmp.eq.f32.partialorder %v6196_v45, 0.0  ;;  %4996 = vrsqrt.f32 %v6258_v7 }
 0x280   : > { %v3344_v11 = vmul.f32 %v4989_v27, %v6196_v45  ;;  %v4991_v53 = vpop.eup %4990  ;;  %v3321_v42 = vsel %vm3319_vm7, %v3320_v44, %v3318_v50  ;;  %vm3338_vm10 = vcmp.eq.f32.partialorder %v6210_v55, inf  ;;  %v3341_v16 = vand.u32 2147483648, %v6210_v55  ;;  %v7675_v27 = vld [vmem:[#allocation19_spill] sm:$0xff] }
 0x281   : > { %7673 = vst [vmem:[#allocation36_spill] sm:$0xff] %v6286_v57  ;;  %3887 = vxpose.xlu0.b32.cont [6/16] %v3321_v42, 128  ;;  %v3337_v48 = vmul.f32 %v4991_v53, %v6210_v55  ;;  %v6295_v1 = vadd.f32 %v2961_v43, %v7674_v24  ;;  %v6303_v44 = vmul.f32 %v7675_v27, %v7675_v27  ;;  %vm3340_vm11 = vcmp.eq.f32.partialorder %v6210_v55, 0.0  ;;  %v7676_v53 = vld [vmem:[#allocation20_spill] sm:$0xff] }
 0x282   : > { %v3346_v22 = vsel %vm3345_vm8, %v6196_v45, %v3344_v11  ;;  %v6297_v4 = vpop.f32.mrb[96].mxu1  ;;  %4998 = vrsqrt.f32 %v6268_v31  ;;  %v6314_v42 = vmul.f32 %v7676_v53, %v7676_v53  ;;  %vm3366_vm12 = vcmp.eq.f32.partialorder %v6213_v49, inf }
 0x283   : > { %v3349_v56 = vsel %vm3347_vm9, %v3348_v2, %v3346_v22  ;;  %v6299_v12 = vpop.f32.mrb[96].mxu0  ;;  %v3339_v45 = vsel %vm3338_vm10, %v6210_v55, %v3337_v48  ;;  %v6308_v59 = vpop.f32.mrb[97].mxu1  ;;  %v6317_v2 = vmax.f32 %v6176_v6, 1e-07  ;;  %v2965_v24 = vmul.f32 %v6247_v18, %v6247_v18 }
 0x284   : > { %3920 = vxpose.xlu1.b32.cont [7/16] %v3349_v56, 128  ;;  %v6310_v50 = vpop.f32.mrb[97].mxu0  ;;  %v4993_v11 = vpop.eup %4992  ;;  %v3342_v43 = vsel %vm3340_vm11, %v3341_v16, %v3339_v45  ;;  %v2870_v56 = vmul.f32 %v6245_v33, %v6245_v33  ;;  %v2964_v27 = vmul.f32 %v2353_v10, %v2353_v10  ;;  %v3369_v16 = vand.u32 2147483648, %v6213_v49 }
 0x285   : > { %v6320_v22 = vpop.f32.mrb[98].mxu0  ;;  %v6322_v55 = vpop.f32.mrb[98].mxu1  ;;  %3888 = vxpose.xlu0.b32.cont [7/16] %v3342_v43, 128  ;;  %v3365_v48 = vmul.f32 %v4993_v11, %v6213_v49  ;;  %v2966_v45 = vmul.f32 %v2739_v54, %v2739_v54  ;;  %v2968_v57 = vmul.f32 %v2741_v52, %v2741_v52  ;;  %5000 = vrsqrt.f32 %v6271_v41  ;;  %v7677_v11 = vld [vmem:[#allocation21_spill] sm:$0xff] }
 0x286   : > { %v6329_v53 = vpop.f32.mrb[99].mxu0  ;;  %v6331_v6 = vpop.f32.mrb[99].mxu1  ;;  %vm3368_vm13 = vcmp.eq.f32.partialorder %v6213_v49, 0.0  ;;  %v6338_v33 = vadd.f32 %v2965_v24, %v6075_v23  ;;  %v6341_v18 = vadd.f32 %v2964_v27, %v6071_v9  ;;  %v6345_v38 = vmul.f32 %v7677_v11, %v7677_v11 }
 0x287   : > { %v3367_v43 = vsel %vm3366_vm12, %v6213_v49, %v3365_v48  ;;  %v4995_v10 = vpop.eup %4994  ;;  %v6347_v54 = vadd.f32 %v2966_v45, %v2870_v56  ;;  %v6350_v52 = vadd.f32 %v2968_v57, %v6086_v36  ;;  %v6353_v48 = vmax.f32 %v6184_v19, 1e-07 }
 0x288   : > { %v3370_v34 = vsel %vm3368_vm13, %v3369_v16, %v3367_v43  ;;  %v6356_v23 = vmax.f32 %v6187_v26, 1e-07  ;;  %v3358_v9 = vmul.f32 %v4995_v10, %v6218_v47  ;;  %v2873_v49 = vmul.f32 %v6265_v40, %v6265_v40 }
 0x289   : > { %7678 = vst [vmem:[#allocation12_spill] sm:$0xff] %v6347_v54  ;;  %3921 = vxpose.xlu1.b32.cont [8/16] %v3370_v34, 128  ;;  %vm3359_vm14 = vcmp.eq.f32.partialorder %v6218_v47, inf  ;;  %v3362_v56 = vand.u32 2147483648, %v6218_v47  ;;  %v2969_v36 = vmul.f32 %v6274_v15, %v6274_v15  ;;  %5002 = vrsqrt.f32 %v6317_v2  ;;  %v4997_v26 = vpop.eup %4996  ;;  %v7679_v34 = vld [vmem:[#allocation22_spill] sm:$0xff] }
 0x28a   : > { %v6366_v19 = vpop.f32.mrb[100].mxu1  ;;  %v6372_v24 = vmul.f32 %v7679_v34, %v7679_v34  ;;  %v6375_v40 = vmax.f32 %v6199_v14, 1e-07  ;;  %v3360_v27 = vsel %vm3359_vm14, %v6218_v47, %v3358_v9  ;;  %vm3361_vm15 = vcmp.eq.f32.partialorder %v6218_v47, 0.0 }
 0x28b   : > { %v6368_v57 = vpop.f32.mrb[100].mxu0  ;;  %v6379_v16 = vpop.f32.mrb[101].mxu1  ;;  %v3363_v45 = vsel %vm3361_vm15, %v3362_v56, %v3360_v27  ;;  %v3386_v43 = vmul.f32 %v4997_v26, %v6258_v7  ;;  %v6384_v10 = vadd.f32 %v2969_v36, %v2873_v49  ;;  %v2967_v11 = vmul.f32 %v6276_v35, %v6276_v35 }
 0x28c   : > { %v6381_v15 = vpop.f32.mrb[101].mxu0  ;;  %v6390_v14 = vpop.f32.mrb[102].mxu1  ;;  %v6393_v9 = vmax.f32 %v6230_v60, 1e-07  ;;  %3889 = vxpose.xlu0.b32.cont [8/16] %v3363_v45, 128  ;;  %vm3387_vm0 = vcmp.eq.f32.partialorder %v6258_v7, inf  ;;  %v3390_v47 = vand.u32 2147483648, %v6258_v7  ;;  %5004 = vrsqrt.f32 %v6353_v48 }
 0x28d   : > { %7680 = vst [vmem:[#allocation19_spill] sm:$0xff] %v6384_v10  ;;  %v6388_v34 = vpop.f32.mrb[102].mxu0  ;;  %v4999_v54 = vpop.eup %4998  ;;  %v3388_v35 = vsel %vm3387_vm0, %v6258_v7, %v3386_v43  ;;  %vm3389_vm1 = vcmp.eq.f32.partialorder %v6258_v7, 0.0  ;;  %v6406_v60 = vadd.f32 %v2967_v11, %v6082_v37  ;;  %vm3380_vm2 = vcmp.eq.f32.partialorder %v6268_v31, inf }
 0x28e   : > { %v6398_v49 = vpop.f32.mrb[103].mxu0  ;;  %v6400_v56 = vpop.f32.mrb[103].mxu1  ;;  %v3379_v36 = vmul.f32 %v4999_v54, %v6268_v31  ;;  %v3391_v26 = vsel %vm3389_vm1, %v3390_v47, %v3388_v35  ;;  %v3383_v27 = vand.u32 2147483648, %v6268_v31  ;;  %5006 = vrsqrt.f32 %v6356_v23 }
 0x28f   : > { %v5001_v45 = vpop.eup %5000  ;;  %3922 = vxpose.xlu1.b32.cont [9/16] %v3391_v26, 128  ;;  %vm3382_vm3 = vcmp.eq.f32.partialorder %v6268_v31, 0.0  ;;  %vm3408_vm4 = vcmp.eq.f32.partialorder %v6271_v41, inf  ;;  %v2876_v7 = vmul.f32 %v6297_v4, %v6297_v4  ;;  %v2971_v43 = vmul.f32 %v6299_v12, %v6299_v12 }
 0x290   : > { %v3381_v10 = vsel %vm3380_vm2, %v6268_v31, %v3379_v36  ;;  %v3407_v54 = vmul.f32 %v5001_v45, %v6271_v41  ;;  %v2970_v11 = vmul.f32 %v6308_v59, %v6308_v59  ;;  %v3411_v47 = vand.u32 2147483648, %v6271_v41 }
 0x291   : > { %v3384_v37 = vsel %vm3382_vm3, %v3383_v27, %v3381_v10  ;;  %v2972_v31 = vmul.f32 %v6310_v50, %v6310_v50  ;;  %v2974_v35 = vmul.f32 %v6320_v22, %v6320_v22  ;;  %5008 = vrsqrt.f32 %v6375_v40  ;;  %v7682_v27 = vld [vmem:[#allocation23_spill] sm:$0xff] }
 0x292   : > { %3890 = vxpose.xlu0.b32.cont [9/16] %v3384_v37, 128  ;;  %v6427_v4 = vpop.f32.mrb[104].mxu1  ;;  %v3409_v12 = vsel %vm3408_vm4, %v6271_v41, %v3407_v54  ;;  %vm3410_vm5 = vcmp.eq.f32.partialorder %v6271_v41, 0.0  ;;  %v6434_v59 = vadd.f32 %v2971_v43, %v6126_v5  ;;  %v6437_v36 = vadd.f32 %v2970_v11, %v6094_v58  ;;  %v7686_v58 = vld [vmem:[#allocation24_spill] sm:$0xff] }
 0x293   : > { %v6429_v10 = vpop.f32.mrb[104].mxu0  ;;  %v6439_v50 = vpop.f32.mrb[105].mxu1  ;;  %v6445_v45 = vmul.f32 %v7682_v27, %v7682_v27  ;;  %v3412_v37 = vsel %vm3410_vm5, %v3411_v47, %v3409_v12  ;;  %v6447_v20 = vadd.f32 %v2972_v31, %v2876_v7  ;;  %v6450_v41 = vadd.f32 %v2974_v35, %v6136_v46 }
 0x294   : > { %7681 = vst [vmem:[#allocation20_spill] sm:$0xff] %v6434_v59  ;;  %v6441_v26 = vpop.f32.mrb[105].mxu0  ;;  %v5003_v22 = vpop.eup %5002  ;;  %v6458_v43 = vmul.f32 %v7686_v58, %v7686_v58  ;;  %v6461_v11 = vmax.f32 %v6252_v17, 1e-07  ;;  %3923 = vxpose.xlu1.b32.cont [10/16] %v3412_v37, 128  ;;  %v2879_v7 = vmul.f32 %v6322_v55, %v6322_v55  ;;  %vm3401_vm6 = vcmp.eq.f32.partialorder %v6317_v2, inf }
 0x295   : > { %7683 = vst [vmem:[#allocation21_spill] sm:$0xff] %v6445_v45  ;;  %7684 = vst [vmem:[#allocation22_spill] sm:$0xff] %v6447_v20  ;;  %v6452_v5 = vpop.f32.mrb[106].mxu0  ;;  %v6454_v54 = vpop.f32.mrb[106].mxu1  ;;  %v3400_v27 = vmul.f32 %v5003_v22, %v6317_v2  ;;  %v3404_v31 = vand.u32 2147483648, %v6317_v2  ;;  %v2975_v35 = vmul.f32 %v6329_v53, %v6329_v53  ;;  %5010 = vrsqrt.f32 %v6393_v9 }
 0x296   : > { %7685 = vst [vmem:[#allocation23_spill] sm:$0xff] %v6450_v41  ;;  %v6466_v47 = vpop.f32.mrb[107].mxu0  ;;  %v6468_v46 = vpop.f32.mrb[107].mxu1  ;;  %v6476_v12 = vmax.f32 %v6255_v8, 1e-07  ;;  %vm3403_vm7 = vcmp.eq.f32.partialorder %v6317_v2, 0.0  ;;  %v2973_v53 = vmul.f32 %v6331_v6, %v6331_v6  ;;  %5012 = vrsqrt.f32 %v6461_v11 }
 0x297   : > { %v5005_v17 = vpop.eup %5004  ;;  %v6479_v22 = vmax.f32 %v6263_v39, 1e-07  ;;  %v3402_v55 = vsel %vm3401_vm6, %v6317_v2, %v3400_v27  ;;  %v6484_v41 = vadd.f32 %v2975_v35, %v2879_v7  ;;  %v6489_v59 = vmax.f32 %v6295_v1, 1e-07 }
 0x298   : > { %v3405_v37 = vsel %vm3403_vm7, %v3404_v31, %v3402_v55  ;;  %v3428_v58 = vmul.f32 %v5005_v17, %v6353_v48  ;;  %v5007_v20 = vpop.eup %5006  ;;  %vm3429_vm8 = vcmp.eq.f32.partialorder %v6353_v48, inf  ;;  %v3432_v8 = vand.u32 2147483648, %v6353_v48 }
 0x299   : > { %7687 = vst [vmem:[#allocation24_spill] sm:$0xff] %v6484_v41  ;;  %3891 = vxpose.xlu0.b32.cont [10/16] %v3405_v37, 128  ;;  %vm3431_vm9 = vcmp.eq.f32.partialorder %v6353_v48, 0.0  ;;  %v3421_v2 = vmul.f32 %v5007_v20, %v6356_v23  ;;  %v6498_v27 = vadd.f32 %v2973_v53, %v6130_v62  ;;  %vm3422_vm10 = vcmp.eq.f32.partialorder %v6356_v23, inf }
 0x29a   : > { %v3430_v39 = vsel %vm3429_vm8, %v6353_v48, %v3428_v58  ;;  %v6500_v6 = vpop.f32.mrb[108].mxu1  ;;  %v3425_v31 = vand.u32 2147483648, %v6356_v23  ;;  %5014 = vrsqrt.f32 %v6476_v12  ;;  %vm3424_vm11 = vcmp.eq.f32.partialorder %v6356_v23, 0.0 }
 0x29b   : > { %v6502_v1 = vpop.f32.mrb[108].mxu0  ;;  %v3433_v7 = vsel %vm3431_vm9, %v3432_v8, %v3430_v39  ;;  %v6507_v35 = vpop.f32.mrb[109].mxu1  ;;  %v3423_v20 = vsel %vm3422_vm10, %v6356_v23, %v3421_v2  ;;  %vm3450_vm12 = vcmp.eq.f32.partialorder %v6375_v40, inf  ;;  %v2882_v62 = vmul.f32 %v6366_v19, %v6366_v19 }
 0x29c   : > { %v6509_v17 = vpop.f32.mrb[109].mxu0  ;;  %v5009_v48 = vpop.eup %5008  ;;  %3924 = vxpose.xlu1.b32.cont [11/16] %v3433_v7, 128  ;;  %v3426_v58 = vsel %vm3424_vm11, %v3425_v31, %v3423_v20  ;;  %v2977_v8 = vmul.f32 %v6368_v57, %v6368_v57  ;;  %v2976_v39 = vmul.f32 %v6379_v16, %v6379_v16  ;;  %v3453_v19 = vand.u32 2147483648, %v6375_v40 }
 0x29d   : > { %v6516_v55 = vpop.f32.mrb[110].mxu1  ;;  %v6518_v37 = vpop.f32.mrb[110].mxu0  ;;  %v3449_v53 = vmul.f32 %v5009_v48, %v6375_v40  ;;  %3892 = vxpose.xlu0.b32.cont [11/16] %v3426_v58, 128  ;;  %v2978_v7 = vmul.f32 %v6381_v15, %v6381_v15  ;;  %v2980_v31 = vmul.f32 %v6388_v34, %v6388_v34  ;;  %5016 = vrsqrt.f32 %v6479_v22  ;;  %v7689_v58 = vld [vmem:[#allocation25_spill] sm:$0xff] }
 0x29e   : > { %v6525_v2 = vpop.f32.mrb[111].mxu0  ;;  %v6527_v23 = vpop.f32.mrb[111].mxu1  ;;  %vm3452_vm13 = vcmp.eq.f32.partialorder %v6375_v40, 0.0  ;;  %v6538_v16 = vadd.f32 %v2977_v8, %v6144_v0  ;;  %v6541_v48 = vadd.f32 %v2976_v39, %v6140_v21  ;;  %v6545_v41 = vmul.f32 %v7689_v58, %v7689_v58  ;;  %v7692_v39 = vld [vmem:[#allocation26_spill] sm:$0xff] }
 0x29f   : > { %v3451_v57 = vsel %vm3450_vm12, %v6375_v40, %v3449_v53  ;;  %v5011_v20 = vpop.eup %5010  ;;  %v6547_v45 = vadd.f32 %v2978_v7, %v2882_v62  ;;  %v6550_v34 = vadd.f32 %v2980_v31, %v6152_v51  ;;  %v6553_v53 = vmax.f32 %v6338_v33, 1e-07 }
 0x2a0   : > { %7688 = vst [vmem:[#allocation37_spill] sm:$0xff] %v6538_v16  ;;  %v3454_v15 = vsel %vm3452_vm13, %v3453_v19, %v3451_v57  ;;  %v6556_v0 = vmax.f32 %v6341_v18, 1e-07  ;;  %v3442_v21 = vmul.f32 %v5011_v20, %v6393_v9  ;;  %v2885_v40 = vmul.f32 %v6390_v14, %v6390_v14  ;;  %v5013_v18 = vpop.eup %5012 }
 0x2a1   : > { %7690 = vst [vmem:[#allocation25_spill] sm:$0xff] %v6547_v45  ;;  %7691 = vst [vmem:[#allocation38_spill] sm:$0xff] %v6550_v34  ;;  %3925 = vxpose.xlu1.b32.cont [12/16] %v3454_v15, 128  ;;  %vm3443_vm14 = vcmp.eq.f32.partialorder %v6393_v9, inf  ;;  %v3446_v62 = vand.u32 2147483648, %v6393_v9  ;;  %v2981_v51 = vmul.f32 %v6398_v49, %v6398_v49  ;;  %5018 = vrsqrt.f32 %v6489_v59 }
 0x2a2   : > { %v6566_v33 = vpop.f32.mrb[112].mxu1  ;;  %v6572_v19 = vmul.f32 %v7692_v39, %v7692_v39  ;;  %v6575_v14 = vmax.f32 %v6350_v52, 1e-07  ;;  %v3444_v7 = vsel %vm3443_vm14, %v6393_v9, %v3442_v21  ;;  %vm3445_vm15 = vcmp.eq.f32.partialorder %v6393_v9, 0.0 }
 0x2a3   : > { %v6568_v8 = vpop.f32.mrb[112].mxu0  ;;  %v6579_v31 = vpop.f32.mrb[113].mxu1  ;;  %v3447_v57 = vsel %vm3445_vm15, %v3446_v62, %v3444_v7  ;;  %v3470_v20 = vmul.f32 %v5013_v18, %v6461_v11  ;;  %v6584_v58 = vadd.f32 %v2981_v51, %v2885_v40  ;;  %v2979_v15 = vmul.f32 %v6400_v56, %v6400_v56 }
 0x2a4   : > { %v6581_v49 = vpop.f32.mrb[113].mxu0  ;;  %v6588_v39 = vpop.f32.mrb[114].mxu1  ;;  %v6593_v21 = vmax.f32 %v6406_v60, 1e-07  ;;  %3893 = vxpose.xlu0.b32.cont [12/16] %v3447_v57, 128  ;;  %vm3471_vm0 = vcmp.eq.f32.partialorder %v6461_v11, inf  ;;  %v3474_v9 = vand.u32 2147483648, %v6461_v11  ;;  %5020 = vrsqrt.f32 %v6553_v53 }
 0x2a5   : > { %7693 = vst [vmem:[#allocation26_spill] sm:$0xff] %v6584_v58  ;;  %v6590_v52 = vpop.f32.mrb[114].mxu0  ;;  %v5015_v34 = vpop.eup %5014  ;;  %v3472_v56 = vsel %vm3471_vm0, %v6461_v11, %v3470_v20  ;;  %vm3473_vm1 = vcmp.eq.f32.partialorder %v6461_v11, 0.0  ;;  %v6606_v60 = vadd.f32 %v2979_v15, %v6148_v13  ;;  %vm3464_vm2 = vcmp.eq.f32.partialorder %v6476_v12, inf }
 0x2a6   : > { %v6598_v40 = vpop.f32.mrb[115].mxu0  ;;  %v6600_v62 = vpop.f32.mrb[115].mxu1  ;;  %v3463_v51 = vmul.f32 %v5015_v34, %v6476_v12  ;;  %v3475_v18 = vsel %vm3473_vm1, %v3474_v9, %v3472_v56  ;;  %v3467_v7 = vand.u32 2147483648, %v6476_v12  ;;  %5022 = vrsqrt.f32 %v6556_v0 }
 0x2a7   : > { %v5017_v57 = vpop.eup %5016  ;;  %3926 = vxpose.xlu1.b32.cont [13/16] %v3475_v18, 128  ;;  %vm3466_vm3 = vcmp.eq.f32.partialorder %v6476_v12, 0.0  ;;  %vm3492_vm4 = vcmp.eq.f32.partialorder %v6479_v22, inf  ;;  %v2888_v11 = vmul.f32 %v6427_v4, %v6427_v4  ;;  %v2983_v20 = vmul.f32 %v6429_v10, %v6429_v10 }
 0x2a8   : > { %v3465_v58 = vsel %vm3464_vm2, %v6476_v12, %v3463_v51  ;;  %v3491_v34 = vmul.f32 %v5017_v57, %v6479_v22  ;;  %v2982_v15 = vmul.f32 %v6439_v50, %v6439_v50  ;;  %v3495_v9 = vand.u32 2147483648, %v6479_v22 }
 0x2a9   : > { %v3468_v13 = vsel %vm3466_vm3, %v3467_v7, %v3465_v58  ;;  %v2984_v12 = vmul.f32 %v6441_v26, %v6441_v26  ;;  %v2986_v56 = vmul.f32 %v6452_v5, %v6452_v5  ;;  %5024 = vrsqrt.f32 %v6575_v14  ;;  %v7695_v7 = vld [vmem:[#allocation8_spill] sm:$0xff] }
 0x2aa   : > { %3894 = vxpose.xlu0.b32.cont [13/16] %v3468_v13, 128  ;;  %v6627_v4 = vpop.f32.mrb[116].mxu1  ;;  %v3493_v10 = vsel %vm3492_vm4, %v6479_v22, %v3491_v34  ;;  %vm3494_vm5 = vcmp.eq.f32.partialorder %v6479_v22, 0.0  ;;  %v6634_v50 = vadd.f32 %v2983_v20, %v6164_v63  ;;  %v6637_v51 = vadd.f32 %v2982_v15, %v6160_v32  ;;  %v7698_v32 = vld [vmem:[#allocation9_spill] sm:$0xff] }
 0x2ab   : > { %v6629_v58 = vpop.f32.mrb[116].mxu0  ;;  %v6639_v26 = vpop.f32.mrb[117].mxu1  ;;  %v6644_v57 = vmax.f32 %v7695_v7, 1e-07  ;;  %v3496_v13 = vsel %vm3494_vm5, %v3495_v9, %v3493_v10  ;;  %v6646_v45 = vadd.f32 %v2984_v12, %v2888_v11  ;;  %v6649_v34 = vadd.f32 %v2986_v56, %v6193_v29 }
 0x2ac   : > { %7694 = vst [vmem:[#allocation39_spill] sm:$0xff] %v6634_v50  ;;  %v6641_v18 = vpop.f32.mrb[117].mxu0  ;;  %v5019_v5 = vpop.eup %5018  ;;  %v6656_v20 = vmax.f32 %v7698_v32, 1e-07  ;;  %v6659_v15 = vmax.f32 %v6437_v36, 1e-07  ;;  %3927 = vxpose.xlu1.b32.cont [14/16] %v3496_v13, 128  ;;  %v2891_v11 = vmul.f32 %v6454_v54, %v6454_v54  ;;  %v2987_v56 = vmul.f32 %v6466_v47, %v6466_v47 }
 0x2ad   : > { %7696 = vst [vmem:[#allocation8_spill] sm:$0xff] %v6646_v45  ;;  %7697 = vst [vmem:[#allocation40_spill] sm:$0xff] %v6649_v34  ;;  %v6651_v22 = vpop.f32.mrb[118].mxu1  ;;  %v6653_v63 = vpop.f32.mrb[118].mxu0  ;;  %v3484_v7 = vmul.f32 %v5019_v5, %v6489_v59  ;;  %vm3485_vm6 = vcmp.eq.f32.partialorder %v6489_v59, inf  ;;  %v3488_v12 = vand.u32 2147483648, %v6489_v59  ;;  %5026 = vrsqrt.f32 %v6593_v21 }
 0x2ae   : > { %v6664_v9 = vpop.f32.mrb[119].mxu0  ;;  %v6666_v29 = vpop.f32.mrb[119].mxu1  ;;  %v6674_v10 = vmax.f32 %v6498_v27, 1e-07  ;;  %vm3487_vm7 = vcmp.eq.f32.partialorder %v6489_v59, 0.0  ;;  %vm3513_vm8 = vcmp.eq.f32.partialorder %v6553_v53, inf  ;;  %v6680_v32 = vadd.f32 %v2987_v56, %v2891_v11 }
 0x2af   : > { %v5021_v36 = vpop.eup %5020  ;;  %v3486_v5 = vsel %vm3485_vm6, %v6489_v59, %v3484_v7  ;;  %v2985_v47 = vmul.f32 %v6468_v46, %v6468_v46  ;;  %vm3515_vm9 = vcmp.eq.f32.partialorder %v6553_v53, 0.0  ;;  %v3516_v27 = vand.u32 2147483648, %v6553_v53 }
 0x2b0   : > { %v3489_v54 = vsel %vm3487_vm7, %v3488_v12, %v3486_v5  ;;  %v3512_v13 = vmul.f32 %v5021_v36, %v6553_v53  ;;  %7699 = vst [vmem:[#allocation9_spill] sm:$0xff] %v6680_v32  ;;  %v5023_v34 = vpop.eup %5022  ;;  %vm3506_vm10 = vcmp.eq.f32.partialorder %v6556_v0, inf  ;;  %5028 = vrsqrt.f32 %v6644_v57 }
 0x2b1   : > { %3895 = vxpose.xlu0.b32.cont [14/16] %v3489_v54, 128  ;;  %v3505_v7 = vmul.f32 %v5023_v34, %v6556_v0  ;;  %vm3508_vm11 = vcmp.eq.f32.partialorder %v6556_v0, 0.0  ;;  %v6692_v11 = vadd.f32 %v2985_v47, %v6168_v3  ;;  %v3509_v36 = vand.u32 2147483648, %v6556_v0 }
 0x2b2   : > { %v3514_v59 = vsel %vm3513_vm8, %v6553_v53, %v3512_v13  ;;  %v6694_v46 = vpop.f32.mrb[120].mxu1  ;;  %vm3534_vm12 = vcmp.eq.f32.partialorder %v6575_v14, inf  ;;  %5030 = vrsqrt.f32 %v6659_v15  ;;  %vm3536_vm13 = vcmp.eq.f32.partialorder %v6575_v14, 0.0 }
 0x2b3   : > { %v6696_v12 = vpop.f32.mrb[120].mxu0  ;;  %v3517_v56 = vsel %vm3515_vm9, %v3516_v27, %v3514_v59  ;;  %v6701_v5 = vpop.f32.mrb[121].mxu1  ;;  %v3507_v3 = vsel %vm3506_vm10, %v6556_v0, %v3505_v7  ;;  %v3537_v54 = vand.u32 2147483648, %v6575_v14  ;;  %v2894_v13 = vmul.f32 %v6500_v6, %v6500_v6 }
 0x2b4   : > { %v6703_v53 = vpop.f32.mrb[121].mxu0  ;;  %v5025_v34 = vpop.eup %5024  ;;  %3928 = vxpose.xlu1.b32.cont [15/16] %v3517_v56, 128  ;;  %v3510_v59 = vsel %vm3508_vm11, %v3509_v36, %v3507_v3  ;;  %v2989_v32 = vmul.f32 %v6502_v1, %v6502_v1  ;;  %v2988_v7 = vmul.f32 %v6507_v35, %v6507_v35  ;;  %v2990_v6 = vmul.f32 %v6509_v17, %v6509_v17 }
 0x2b5   : > { %v6712_v47 = vpop.f32.mrb[122].mxu1  ;;  %v6714_v27 = vpop.f32.mrb[122].mxu0  ;;  %v3533_v56 = vmul.f32 %v5025_v34, %v6575_v14  ;;  %3896 = vxpose.xlu0.b32.cont [15/16] %v3510_v59, 128  ;;  %v2897_v0 = vmul.f32 %v6516_v55, %v6516_v55  ;;  %v2992_v36 = vmul.f32 %v6518_v37, %v6518_v37  ;;  %v2993_v1 = vmul.f32 %v6525_v2, %v6525_v2 }
 0x2b6   : > { %v6723_v45 = vpop.f32.mrb[123].mxu0  ;;  %v6725_v50 = vpop.f32.mrb[123].mxu1  ;;  %v6739_v34 = vadd.f32 %v2989_v32, %v6207_v61  ;;  %v6742_v3 = vadd.f32 %v2988_v7, %v6203_v25  ;;  %5032 = vrsqrt.f32 %v6656_v20  ;;  %v6747_v37 = vadd.f32 %v2990_v6, %v2894_v13  ;;  %v7705_v32 = vld [vmem:[#allocation28_spill] sm:$0xff]  ;;  %v7706_v7 = vld [vmem:[#allocation10_spill] sm:$0xff]  ;;  %v7707_v6 = vld [vmem:[#allocation29_spill] sm:$0xff] }
 0x2b7   : > { %v3535_v35 = vsel %vm3534_vm12, %v6575_v14, %v3533_v56  ;;  %v5027_v17 = vpop.eup %5026  ;;  %v6750_v2 = vadd.f32 %v2992_v36, %v6314_v42  ;;  %v6752_v59 = vadd.f32 %v2993_v1, %v2897_v0  ;;  %v7704_v56 = vld [vmem:[#allocation27_spill] sm:$0xff]  ;;  %v6760_v25 = vmul.f32 %v7705_v32, %v7705_v32 }
 0x2b8   : > { %7700 = vst [vmem:[#allocation41_spill] sm:$0xff] %v6739_v34  ;;  %v3538_v55 = vsel %vm3536_vm13, %v3537_v54, %v3535_v35  ;;  %7701 = vst [vmem:[#allocation42_spill] sm:$0xff] %v6747_v37  ;;  %v6756_v61 = vmul.f32 %v7704_v56, %v7704_v56  ;;  %v6763_v34 = vmax.f32 %v7706_v7, 1e-07  ;;  %v3526_v14 = vmul.f32 %v5027_v17, %v6593_v21  ;;  %v7708_v36 = vld [vmem:[#allocation11_spill] sm:$0xff] }
 0x2b9   : > { %7702 = vst [vmem:[#allocation43_spill] sm:$0xff] %v6750_v2  ;;  %7703 = vst [vmem:[#allocation44_spill] sm:$0xff] %v6752_v59  ;;  %3929 = vxpose.xlu1.b32.end [16/16] %v3538_v55, 128  ;;  %v6767_v54 = vmax.f32 %v6541_v48, 1e-07  ;;  %vm3527_vm14 = vcmp.eq.f32.partialorder %v6593_v21, inf  ;;  %v3530_v42 = vand.u32 2147483648, %v6593_v21  ;;  %5034 = vrsqrt.f32 %v6674_v10 }
 0x2ba   : > { %v5029_v13 = vpop.eup %5028  ;;  %v6774_v0 = vmul.f32 %v7707_v6, %v7707_v6  ;;  %v6777_v1 = vmax.f32 %v7708_v36, 1e-07  ;;  %v3528_v35 = vsel %vm3527_vm14, %v6593_v21, %v3526_v14  ;;  %vm3529_vm15 = vcmp.eq.f32.partialorder %v6593_v21, 0.0  ;;  %v6781_v48 = vpop.f32.mrb[124].mxu1 }
 0x2bb   : > { %v6783_v17 = vpop.f32.mrb[124].mxu0  ;;  %v6786_v55 = vmax.f32 %v6606_v60, 1e-07  ;;  %v3531_v56 = vsel %vm3529_vm15, %v3530_v42, %v3528_v35  ;;  %v3225_v32 = vmul.f32 %v5029_v13, %v6644_v57  ;;  %vm3226_vm0 = vcmp.eq.f32.partialorder %v6644_v57, inf  ;;  %v6790_v7 = vpop.f32.mrb[125].mxu1 }
 0x2bc   : > { %v6792_v6 = vpop.f32.mrb[125].mxu0  ;;  %v5031_v36 = vpop.eup %5030  ;;  %3897 = vxpose.xlu0.b32.end [16/16] %v3531_v56, 128  ;;  %vm3228_vm1 = vcmp.eq.f32.partialorder %v6644_v57, 0.0  ;;  %v3229_v21 = vand.u32 2147483648, %v6644_v57  ;;  %v2991_v14 = vmul.f32 %v6527_v23, %v6527_v23  ;;  %5036 = vrsqrt.f32 %v6763_v34 }
 0x2bd   : > { %v6799_v60 = vpop.f32.mrb[126].mxu1  ;;  %v6801_v42 = vpop.f32.mrb[126].mxu0  ;;  %v3227_v13 = vsel %vm3226_vm0, %v6644_v57, %v3225_v32  ;;  %v3547_v35 = vmul.f32 %v5031_v36, %v6659_v15  ;;  %vm3548_vm2 = vcmp.eq.f32.partialorder %v6659_v15, inf  ;;  %5038 = vrsqrt.f32 %v6767_v54 }
 0x2be   : > { %7709 = vst [vmem:[#allocation27_spill] sm:$0xff] %v6801_v42  ;;  %v6807_v56 = vpop.f32.mrb[127].mxu0  ;;  %v6809_v59 = vpop.f32.mrb[127].mxu1  ;;  %vm3550_vm3 = vcmp.eq.f32.partialorder %v6659_v15, 0.0  ;;  %v3551_v23 = vand.u32 2147483648, %v6659_v15  ;;  %vm3247_vm4 = vcmp.eq.f32.partialorder %v6656_v20, inf  ;;  %v6815_v2 = vadd.f32 %v2991_v14, %v6303_v44 }
 0x2bf   : > { %7710 = vst [vmem:[#allocation28_spill] sm:$0xff] %v6807_v56  ;;  %7711 = vst [vmem:[#allocation10_spill] sm:$0xff] %v6809_v59  ;;  %v3230_v32 = vsel %vm3228_vm1, %v3229_v21, %v3227_v13  ;;  %v3549_v36 = vsel %vm3548_vm2, %v6659_v15, %v3547_v35  ;;  %v2900_v37 = vmul.f32 %v6566_v33, %v6566_v33  ;;  %v3250_v42 = vand.u32 2147483648, %v6656_v20 }
 0x2c0   : > { %v2995_v16 = vmul.f32 %v6568_v8, %v6568_v8  ;;  %v5033_v59 = vpop.eup %5032  ;;  %3946 = vxpose.xlu0.b32.start [1/16] (narrow) %v3230_v32, 8  ;;  %v3552_v56 = vsel %vm3550_vm3, %v3551_v23, %v3549_v36  ;;  %v2994_v44 = vmul.f32 %v6579_v31, %v6579_v31  ;;  %v2996_v57 = vmul.f32 %v6581_v49, %v6581_v49 }
 0x2c1   : > { %3978 = vxpose.xlu1.b32.start [1/16] %v3552_v56, 128  ;;  %v3246_v15 = vmul.f32 %v5033_v59, %v6656_v20  ;;  %v2903_v33 = vmul.f32 %v6588_v39, %v6588_v39  ;;  %v2998_v8 = vmul.f32 %v6590_v52, %v6590_v52  ;;  %v2999_v31 = vmul.f32 %v6598_v40, %v6598_v40  ;;  %v7712_v59 = vld [vmem:[#allocation30_spill] sm:$0xff]  ;;  %v7713_v39 = vld [vmem:[#allocation31_spill] sm:$0xff] }
 0x2c2   : > { %v6831_v21 = vadd.f32 %v2995_v16, %v6372_v24  ;;  %v6838_v14 = vadd.f32 %v2994_v44, %v6345_v38  ;;  %v6840_v13 = vadd.f32 %v2996_v57, %v2900_v37  ;;  %5040 = vrsqrt.f32 %v6777_v1 }
 0x2c3   : > { %v5035_v49 = vpop.eup %5034  ;;  %v6847_v24 = vmul.f32 %v7712_v59, %v7712_v59  ;;  %v3248_v16 = vsel %vm3247_vm4, %v6656_v20, %v3246_v15  ;;  %vm3249_vm5 = vcmp.eq.f32.partialorder %v6656_v20, 0.0  ;;  %v6854_v38 = vadd.f32 %v2998_v8, %v6458_v43 }
 0x2c4   : > { %v6858_v52 = vmul.f32 %v7713_v39, %v7713_v39  ;;  %v6861_v40 = vmax.f32 %v6014_v28, 1e-07  ;;  %v3251_v37 = vsel %vm3249_vm5, %v3250_v42, %v3248_v16  ;;  %v3568_v35 = vmul.f32 %v5035_v49, %v6674_v10 }
 0x2c5   : > { %v6865_v56 = vmax.f32 %v6637_v51, 1e-07  ;;  %3947 = vxpose.xlu0.b32.cont [2/16] (narrow) %v3251_v37, 8  ;;  %vm3569_vm6 = vcmp.eq.f32.partialorder %v6674_v10, inf  ;;  %v3572_v20 = vand.u32 2147483648, %v6674_v10  ;;  %v6869_v43 = vadd.f32 %v2999_v31, %v2903_v33  ;;  %v7714_v31 = vld [vmem:[#allocation21_spill] sm:$0xff] }
 0x2c6   : > { %v5037_v23 = vpop.eup %5036  ;;  %v6872_v32 = vmax.f32 %v6029_v30, 1e-07  ;;  %v3570_v28 = vsel %vm3569_vm6, %v6674_v10, %v3568_v35  ;;  %vm3571_vm7 = vcmp.eq.f32.partialorder %v6674_v10, 0.0  ;;  %5042 = vrsqrt.f32 %v6786_v55 }
 0x2c7   : > { %v5039_v42 = vpop.eup %5038  ;;  %v3573_v51 = vsel %vm3571_vm7, %v3572_v20, %v3570_v28  ;;  %v3267_v36 = vmul.f32 %v5037_v23, %v6763_v34  ;;  %vm3268_vm8 = vcmp.eq.f32.partialorder %v6763_v34, inf  ;;  %vm3270_vm9 = vcmp.eq.f32.partialorder %v6763_v34, 0.0 }
 0x2c8   : > { %3979 = vxpose.xlu1.b32.cont [2/16] %v3573_v51, 128  ;;  %v3271_v44 = vand.u32 2147483648, %v6763_v34  ;;  %v3589_v30 = vmul.f32 %v5039_v42, %v6767_v54  ;;  %v2997_v57 = vmul.f32 %v6600_v62, %v6600_v62  ;;  %5044 = vrsqrt.f32 %v6861_v40  ;;  %v7716_v42 = vld [vmem:[#allocation6_spill] sm:$0xff] }
 0x2c9   : > { %v3269_v10 = vsel %vm3268_vm8, %v6763_v34, %v3267_v36  ;;  %vm3590_vm10 = vcmp.eq.f32.partialorder %v6767_v54, inf  ;;  %v3593_v15 = vand.u32 2147483648, %v6767_v54  ;;  %5046 = vrsqrt.f32 %v6865_v56  ;;  %v7717_v36 = vld [vmem:[#allocation13_spill] sm:$0xff] }
 0x2ca   : > { %v3272_v33 = vsel %vm3270_vm9, %v3271_v44, %v3269_v10  ;;  %v3591_v8 = vsel %vm3590_vm10, %v6767_v54, %v3589_v30  ;;  %vm3592_vm11 = vcmp.eq.f32.partialorder %v6767_v54, 0.0  ;;  %v6892_v49 = vadd.f32 %v2997_v57, %v7714_v31  ;;  %v7718_v57 = vld [vmem:[#allocation14_spill] sm:$0xff] }
 0x2cb   : > { %v6895_v62 = vmax.f32 %v6692_v11, 1e-07  ;;  %3948 = vxpose.xlu0.b32.cont [3/16] (narrow) %v3272_v33, 8  ;;  %v3594_v59 = vsel %vm3592_vm11, %v3593_v15, %v3591_v8  ;;  %vm3289_vm12 = vcmp.eq.f32.partialorder %v6777_v1, inf  ;;  %v2906_v34 = vmul.f32 %v6627_v4, %v6627_v4 }
 0x2cc   : > { %v5041_v16 = vpop.eup %5040  ;;  %3980 = vxpose.xlu1.b32.cont [3/16] %v3594_v59, 128  ;;  %v3292_v39 = vand.u32 2147483648, %v6777_v1  ;;  %v3001_v54 = vmul.f32 %v6629_v58, %v6629_v58  ;;  %v3000_v37 = vmul.f32 %v6639_v26, %v6639_v26  ;;  %v3002_v11 = vmul.f32 %v6641_v18, %v6641_v18 }
 0x2cd   : > { %v3288_v35 = vmul.f32 %v5041_v16, %v6777_v1  ;;  %v2909_v20 = vmul.f32 %v6651_v22, %v6651_v22  ;;  %v3004_v4 = vmul.f32 %v6653_v63, %v6653_v63  ;;  %v3005_v23 = vmul.f32 %v6664_v9, %v6664_v9  ;;  %v7715_v9 = vld [vmem:[#allocation32_spill] sm:$0xff] }
 0x2ce   : > { %v6915_v28 = vadd.f32 %v3001_v54, %v6572_v19  ;;  %v6918_v58 = vadd.f32 %v3000_v37, %v6545_v41  ;;  %v6920_v26 = vadd.f32 %v3002_v11, %v2906_v34  ;;  %5048 = vrsqrt.f32 %v6872_v32 }
 0x2cf   : > { %v3290_v18 = vsel %vm3289_vm12, %v6777_v1, %v3288_v35  ;;  %vm3291_vm13 = vcmp.eq.f32.partialorder %v6777_v1, 0.0  ;;  %v6928_v22 = vadd.f32 %v3004_v4, %v6760_v25  ;;  %v6930_v63 = vadd.f32 %v3005_v23, %v2909_v20 }
 0x2d0   : > { %v5043_v19 = vpop.eup %5042  ;;  %v2914_v41 = vmul.f32 %v7715_v9, %v7715_v9  ;;  %v6936_v51 = vmul.f32 %v7716_v42, %v7716_v42  ;;  %v6939_v44 = vmax.f32 %v7717_v36, 1e-07  ;;  %v3293_v30 = vsel %vm3291_vm13, %v3292_v39, %v3290_v18 }
 0x2d1   : > { %v6942_v10 = vmax.f32 %v7718_v57, 1e-07  ;;  %v6945_v25 = vmax.f32 %v6742_v3, 1e-07  ;;  %3949 = vxpose.xlu0.b32.cont [4/16] (narrow) %v3293_v30, 8  ;;  %v3610_v1 = vmul.f32 %v5043_v19, %v6786_v55  ;;  %vm3611_vm14 = vcmp.eq.f32.partialorder %v6786_v55, inf }
 0x2d2   : > { %v5045_v15 = vpop.eup %5044  ;;  %vm3613_vm15 = vcmp.eq.f32.partialorder %v6786_v55, 0.0  ;;  %v3614_v33 = vand.u32 2147483648, %v6786_v55  ;;  %vm3310_vm0 = vcmp.eq.f32.partialorder %v6861_v40, inf  ;;  %5050 = vrsqrt.f32 %v6895_v62  ;;  %v7721_v57 = vld [vmem:[#allocation35_spill] sm:$0xff] }
 0x2d3   : > { %v5047_v8 = vpop.eup %5046  ;;  %v3612_v31 = vsel %vm3611_vm14, %v6786_v55, %v3610_v1  ;;  %v3309_v3 = vmul.f32 %v5045_v15, %v6861_v40  ;;  %vm3312_vm1 = vcmp.eq.f32.partialorder %v6861_v40, 0.0  ;;  %v3003_v59 = vmul.f32 %v6666_v29, %v6666_v29 }
 0x2d4   : > { %v3615_v34 = vsel %vm3613_vm15, %v3614_v33, %v3612_v31  ;;  %v3313_v16 = vand.u32 2147483648, %v6861_v40  ;;  %v3631_v39 = vmul.f32 %v5047_v8, %v6865_v56  ;;  %5052 = vrsqrt.f32 %v6939_v44  ;;  %v7722_v33 = vld [vmem:[#allocation34_spill] sm:$0xff] }
 0x2d5   : > { %3981 = vxpose.xlu1.b32.cont [4/16] %v3615_v34, 128  ;;  %v3311_v54 = vsel %vm3310_vm0, %v6861_v40, %v3309_v3  ;;  %vm3632_vm2 = vcmp.eq.f32.partialorder %v6865_v56, inf  ;;  %v3635_v55 = vand.u32 2147483648, %v6865_v56  ;;  %v6965_v37 = vadd.f32 %v3003_v59, %v6756_v61 }
 0x2d6   : > { %v3314_v11 = vsel %vm3312_vm1, %v3313_v16, %v3311_v54  ;;  %v3633_v29 = vsel %vm3632_vm2, %v6865_v56, %v3631_v39  ;;  %vm3634_vm3 = vcmp.eq.f32.partialorder %v6865_v56, 0.0  ;;  %5054 = vrsqrt.f32 %v6945_v25 }
 0x2d7   : > { %v6971_v35 = vmax.f32 %v6815_v2, 1e-07  ;;  %3950 = vxpose.xlu0.b32.cont [5/16] (narrow) %v3314_v11, 8  ;;  %v3636_v20 = vsel %vm3634_vm3, %v3635_v55, %v3633_v29  ;;  %vm3331_vm4 = vcmp.eq.f32.partialorder %v6872_v32, inf  ;;  %v3334_v40 = vand.u32 2147483648, %v6872_v32 }
 0x2d8   : > { %v5049_v4 = vpop.eup %5048  ;;  %v2912_v61 = vmul.f32 %v6694_v46, %v6694_v46  ;;  %v3007_v23 = vmul.f32 %v6696_v12, %v6696_v12  ;;  %v3006_v56 = vmul.f32 %v6701_v5, %v6701_v5  ;;  %v3008_v2 = vmul.f32 %v6703_v53, %v6703_v53 }
 0x2d9   : > { %3982 = vxpose.xlu1.b32.cont [5/16] %v3636_v20, 128  ;;  %v3330_v18 = vmul.f32 %v5049_v4, %v6872_v32  ;;  %v2915_v19 = vmul.f32 %v6712_v47, %v6712_v47  ;;  %v3010_v9 = vmul.f32 %v6714_v27, %v6714_v27  ;;  %v3011_v46 = vmul.f32 %v6723_v45, %v6723_v45 }
 0x2da   : > { %v6991_v12 = vadd.f32 %v3007_v23, %v6847_v24  ;;  %v6994_v5 = vadd.f32 %v3006_v56, %v6774_v0  ;;  %v6996_v42 = vadd.f32 %v3008_v2, %v2912_v61  ;;  %5056 = vrsqrt.f32 %v6942_v10  ;;  %v7719_v24 = vld [vmem:[#allocation7_spill] sm:$0xff] }
 0x2db   : > { %v3332_v53 = vsel %vm3331_vm4, %v6872_v32, %v3330_v18  ;;  %vm3333_vm5 = vcmp.eq.f32.partialorder %v6872_v32, 0.0  ;;  %v7003_v47 = vadd.f32 %v3010_v9, %v2914_v41  ;;  %v7005_v27 = vadd.f32 %v3011_v46, %v2915_v19  ;;  %v7720_v0 = vld [vmem:[#allocation15_spill] sm:$0xff]  ;;  %v7724_v19 = vld [vmem:[#allocation28_spill] sm:$0xff] }
 0x2dc   : > { %v5051_v45 = vpop.eup %5050  ;;  %v2917_v36 = vmul.f32 %v7719_v24, %v7719_v24  ;;  %v7010_v30 = vmax.f32 %v7720_v0, 1e-07  ;;  %v7013_v1 = vmax.f32 %v7721_v57, 1e-07  ;;  %v3335_v15 = vsel %vm3333_vm5, %v3334_v40, %v3332_v53  ;;  %v7723_v18 = vld [vmem:[#allocation27_spill] sm:$0xff]  ;;  %v7725_v24 = vld [vmem:[#allocation16_spill] sm:$0xff] }
 0x2dd   : > { %v2920_v8 = vmul.f32 %v7722_v33, %v7722_v33  ;;  %v7018_v32 = vmax.f32 %v6838_v14, 1e-07  ;;  %v7021_v41 = vmax.f32 %v6892_v49, 1e-07  ;;  %3951 = vxpose.xlu0.b32.cont [6/16] (narrow) %v3335_v15, 8  ;;  %v3652_v31 = vmul.f32 %v5051_v45, %v6895_v62  ;;  %v7726_v0 = vld [vmem:[#allocation17_spill] sm:$0xff] }
 0x2de   : > { %v5053_v3 = vpop.eup %5052  ;;  %vm3653_vm6 = vcmp.eq.f32.partialorder %v6895_v62, inf  ;;  %vm3655_vm7 = vcmp.eq.f32.partialorder %v6895_v62, 0.0  ;;  %v3656_v59 = vand.u32 2147483648, %v6895_v62  ;;  %5058 = vrsqrt.f32 %v6971_v35  ;;  %v7727_v15 = vld [vmem:[#allocation33_spill] sm:$0xff] }
 0x2df   : > { %v3654_v34 = vsel %vm3653_vm6, %v6895_v62, %v3652_v31  ;;  %v3351_v14 = vmul.f32 %v5053_v3, %v6939_v44  ;;  %vm3352_vm8 = vcmp.eq.f32.partialorder %v6939_v44, inf  ;;  %v3009_v49 = vmul.f32 %v6725_v50, %v6725_v50  ;;  %v7728_v31 = vld [vmem:[#allocation18_spill] sm:$0xff] }
 0x2e0   : > { %v5055_v16 = vpop.eup %5054  ;;  %v3657_v39 = vsel %vm3655_vm7, %v3656_v59, %v3654_v34  ;;  %vm3354_vm9 = vcmp.eq.f32.partialorder %v6939_v44, 0.0  ;;  %v3355_v54 = vand.u32 2147483648, %v6939_v44  ;;  %5060 = vrsqrt.f32 %v7010_v30 }
 0x2e1   : > { %3983 = vxpose.xlu1.b32.cont [6/16] %v3657_v39, 128  ;;  %v3353_v55 = vsel %vm3352_vm8, %v6939_v44, %v3351_v14  ;;  %v3673_v62 = vmul.f32 %v5055_v16, %v6945_v25  ;;  %vm3674_vm10 = vcmp.eq.f32.partialorder %v6945_v25, inf  ;;  %v7040_v11 = vadd.f32 %v3009_v49, %v6858_v52  ;;  %v7729_v16 = vld [vmem:[#allocation10_spill] sm:$0xff] }
 0x2e2   : > { %v3356_v29 = vsel %vm3354_vm9, %v3355_v54, %v3353_v55  ;;  %vm3676_vm11 = vcmp.eq.f32.partialorder %v6945_v25, 0.0  ;;  %v3677_v50 = vand.u32 2147483648, %v6945_v25  ;;  %5062 = vrsqrt.f32 %v7018_v32 }
 0x2e3   : > { %3952 = vxpose.xlu0.b32.cont [7/16] (narrow) %v3356_v29, 8  ;;  %v3675_v20 = vsel %vm3674_vm10, %v6945_v25, %v3673_v62  ;;  %vm3373_vm12 = vcmp.eq.f32.partialorder %v6942_v10, inf  ;;  %v3376_v44 = vand.u32 2147483648, %v6942_v10  ;;  %v2918_v40 = vmul.f32 %v6781_v48, %v6781_v48 }
 0x2e4   : > { %v5057_v4 = vpop.eup %5056  ;;  %v3678_v52 = vsel %vm3676_vm11, %v3677_v50, %v3675_v20  ;;  %v3013_v61 = vmul.f32 %v6783_v17, %v6783_v17  ;;  %v3012_v23 = vmul.f32 %v6790_v7, %v6790_v7  ;;  %v3014_v56 = vmul.f32 %v6792_v6, %v6792_v6 }
 0x2e5   : > { %3984 = vxpose.xlu1.b32.cont [7/16] %v3678_v52, 128  ;;  %v3372_v25 = vmul.f32 %v5057_v4, %v6942_v10  ;;  %v2921_v2 = vmul.f32 %v6799_v60, %v6799_v60  ;;  %v3016_v48 = vmul.f32 %v7723_v18, %v7723_v18  ;;  %v3017_v9 = vmul.f32 %v7724_v19, %v7724_v19  ;;  %v7730_v4 = vld [vmem:[#allocation36_spill] sm:$0xff] }
 0x2e6   : > { %v7063_v46 = vadd.f32 %v3013_v61, %v2917_v36  ;;  %v3108_v17 = vadd.f32 %v3012_v23, %v6936_v51  ;;  %v7066_v7 = vadd.f32 %v3014_v56, %v2918_v40  ;;  %5064 = vrsqrt.f32 %v7013_v1  ;;  %v7731_v61 = vld [vmem:[#allocation12_spill] sm:$0xff] }
 0x2e7   : > { %v3374_v6 = vsel %vm3373_vm12, %v6942_v10, %v3372_v25  ;;  %vm3375_vm13 = vcmp.eq.f32.partialorder %v6942_v10, 0.0  ;;  %v7073_v60 = vadd.f32 %v3016_v48, %v2920_v8  ;;  %v7075_v53 = vadd.f32 %v3017_v9, %v2921_v2  ;;  %v7732_v25 = vld [vmem:[#allocation19_spill] sm:$0xff]  ;;  %v7734_v9 = vld [vmem:[#allocation22_spill] sm:$0xff] }
 0x2e8   : > { %v5059_v45 = vpop.eup %5058  ;;  %v7078_v36 = vmax.f32 %v7725_v24, 1e-07  ;;  %v7081_v51 = vmax.f32 %v7726_v0, 1e-07  ;;  %v3377_v57 = vsel %vm3375_vm13, %v3376_v44, %v3374_v6  ;;  %v2919_v33 = vmul.f32 %v7727_v15, %v7727_v15  ;;  %v7735_v0 = vld [vmem:[#allocation23_spill] sm:$0xff] }
 0x2e9   : > { %v7086_v3 = vmax.f32 %v7728_v31, 1e-07  ;;  %v7089_v10 = vmax.f32 %v6918_v58, 1e-07  ;;  %3953 = vxpose.xlu0.b32.cont [8/16] (narrow) %v3377_v57, 8  ;;  %v3694_v8 = vmul.f32 %v5059_v45, %v6971_v35  ;;  %vm3695_vm14 = vcmp.eq.f32.partialorder %v6971_v35, inf }
 0x2ea   : > { %v5061_v59 = vpop.eup %5060  ;;  %v7093_v34 = vmax.f32 %v6965_v37, 1e-07  ;;  %v3698_v14 = vand.u32 2147483648, %v6971_v35  ;;  %5066 = vrsqrt.f32 %v7021_v41  ;;  %vm3697_vm15 = vcmp.eq.f32.partialorder %v6971_v35, 0.0 }
 0x2eb   : > { %v3696_v49 = vsel %vm3695_vm14, %v6971_v35, %v3694_v8  ;;  %v3393_v58 = vmul.f32 %v5061_v59, %v7010_v30  ;;  %v3015_v39 = vmul.f32 %v7729_v16, %v7729_v16  ;;  %vm3394_vm0 = vcmp.eq.f32.partialorder %v7010_v30, inf  ;;  %v7737_v8 = vld [vmem:[#allocation37_spill] sm:$0xff] }
 0x2ec   : > { %v5063_v54 = vpop.eup %5062  ;;  %v3699_v55 = vsel %vm3697_vm15, %v3698_v14, %v3696_v49  ;;  %v3397_v37 = vand.u32 2147483648, %v7010_v30  ;;  %5068 = vrsqrt.f32 %v7078_v36  ;;  %vm3396_vm1 = vcmp.eq.f32.partialorder %v7010_v30, 0.0 }
 0x2ed   : > { %3985 = vxpose.xlu1.b32.cont [8/16] %v3699_v55, 128  ;;  %v3395_v62 = vsel %vm3394_vm0, %v7010_v30, %v3393_v58  ;;  %v3715_v35 = vmul.f32 %v5063_v54, %v7018_v32  ;;  %v3111_v29 = vadd.f32 %v3015_v39, %v2919_v33  ;;  %vm3716_vm2 = vcmp.eq.f32.partialorder %v7018_v32, inf  ;;  %v7736_v33 = vld [vmem:[#allocation24_spill] sm:$0xff] }
 0x2ee   : > { %v3398_v50 = vsel %vm3396_vm1, %v3397_v37, %v3395_v62  ;;  %v3719_v20 = vand.u32 2147483648, %v7018_v32  ;;  %5070 = vrsqrt.f32 %v7089_v10  ;;  %v7113_v44 = vmax.f32 %v6994_v5, 1e-07  ;;  %v7733_v5 = vld [vmem:[#allocation20_spill] sm:$0xff] }
 0x2ef   : > { %3954 = vxpose.xlu0.b32.cont [9/16] (narrow) %v3398_v50, 8  ;;  %v3717_v40 = vsel %vm3716_vm2, %v7018_v32, %v3715_v35  ;;  %vm3718_vm3 = vcmp.eq.f32.partialorder %v7018_v32, 0.0  ;;  %5072 = vrsqrt.f32 %v7081_v51  ;;  %v7119_v52 = vmax.f32 %v7730_v4, 1e-07 }
 0x2f0   : > { %v5065_v30 = vpop.eup %5064  ;;  %v7122_v23 = vmax.f32 %v7731_v61, 1e-07  ;;  %v3720_v56 = vsel %vm3718_vm3, %v3719_v20, %v3717_v40  ;;  %v7125_v2 = vmax.f32 %v7732_v25, 1e-07  ;;  %v7128_v18 = vmax.f32 %v7733_v5, 1e-07 }
 0x2f1   : > { %3986 = vxpose.xlu1.b32.cont [9/16] %v3720_v56, 128  ;;  %v3414_v48 = vmul.f32 %v5065_v30, %v7013_v1  ;;  %5074 = vrsqrt.f32 %v7093_v34  ;;  %v7133_v32 = vmax.f32 %v7040_v11, 1e-07  ;;  %vm3415_vm4 = vcmp.eq.f32.partialorder %v7013_v1, inf }
 0x2f2   : > { %v3418_v19 = vand.u32 2147483648, %v7013_v1  ;;  %5076 = vrsqrt.f32 %v7086_v3  ;;  %v7139_v6 = vmax.f32 %v7734_v9, 1e-07  ;;  %vm3417_vm5 = vcmp.eq.f32.partialorder %v7013_v1, 0.0 }
 0x2f3   : > { %v3416_v45 = vsel %vm3415_vm4, %v7013_v1, %v3414_v48  ;;  %5078 = vrsqrt.f32 %v7113_v44  ;;  %v7145_v11 = vmax.f32 %v7735_v0, 1e-07  ;;  %v7147_v57 = vmax.f32 %v3108_v17, 1e-07 }
 0x2f4   : > { %v5067_v24 = vpop.eup %5066  ;;  %v3419_v15 = vsel %vm3417_vm5, %v3418_v19, %v3416_v45  ;;  %5080 = vrsqrt.f32 %v7119_v52  ;;  %v7151_v31 = vmax.f32 %v7736_v33, 1e-07  ;;  %v7154_v59 = vmax.f32 %v7737_v8, 1e-07 }
 0x2f5   : > { %3955 = vxpose.xlu0.b32.cont [10/16] (narrow) %v3419_v15, 8  ;;  %v3736_v1 = vmul.f32 %v5067_v24, %v7021_v41  ;;  %vm3737_vm6 = vcmp.eq.f32.partialorder %v7021_v41, inf  ;;  %vm3739_vm7 = vcmp.eq.f32.partialorder %v7021_v41, 0.0  ;;  %v3740_v17 = vand.u32 2147483648, %v7021_v41 }
 0x2f6   : > { %v5069_v14 = vpop.eup %5068  ;;  %vm3436_vm8 = vcmp.eq.f32.partialorder %v7078_v36, inf  ;;  %5082 = vrsqrt.f32 %v7133_v32  ;;  %vm3438_vm9 = vcmp.eq.f32.partialorder %v7078_v36, 0.0  ;;  %v7167_v54 = vmax.f32 %v3111_v29, 1e-07 }
 0x2f7   : > { %v3738_v49 = vsel %vm3737_vm6, %v7021_v41, %v3736_v1  ;;  %v3435_v58 = vmul.f32 %v5069_v14, %v7078_v36  ;;  %5084 = vrsqrt.f32 %v7122_v23  ;;  %v3439_v55 = vand.u32 2147483648, %v7078_v36 }
 0x2f8   : > { %v5071_v16 = vpop.eup %5070  ;;  %v3741_v39 = vsel %vm3739_vm7, %v3740_v17, %v3738_v49  ;;  %5086 = vrsqrt.f32 %v7147_v57  ;;  %vm3758_vm10 = vcmp.eq.f32.partialorder %v7089_v10, inf  ;;  %vm3760_vm11 = vcmp.eq.f32.partialorder %v7089_v10, 0.0 }
 0x2f9   : > { %v5073_v37 = vpop.eup %5072  ;;  %3987 = vxpose.xlu1.b32.cont [10/16] %v3741_v39, 128  ;;  %v3437_v62 = vsel %vm3436_vm8, %v7078_v36, %v3435_v58  ;;  %v3757_v41 = vmul.f32 %v5071_v16, %v7089_v10  ;;  %v3761_v50 = vand.u32 2147483648, %v7089_v10  ;;  %5088 = vrsqrt.f32 %v7125_v2  ;;  %v7738_v39 = vld [vmem:[#allocation25_spill] sm:$0xff] }
 0x2fa   : > { %v3440_v35 = vsel %vm3438_vm9, %v3439_v55, %v3437_v62  ;;  %v3456_v29 = vmul.f32 %v5073_v37, %v7081_v51  ;;  %vm3457_vm12 = vcmp.eq.f32.partialorder %v7081_v51, inf  ;;  %vm3459_vm13 = vcmp.eq.f32.partialorder %v7081_v51, 0.0 }
 0x2fb   : > { %v5075_v20 = vpop.eup %5074  ;;  %3956 = vxpose.xlu0.b32.cont [11/16] (narrow) %v3440_v35, 8  ;;  %v3759_v36 = vsel %vm3758_vm10, %v7089_v10, %v3757_v41  ;;  %v3460_v40 = vand.u32 2147483648, %v7081_v51  ;;  %5090 = vrsqrt.f32 %v7167_v54  ;;  %vm3779_vm14 = vcmp.eq.f32.partialorder %v7093_v34, inf }
 0x2fc   : > { %v5077_v30 = vpop.eup %5076  ;;  %v3762_v4 = vsel %vm3760_vm11, %v3761_v50, %v3759_v36  ;;  %v3458_v61 = vsel %vm3457_vm12, %v7081_v51, %v3456_v29  ;;  %v3778_v56 = vmul.f32 %v5075_v20, %v7093_v34  ;;  %v3782_v10 = vand.u32 2147483648, %v7093_v34  ;;  %v7739_v50 = vld [vmem:[#allocation38_spill] sm:$0xff] }
 0x2fd   : > { %v3930_v25 = vpop.trf.xlu1  ;;  %v5079_v5 = vpop.eup %5078  ;;  %3988 = vxpose.xlu1.b32.cont [11/16] %v3762_v4, 128  ;;  %v3477_v48 = vmul.f32 %v5077_v30, %v7086_v3  ;;  %vm3478_vm15 = vcmp.eq.f32.partialorder %v7086_v3, inf  ;;  %v3461_v9 = vsel %vm3459_vm13, %v3460_v40, %v3458_v61  ;;  %5092 = vrsqrt.f32 %v7128_v18  ;;  %v7740_v20 = vld [vmem:[#allocation26_spill] sm:$0xff] }
 0x2fe   : > { %4106 = vst [vmem:[%s7181_s12 + $0x100] sm:$0xff] %v3930_v25  ;;  %v5081_v19 = vpop.eup %5080  ;;  %v3780_v45 = vsel %vm3779_vm14, %v7093_v34, %v3778_v56  ;;  %v3799_v24 = vmul.f32 %v5079_v5, %v7113_v44  ;;  %vm3781_vm0 = vcmp.eq.f32.partialorder %v7093_v34, 0.0  ;;  %vm3800_vm1 = vcmp.eq.f32.partialorder %v7113_v44, inf }
 0x2ff   : > { %3957 = vxpose.xlu0.b32.cont [12/16] (narrow) %v3461_v9, 8  ;;  %v3479_v0 = vsel %vm3478_vm15, %v7086_v3, %v3477_v48  ;;  %v3498_v15 = vmul.f32 %v5081_v19, %v7119_v52  ;;  %v3783_v51 = vsel %vm3781_vm0, %v3782_v10, %v3780_v45  ;;  %v3481_v8 = vand.u32 2147483648, %v7086_v3  ;;  %v7741_v9 = vld [vmem:[#allocation39_spill] sm:$0xff] }
 0x300   : > { %v5083_v33 = vpop.eup %5082  ;;  %v3801_v1 = vsel %vm3800_vm1, %v7113_v44, %v3799_v24  ;;  %v3803_v14 = vand.u32 2147483648, %v7113_v44  ;;  %v3898_v17 = vpop.trf.xlu0  ;;  %vm3480_vm2 = vcmp.eq.f32.partialorder %v7086_v3, 0.0  ;;  %vm3802_vm3 = vcmp.eq.f32.partialorder %v7113_v44, 0.0 }
 0x301   : > { %v3931_v49 = vpop.trf.xlu1  ;;  %v5085_v58 = vpop.eup %5084  ;;  %3989 = vxpose.xlu1.b32.cont [12/16] %v3783_v51, 128  ;;  %v3820_v34 = vmul.f32 %v5083_v33, %v7133_v32  ;;  %5094 = vrsqrt.f32 %v7139_v6  ;;  %4074 = vst [vmem:[%s7181_s12] sm:$0xff] %v3898_v17  ;;  %v7214_v55 = vmax.f32 %v7738_v39, 1e-07  ;;  %v3482_v37 = vsel %vm3480_vm2, %v3481_v8, %v3479_v0  ;;  %v7742_v17 = vld [vmem:[#allocation8_spill] sm:$0xff] }
 0x302   : > { %4108 = vst [vmem:[%s7181_s12 + $0x110] sm:$0xff] %v3931_v49  ;;  %v5087_v16 = vpop.eup %5086  ;;  %v3804_v62 = vsel %vm3802_vm3, %v3803_v14, %v3801_v1  ;;  %vm3499_vm4 = vcmp.eq.f32.partialorder %v7119_v52, inf  ;;  %v3519_v3 = vmul.f32 %v5085_v58, %v7122_v23  ;;  %5096 = vrsqrt.f32 %v7145_v11 }
 0x303   : > { %3958 = vxpose.xlu0.b32.cont [13/16] (narrow) %v3482_v37, 8  ;;  %v3500_v41 = vsel %vm3499_vm4, %v7119_v52, %v3498_v15  ;;  %v3841_v44 = vmul.f32 %v5087_v16, %v7147_v57  ;;  %v5089_v35 = vpop.eup %5088  ;;  %v7222_v29 = vmax.f32 %v7739_v50, 1e-07  ;;  %v7225_v36 = vmax.f32 %v7740_v20, 1e-07  ;;  %v7743_v37 = vld [vmem:[#allocation40_spill] sm:$0xff] }
 0x304   : > { %v3502_v40 = vand.u32 2147483648, %v7119_v52  ;;  %vm3821_vm5 = vcmp.eq.f32.partialorder %v7133_v32, inf  ;;  %v3899_v30 = vpop.trf.xlu0  ;;  %vm3501_vm6 = vcmp.eq.f32.partialorder %v7119_v52, 0.0  ;;  %vm3823_vm7 = vcmp.eq.f32.partialorder %v7133_v32, 0.0  ;;  %v7744_v50 = vld [vmem:[#allocation9_spill] sm:$0xff] }
 0x305   : > { %v3932_v4 = vpop.trf.xlu1  ;;  %3990 = vxpose.xlu1.b32.cont [13/16] %v3804_v62, 128  ;;  %v3822_v61 = vsel %vm3821_vm5, %v7133_v32, %v3820_v34  ;;  %v3824_v56 = vand.u32 2147483648, %v7133_v32  ;;  %4076 = vst [vmem:[%s7181_s12 + $0x10] sm:$0xff] %v3899_v30  ;;  %v5091_v25 = vpop.eup %5090  ;;  %vm3520_vm8 = vcmp.eq.f32.partialorder %v7122_v23, inf  ;;  %vm3842_vm9 = vcmp.eq.f32.partialorder %v7147_v57, inf }
 0x306   : > { %4110 = vst [vmem:[%s7181_s12 + $0x120] sm:$0xff] %v3932_v4  ;;  %v3503_v5 = vsel %vm3501_vm6, %v3502_v40, %v3500_v41  ;;  %5098 = vrsqrt.f32 %v7151_v31  ;;  %v3521_v10 = vsel %vm3520_vm8, %v7122_v23, %v3519_v3  ;;  %v3843_v52 = vsel %vm3842_vm9, %v7147_v57, %v3841_v44 }
 0x307   : > { %3959 = vxpose.xlu0.b32.cont [14/16] (narrow) %v3503_v5, 8  ;;  %v3540_v48 = vmul.f32 %v5089_v35, %v7125_v2  ;;  %5100 = vrsqrt.f32 %v7154_v59  ;;  %v5093_v19 = vpop.eup %5092  ;;  %v7243_v45 = vmax.f32 %v7741_v9, 1e-07  ;;  %v3825_v24 = vsel %vm3823_vm7, %v3824_v56, %v3822_v61 }
 0x308   : > { %v3523_v0 = vand.u32 2147483648, %v7122_v23  ;;  %v3845_v15 = vand.u32 2147483648, %v7147_v57  ;;  %v3900_v33 = vpop.trf.xlu0  ;;  %vm3522_vm10 = vcmp.eq.f32.partialorder %v7122_v23, 0.0  ;;  %vm3844_vm11 = vcmp.eq.f32.partialorder %v7147_v57, 0.0 }
 0x309   : > { %v3933_v51 = vpop.trf.xlu1  ;;  %3991 = vxpose.xlu1.b32.cont [14/16] %v3825_v24, 128  ;;  %v3862_v8 = vmul.f32 %v5091_v25, %v7167_v54  ;;  %5102 = vrsqrt.f32 %v7214_v55  ;;  %4078 = vst [vmem:[%s7181_s12 + $0x20] sm:$0xff] %v3900_v33  ;;  %vm3541_vm12 = vcmp.eq.f32.partialorder %v7125_v2, inf  ;;  %v3554_v57 = vmul.f32 %v5093_v19, %v7128_v18 }
 0x30a   : > { %4112 = vst [vmem:[%s7181_s12 + $0x130] sm:$0xff] %v3933_v51  ;;  %v3524_v1 = vsel %vm3522_vm10, %v3523_v0, %v3521_v10  ;;  %v3846_v32 = vsel %vm3844_vm11, %v3845_v15, %v3843_v52  ;;  %5104 = vrsqrt.f32 %v7222_v29  ;;  %v3542_v23 = vsel %vm3541_vm12, %v7125_v2, %v3540_v48  ;;  %v7745_v10 = vld [vmem:[#allocation41_spill] sm:$0xff]  ;;  %v7746_v0 = vld [vmem:[#allocation42_spill] sm:$0xff] }
 0x30b   : > { %v5095_v14 = vpop.eup %5094  ;;  %3960 = vxpose.xlu0.b32.cont [15/16] (narrow) %v3524_v1, 8  ;;  %v7260_v49 = vmax.f32 %v7742_v17, 1e-07  ;;  %v3544_v58 = vand.u32 2147483648, %v7125_v2  ;;  %vm3863_vm13 = vcmp.eq.f32.partialorder %v7167_v54, inf  ;;  %5106 = vrsqrt.f32 %v7225_v36 }
 0x30c   : > { %v3901_v34 = vpop.trf.xlu0  ;;  %v5097_v39 = vpop.eup %5096  ;;  %v7266_v62 = vmax.f32 %v7743_v37, 1e-07  ;;  %vm3543_vm14 = vcmp.eq.f32.partialorder %v7125_v2, 0.0  ;;  %v3864_v41 = vsel %vm3863_vm13, %v7167_v54, %v3862_v8  ;;  %v3561_v3 = vmul.f32 %v5095_v14, %v7139_v6 }
 0x30d   : > { %v3934_v16 = vpop.trf.xlu1  ;;  %3992 = vxpose.xlu1.b32.cont [15/16] %v3846_v32, 128  ;;  %4080 = vst [vmem:[%s7181_s12 + $0x30] sm:$0xff] %v3901_v34  ;;  %v3545_v44 = vsel %vm3543_vm14, %v3544_v58, %v3542_v23  ;;  %v3866_v35 = vand.u32 2147483648, %v7167_v54  ;;  %vm3555_vm15 = vcmp.eq.f32.partialorder %v7128_v18, inf  ;;  %5108 = vrsqrt.f32 %v7243_v45  ;;  %v7747_v23 = vld [vmem:[#allocation43_spill] sm:$0xff] }
 0x30e   : > { %4114 = vst [vmem:[%s7181_s12 + $0x140] sm:$0xff] %v3934_v16  ;;  %v7277_v20 = vmax.f32 %v7744_v50, 1e-07  ;;  %vm3865_vm0 = vcmp.eq.f32.partialorder %v7167_v54, 0.0  ;;  %v3556_v2 = vsel %vm3555_vm15, %v7128_v18, %v3554_v57  ;;  %v3575_v40 = vmul.f32 %v5097_v39, %v7145_v11  ;;  %v7748_v39 = vld [vmem:[#allocation44_spill] sm:$0xff] }
 0x30f   : > { %3961 = vxpose.xlu0.b32.end [16/16] (narrow) %v3545_v44, 8  ;;  %v3867_v4 = vsel %vm3865_vm0, %v3866_v35, %v3864_v41  ;;  %v3558_v61 = vand.u32 2147483648, %v7128_v18  ;;  %vm3562_vm1 = vcmp.eq.f32.partialorder %v7139_v6, inf  ;;  %5110 = vrsqrt.f32 %v7260_v49 }
 0x310   : > { %v5099_v30 = vpop.eup %5098  ;;  %v3902_v56 = vpop.trf.xlu0  ;;  %v7286_v52 = vmax.f32 %v7745_v10, 1e-07  ;;  %vm3557_vm2 = vcmp.eq.f32.partialorder %v7128_v18, 0.0  ;;  %v3563_v54 = vsel %vm3562_vm1, %v7139_v6, %v3561_v3  ;;  %v3565_v9 = vand.u32 2147483648, %v7139_v6 }
 0x311   : > { %v3935_v25 = vpop.trf.xlu1  ;;  %v5101_v5 = vpop.eup %5100  ;;  %3993 = vxpose.xlu1.b32.end [16/16] %v3867_v4, 128  ;;  %v3582_v48 = vmul.f32 %v5099_v30, %v7151_v31  ;;  %4082 = vst [vmem:[%s7181_s12 + $0x40] sm:$0xff] %v3902_v56  ;;  %v3559_v19 = vsel %vm3557_vm2, %v3558_v61, %v3556_v2  ;;  %vm3576_vm3 = vcmp.eq.f32.partialorder %v7145_v11, inf  ;;  %5112 = vrsqrt.f32 %v7266_v62 }
 0x312   : > { %4116 = vst [vmem:[%s7181_s12 + $0x150] sm:$0xff] %v3935_v25  ;;  %v7297_v15 = vmax.f32 %v7746_v0, 1e-07  ;;  %vm3564_vm4 = vcmp.eq.f32.partialorder %v7139_v6, 0.0  ;;  %v3577_v18 = vsel %vm3576_vm3, %v7145_v11, %v3575_v40  ;;  %v3596_v33 = vmul.f32 %v5101_v5, %v7154_v59 }
 0x313   : > { %v5103_v24 = vpop.eup %5102  ;;  %4010 = vxpose.xlu0.b32.start [1/16] %v3559_v19, 128  ;;  %v3566_v8 = vsel %vm3564_vm4, %v3565_v9, %v3563_v54  ;;  %v3579_v1 = vand.u32 2147483648, %v7145_v11  ;;  %vm3583_vm5 = vcmp.eq.f32.partialorder %v7151_v31, inf  ;;  %5114 = vrsqrt.f32 %v7277_v20 }
 0x314   : > { %v5105_v51 = vpop.eup %5104  ;;  %v3903_v32 = vpop.trf.xlu0  ;;  %v7306_v57 = vmax.f32 %v7747_v23, 1e-07  ;;  %vm3578_vm6 = vcmp.eq.f32.partialorder %v7145_v11, 0.0  ;;  %v3584_v6 = vsel %vm3583_vm5, %v7151_v31, %v3582_v48  ;;  %v3603_v17 = vmul.f32 %v5103_v24, %v7214_v55 }
 0x315   : > { %v3936_v14 = vpop.trf.xlu1  ;;  %4042 = vxpose.xlu1.b32.start [1/16] (narrow) %v3566_v8, 8  ;;  %4084 = vst [vmem:[%s7181_s12 + $0x50] sm:$0xff] %v3903_v32  ;;  %v5107_v58 = vpop.eup %5106  ;;  %v3580_v34 = vsel %vm3578_vm6, %v3579_v1, %v3577_v18  ;;  %v3586_v16 = vand.u32 2147483648, %v7151_v31  ;;  %vm3597_vm7 = vcmp.eq.f32.partialorder %v7154_v59, inf  ;;  %5116 = vrsqrt.f32 %v7286_v52 }
 0x316   : > { %4118 = vst [vmem:[%s7181_s12 + $0x160] sm:$0xff] %v3936_v14  ;;  %v7317_v37 = vmax.f32 %v7748_v39, 1e-07  ;;  %vm3585_vm8 = vcmp.eq.f32.partialorder %v7151_v31, 0.0  ;;  %v3598_v11 = vsel %vm3597_vm7, %v7154_v59, %v3596_v33  ;;  %v3617_v41 = vmul.f32 %v5105_v51, %v7222_v29 }
 0x317   : > { %4011 = vxpose.xlu0.b32.cont [2/16] %v3580_v34, 128  ;;  %v5109_v3 = vpop.eup %5108  ;;  %v3587_v44 = vsel %vm3585_vm8, %v3586_v16, %v3584_v6  ;;  %v3600_v35 = vand.u32 2147483648, %v7154_v59  ;;  %vm3604_vm9 = vcmp.eq.f32.partialorder %v7214_v55, inf  ;;  %5118 = vrsqrt.f32 %v7297_v15 }
 0x318   : > { %v3904_v50 = vpop.trf.xlu0  ;;  %v7326_v40 = vmax.f32 %v6831_v21, 1e-07  ;;  %vm3599_vm10 = vcmp.eq.f32.partialorder %v7154_v59, 0.0  ;;  %v3605_v31 = vsel %vm3604_vm9, %v7214_v55, %v3603_v17  ;;  %v3624_v30 = vmul.f32 %v5107_v58, %v7225_v36 }
 0x319   : > { %v3937_v2 = vpop.trf.xlu1  ;;  %4043 = vxpose.xlu1.b32.cont [2/16] (narrow) %v3587_v44, 8  ;;  %4086 = vst [vmem:[%s7181_s12 + $0x60] sm:$0xff] %v3904_v50  ;;  %v5111_v4 = vpop.eup %5110  ;;  %v3601_v61 = vsel %vm3599_vm10, %v3600_v35, %v3598_v11  ;;  %v3607_v56 = vand.u32 2147483648, %v7214_v55  ;;  %vm3618_vm11 = vcmp.eq.f32.partialorder %v7222_v29, inf  ;;  %5120 = vrsqrt.f32 %v7306_v57 }
 0x31a   : > { %4120 = vst [vmem:[%s7181_s12 + $0x170] sm:$0xff] %v3937_v2  ;;  %v7337_v21 = vmax.f32 %v6840_v13, 1e-07  ;;  %vm3606_vm12 = vcmp.eq.f32.partialorder %v7214_v55, 0.0  ;;  %v3619_v59 = vsel %vm3618_vm11, %v7222_v29, %v3617_v41  ;;  %v3638_v25 = vmul.f32 %v5109_v3, %v7243_v45 }
 0x31b   : > { %4012 = vxpose.xlu0.b32.cont [3/16] %v3601_v61, 128  ;;  %v5113_v5 = vpop.eup %5112  ;;  %v3608_v10 = vsel %vm3606_vm12, %v3607_v56, %v3605_v31  ;;  %v3621_v54 = vand.u32 2147483648, %v7222_v29  ;;  %vm3625_vm13 = vcmp.eq.f32.partialorder %v7225_v36, inf  ;;  %5122 = vrsqrt.f32 %v7317_v37 }
 0x31c   : > { %v3905_v48 = vpop.trf.xlu0  ;;  %v7346_v19 = vmax.f32 %v6854_v38, 1e-07  ;;  %vm3620_vm14 = vcmp.eq.f32.partialorder %v7222_v29, 0.0  ;;  %v3626_v55 = vsel %vm3625_vm13, %v7225_v36, %v3624_v30  ;;  %v3645_v9 = vmul.f32 %v5111_v4, %v7260_v49 }
 0x31d   : > { %v3938_v13 = vpop.trf.xlu1  ;;  %4044 = vxpose.xlu1.b32.cont [3/16] (narrow) %v3608_v10, 8  ;;  %4088 = vst [vmem:[%s7181_s12 + $0x70] sm:$0xff] %v3905_v48  ;;  %v5115_v24 = vpop.eup %5114  ;;  %v3622_v0 = vsel %vm3620_vm14, %v3621_v54, %v3619_v59  ;;  %v3628_v18 = vand.u32 2147483648, %v7225_v36  ;;  %vm3639_vm15 = vcmp.eq.f32.partialorder %v7243_v45, inf  ;;  %5124 = vrsqrt.f32 %v7326_v40 }
 0x31e   : > { %4122 = vst [vmem:[%s7181_s12 + $0x180] sm:$0xff] %v3938_v13  ;;  %v7357_v38 = vmax.f32 %v6869_v43, 1e-07  ;;  %vm3627_vm0 = vcmp.eq.f32.partialorder %v7225_v36, 0.0  ;;  %v3640_v29 = vsel %vm3639_vm15, %v7243_v45, %v3638_v25  ;;  %v3659_v33 = vmul.f32 %v5113_v5, %v7266_v62 }
 0x31f   : > { %4013 = vxpose.xlu0.b32.cont [4/16] %v3622_v0, 128  ;;  %v5117_v51 = vpop.eup %5116  ;;  %v3629_v8 = vsel %vm3627_vm0, %v3628_v18, %v3626_v55  ;;  %v3642_v1 = vand.u32 2147483648, %v7243_v45  ;;  %vm3646_vm1 = vcmp.eq.f32.partialorder %v7260_v49, inf  ;;  %5126 = vrsqrt.f32 %v7337_v21 }
 0x320   : > { %v3906_v32 = vpop.trf.xlu0  ;;  %v7366_v14 = vmax.f32 %v6915_v28, 1e-07  ;;  %vm3641_vm2 = vcmp.eq.f32.partialorder %v7243_v45, 0.0  ;;  %v3647_v36 = vsel %vm3646_vm1, %v7260_v49, %v3645_v9  ;;  %v3666_v23 = vmul.f32 %v5115_v24, %v7277_v20 }
 0x321   : > { %v3939_v43 = vpop.trf.xlu1  ;;  %4045 = vxpose.xlu1.b32.cont [4/16] (narrow) %v3629_v8, 8  ;;  %4090 = vst [vmem:[%s7181_s12 + $0x80] sm:$0xff] %v3906_v32  ;;  %v5119_v6 = vpop.eup %5118  ;;  %v3643_v17 = vsel %vm3641_vm2, %v3642_v1, %v3640_v29  ;;  %v3649_v58 = vand.u32 2147483648, %v7260_v49  ;;  %vm3660_vm3 = vcmp.eq.f32.partialorder %v7266_v62, inf  ;;  %5128 = vrsqrt.f32 %v7346_v19 }
 0x322   : > { %4124 = vst [vmem:[%s7181_s12 + $0x190] sm:$0xff] %v3939_v43  ;;  %v7377_v28 = vmax.f32 %v6920_v26, 1e-07  ;;  %vm3648_vm4 = vcmp.eq.f32.partialorder %v7260_v49, 0.0  ;;  %v3661_v45 = vsel %vm3660_vm3, %v7266_v62, %v3659_v33  ;;  %v3680_v34 = vmul.f32 %v5117_v51, %v7286_v52 }
 0x323   : > { %4014 = vxpose.xlu0.b32.cont [5/16] %v3643_v17, 128  ;;  %v5121_v16 = vpop.eup %5120  ;;  %v3650_v39 = vsel %vm3648_vm4, %v3649_v58, %v3647_v36  ;;  %v3663_v11 = vand.u32 2147483648, %v7266_v62  ;;  %vm3667_vm5 = vcmp.eq.f32.partialorder %v7277_v20, inf  ;;  %5130 = vrsqrt.f32 %v7357_v38 }
 0x324   : > { %v3907_v41 = vpop.trf.xlu0  ;;  %v7386_v3 = vmax.f32 %v6928_v22, 1e-07  ;;  %vm3662_vm6 = vcmp.eq.f32.partialorder %v7266_v62, 0.0  ;;  %v3668_v49 = vsel %vm3667_vm5, %v7277_v20, %v3666_v23  ;;  %v3687_v44 = vmul.f32 %v5119_v6, %v7297_v15 }
 0x325   : > { %v3940_v26 = vpop.trf.xlu1  ;;  %4046 = vxpose.xlu1.b32.cont [5/16] (narrow) %v3650_v39, 8  ;;  %4092 = vst [vmem:[%s7181_s12 + $0x90] sm:$0xff] %v3907_v41  ;;  %v5123_v35 = vpop.eup %5122  ;;  %v3664_v50 = vsel %vm3662_vm6, %v3663_v11, %v3661_v45  ;;  %v3670_v2 = vand.u32 2147483648, %v7277_v20  ;;  %vm3681_vm7 = vcmp.eq.f32.partialorder %v7286_v52, inf  ;;  %5132 = vrsqrt.f32 %v7366_v14 }
 0x326   : > { %4126 = vst [vmem:[%s7181_s12 + $0x1a0] sm:$0xff] %v3940_v26  ;;  %v7397_v22 = vmax.f32 %v6930_v63, 1e-07  ;;  %vm3669_vm8 = vcmp.eq.f32.partialorder %v7277_v20, 0.0  ;;  %v3682_v62 = vsel %vm3681_vm7, %v7286_v52, %v3680_v34  ;;  %v3701_v31 = vmul.f32 %v5121_v16, %v7306_v57 }
 0x327   : > { %4015 = vxpose.xlu0.b32.cont [6/16] %v3664_v50, 128  ;;  %v5125_v30 = vpop.eup %5124  ;;  %v3671_v4 = vsel %vm3669_vm8, %v3670_v2, %v3668_v49  ;;  %v3684_v61 = vand.u32 2147483648, %v7286_v52  ;;  %vm3688_vm9 = vcmp.eq.f32.partialorder %v7297_v15, inf  ;;  %5134 = vrsqrt.f32 %v7377_v28 }
 0x328   : > { %v3908_v56 = vpop.trf.xlu0  ;;  %v7406_v59 = vmax.f32 %v6991_v12, 1e-07  ;;  %vm3683_vm10 = vcmp.eq.f32.partialorder %v7286_v52, 0.0  ;;  %v3689_v20 = vsel %vm3688_vm9, %v7297_v15, %v3687_v44  ;;  %v3708_v25 = vmul.f32 %v5123_v35, %v7317_v37 }
 0x329   : > { %v3941_v63 = vpop.trf.xlu1  ;;  %4047 = vxpose.xlu1.b32.cont [6/16] (narrow) %v3671_v4, 8  ;;  %4094 = vst [vmem:[%s7181_s12 + $0xa0] sm:$0xff] %v3908_v56  ;;  %v5127_v5 = vpop.eup %5126  ;;  %v3685_v10 = vsel %vm3683_vm10, %v3684_v61, %v3682_v62  ;;  %v3691_v54 = vand.u32 2147483648, %v7297_v15  ;;  %vm3702_vm11 = vcmp.eq.f32.partialorder %v7306_v57, inf  ;;  %5136 = vrsqrt.f32 %v7386_v3 }
 0x32a   : > { %4128 = vst [vmem:[%s7181_s12 + $0x1b0] sm:$0xff] %v3941_v63  ;;  %v7417_v12 = vmax.f32 %v6996_v42, 1e-07  ;;  %vm3690_vm12 = vcmp.eq.f32.partialorder %v7297_v15, 0.0  ;;  %v3703_v52 = vsel %vm3702_vm11, %v7306_v57, %v3701_v31  ;;  %v3722_v48 = vmul.f32 %v5125_v30, %v7326_v40 }
 0x32b   : > { %4016 = vxpose.xlu0.b32.cont [7/16] %v3685_v10, 128  ;;  %v5129_v13 = vpop.eup %5128  ;;  %v3692_v55 = vsel %vm3690_vm12, %v3691_v54, %v3689_v20  ;;  %v3705_v9 = vand.u32 2147483648, %v7306_v57  ;;  %vm3709_vm13 = vcmp.eq.f32.partialorder %v7317_v37, inf  ;;  %5138 = vrsqrt.f32 %v7397_v22 }
 0x32c   : > { %v3909_v24 = vpop.trf.xlu0  ;;  %v7426_v0 = vmax.f32 %v7003_v47, 1e-07  ;;  %vm3704_vm14 = vcmp.eq.f32.partialorder %v7306_v57, 0.0  ;;  %v3710_v15 = vsel %vm3709_vm13, %v7317_v37, %v3708_v25  ;;  %v3729_v18 = vmul.f32 %v5127_v5, %v7337_v21 }
 0x32d   : > { %v3942_v42 = vpop.trf.xlu1  ;;  %4048 = vxpose.xlu1.b32.cont [7/16] (narrow) %v3692_v55, 8  ;;  %4096 = vst [vmem:[%s7181_s12 + $0xb0] sm:$0xff] %v3909_v24  ;;  %v5131_v29 = vpop.eup %5130  ;;  %v3706_v33 = vsel %vm3704_vm14, %v3705_v9, %v3703_v52  ;;  %v3712_v51 = vand.u32 2147483648, %v7317_v37  ;;  %vm3723_vm15 = vcmp.eq.f32.partialorder %v7326_v40, inf  ;;  %5140 = vrsqrt.f32 %v7406_v59 }
 0x32e   : > { %4130 = vst [vmem:[%s7181_s12 + $0x1c0] sm:$0xff] %v3942_v42  ;;  %v7437_v47 = vmax.f32 %v7005_v27, 1e-07  ;;  %vm3711_vm0 = vcmp.eq.f32.partialorder %v7317_v37, 0.0  ;;  %v3724_v57 = vsel %vm3723_vm15, %v7326_v40, %v3722_v48  ;;  %v3743_v8 = vmul.f32 %v5129_v13, %v7346_v19 }
 0x32f   : > { %4017 = vxpose.xlu0.b32.cont [8/16] %v3706_v33, 128  ;;  %v5133_v1 = vpop.eup %5132  ;;  %v3713_v32 = vsel %vm3711_vm0, %v3712_v51, %v3710_v15  ;;  %v3726_v43 = vand.u32 2147483648, %v7326_v40  ;;  %vm3730_vm1 = vcmp.eq.f32.partialorder %v7337_v21, inf  ;;  %5142 = vrsqrt.f32 %v7417_v12 }
 0x330   : > { %v3910_v36 = vpop.trf.xlu0  ;;  %v7446_v23 = vmax.f32 %v7063_v46, 1e-07  ;;  %vm3725_vm2 = vcmp.eq.f32.partialorder %v7326_v40, 0.0  ;;  %v3731_v37 = vsel %vm3730_vm1, %v7337_v21, %v3729_v18  ;;  %v3750_v6 = vmul.f32 %v5131_v29, %v7357_v38 }
 0x331   : > { %v3943_v27 = vpop.trf.xlu1  ;;  %4049 = vxpose.xlu1.b32.cont [8/16] (narrow) %v3713_v32, 8  ;;  %4098 = vst [vmem:[%s7181_s12 + $0xc0] sm:$0xff] %v3910_v36  ;;  %v5135_v17 = vpop.eup %5134  ;;  %v3727_v58 = vsel %vm3725_vm2, %v3726_v43, %v3724_v57  ;;  %v3733_v45 = vand.u32 2147483648, %v7337_v21  ;;  %vm3744_vm3 = vcmp.eq.f32.partialorder %v7346_v19, inf  ;;  %5144 = vrsqrt.f32 %v7426_v0 }
 0x332   : > { %4132 = vst [vmem:[%s7181_s12 + $0x1d0] sm:$0xff] %v3943_v27  ;;  %v7457_v46 = vmax.f32 %v7066_v7, 1e-07  ;;  %vm3732_vm4 = vcmp.eq.f32.partialorder %v7337_v21, 0.0  ;;  %v3745_v40 = vsel %vm3744_vm3, %v7346_v19, %v3743_v8  ;;  %v3764_v34 = vmul.f32 %v5133_v1, %v7366_v14 }
 0x333   : > { %4018 = vxpose.xlu0.b32.cont [9/16] %v3727_v58, 128  ;;  %v5137_v16 = vpop.eup %5136  ;;  %v3734_v39 = vsel %vm3732_vm4, %v3733_v45, %v3731_v37  ;;  %v3747_v11 = vand.u32 2147483648, %v7346_v19  ;;  %vm3751_vm5 = vcmp.eq.f32.partialorder %v7357_v38, inf  ;;  %5146 = vrsqrt.f32 %v7437_v47 }
 0x334   : > { %v3911_v41 = vpop.trf.xlu0  ;;  %v7466_v26 = vmax.f32 %v7073_v60, 1e-07  ;;  %vm3746_vm6 = vcmp.eq.f32.partialorder %v7346_v19, 0.0  ;;  %v3752_v21 = vsel %vm3751_vm5, %v7357_v38, %v3750_v6  ;;  %v3771_v49 = vmul.f32 %v5135_v17, %v7377_v28 }
 0x335   : > { %v3944_v7 = vpop.trf.xlu1  ;;  %4050 = vxpose.xlu1.b32.cont [9/16] (narrow) %v3734_v39, 8  ;;  %4100 = vst [vmem:[%s7181_s12 + $0xd0] sm:$0xff] %v3911_v41  ;;  %v5139_v44 = vpop.eup %5138  ;;  %v3748_v35 = vsel %vm3746_vm6, %v3747_v11, %v3745_v40  ;;  %v3754_v50 = vand.u32 2147483648, %v7357_v38  ;;  %vm3765_vm7 = vcmp.eq.f32.partialorder %v7366_v14, inf  ;;  %5148 = vrsqrt.f32 %v7446_v23 }
 0x336   : > { %4134 = vst [vmem:[%s7181_s12 + $0x1e0] sm:$0xff] %v3944_v7  ;;  %v7477_v60 = vmax.f32 %v7075_v53, 1e-07  ;;  %vm3753_vm8 = vcmp.eq.f32.partialorder %v7357_v38, 0.0  ;;  %v3766_v19 = vsel %vm3765_vm7, %v7366_v14, %v3764_v34  ;;  %v3785_v2 = vmul.f32 %v5137_v16, %v7386_v3 }
 0x337   : > { %4019 = vxpose.xlu0.b32.cont [10/16] %v3748_v35, 128  ;;  %v5141_v62 = vpop.eup %5140  ;;  %v3755_v31 = vsel %vm3753_vm8, %v3754_v50, %v3752_v21  ;;  %v3768_v30 = vand.u32 2147483648, %v7366_v14  ;;  %vm3772_vm9 = vcmp.eq.f32.partialorder %v7377_v28, inf  ;;  %5150 = vrsqrt.f32 %v7457_v46 }
 0x338   : > { %v3912_v4 = vpop.trf.xlu0  ;;  %vm3767_vm10 = vcmp.eq.f32.partialorder %v7366_v14, 0.0  ;;  %v3773_v61 = vsel %vm3772_vm9, %v7377_v28, %v3771_v49  ;;  %v3792_v38 = vmul.f32 %v5139_v44, %v7397_v22  ;;  %v3775_v20 = vand.u32 2147483648, %v7377_v28 }
 0x339   : > { %v3945_v53 = vpop.trf.xlu1  ;;  %4051 = vxpose.xlu1.b32.cont [10/16] (narrow) %v3755_v31, 8  ;;  %4102 = vst [vmem:[%s7181_s12 + $0xe0] sm:$0xff] %v3912_v4  ;;  %v5143_v56 = vpop.eup %5142  ;;  %v3769_v63 = vsel %vm3767_vm10, %v3768_v30, %v3766_v19  ;;  %vm3786_vm11 = vcmp.eq.f32.partialorder %v7386_v3, inf  ;;  %5152 = vrsqrt.f32 %v7466_v26  ;;  %vm3774_vm12 = vcmp.eq.f32.partialorder %v7377_v28, 0.0 }
 0x33a   : > { %4136 = vst [vmem:[%s7181_s12 + $0x1f0] sm:$0xff] %v3945_v53  ;;  %v3787_v14 = vsel %vm3786_vm11, %v7386_v3, %v3785_v2  ;;  %v3806_v25 = vmul.f32 %v5141_v62, %v7406_v59  ;;  %v3776_v10 = vsel %vm3774_vm12, %v3775_v20, %v3773_v61  ;;  %v3789_v54 = vand.u32 2147483648, %v7386_v3 }
 0x33b   : > { %4020 = vxpose.xlu0.b32.cont [11/16] %v3769_v63, 128  ;;  %v5145_v5 = vpop.eup %5144  ;;  %vm3793_vm13 = vcmp.eq.f32.partialorder %v7397_v22, inf  ;;  %5154 = vrsqrt.f32 %v7477_v60  ;;  %vm3788_vm14 = vcmp.eq.f32.partialorder %v7386_v3, 0.0  ;;  %v3813_v28 = vmul.f32 %v5143_v56, %v7417_v12 }
 0x33c   : > { %v3913_v52 = vpop.trf.xlu0  ;;  %v3794_v48 = vsel %vm3793_vm13, %v7397_v22, %v3792_v38  ;;  %v3790_v55 = vsel %vm3788_vm14, %v3789_v54, %v3787_v14  ;;  %v3796_v9 = vand.u32 2147483648, %v7397_v22  ;;  %vm3807_vm15 = vcmp.eq.f32.partialorder %v7406_v59, inf }
 0x33d   : > { %4052 = vxpose.xlu1.b32.cont [11/16] (narrow) %v3776_v10, 8  ;;  %4104 = vst [vmem:[%s7181_s12 + $0xf0] sm:$0xff] %v3913_v52  ;;  %v5147_v13 = vpop.eup %5146  ;;  %vm3795_vm0 = vcmp.eq.f32.partialorder %v7397_v22, 0.0  ;;  %v3808_v24 = vsel %vm3807_vm15, %v7406_v59, %v3806_v25  ;;  %v3827_v42 = vmul.f32 %v5145_v5, %v7426_v0  ;;  %v3810_v18 = vand.u32 2147483648, %v7406_v59 }
 0x33e   : > { %v3797_v3 = vsel %vm3795_vm0, %v3796_v9, %v3794_v48  ;;  %vm3814_vm1 = vcmp.eq.f32.partialorder %v7417_v12, inf  ;;  %vm3809_vm2 = vcmp.eq.f32.partialorder %v7406_v59, 0.0  ;;  %v3834_v33 = vmul.f32 %v5147_v13, %v7437_v47 }
 0x33f   : > { %4021 = vxpose.xlu0.b32.cont [12/16] %v3790_v55, 128  ;;  %v5149_v15 = vpop.eup %5148  ;;  %v3815_v29 = vsel %vm3814_vm1, %v7417_v12, %v3813_v28  ;;  %v3811_v57 = vsel %vm3809_vm2, %v3810_v18, %v3808_v24  ;;  %v3817_v22 = vand.u32 2147483648, %v7417_v12  ;;  %vm3828_vm3 = vcmp.eq.f32.partialorder %v7426_v0, inf }
 0x340   : > { %vm3816_vm4 = vcmp.eq.f32.partialorder %v7417_v12, 0.0  ;;  %v3829_v8 = vsel %vm3828_vm3, %v7426_v0, %v3827_v42  ;;  %v3848_v1 = vmul.f32 %v5149_v15, %v7446_v23  ;;  %v3831_v59 = vand.u32 2147483648, %v7426_v0 }
 0x341   : > { %4053 = vxpose.xlu1.b32.cont [12/16] (narrow) %v3797_v3, 8  ;;  %v5151_v51 = vpop.eup %5150  ;;  %v3818_v43 = vsel %vm3816_vm4, %v3817_v22, %v3815_v29  ;;  %vm3835_vm5 = vcmp.eq.f32.partialorder %v7437_v47, inf  ;;  %vm3830_vm6 = vcmp.eq.f32.partialorder %v7426_v0, 0.0  ;;  %v3838_v12 = vand.u32 2147483648, %v7437_v47 }
 0x342   : > { %v3836_v36 = vsel %vm3835_vm5, %v7437_v47, %v3834_v33  ;;  %v3855_v27 = vmul.f32 %v5151_v51, %v7457_v46  ;;  %v3832_v6 = vsel %vm3830_vm6, %v3831_v59, %v3829_v8  ;;  %vm3849_vm7 = vcmp.eq.f32.partialorder %v7446_v23, inf }
 0x343   : > { %4022 = vxpose.xlu0.b32.cont [13/16] %v3811_v57, 128  ;;  %v5153_v32 = vpop.eup %5152  ;;  %vm3837_vm8 = vcmp.eq.f32.partialorder %v7437_v47, 0.0  ;;  %v3850_v17 = vsel %vm3849_vm7, %v7446_v23, %v3848_v1  ;;  %v3852_v0 = vand.u32 2147483648, %v7446_v23  ;;  %vm3856_vm9 = vcmp.eq.f32.partialorder %v7457_v46, inf }
 0x344   : > { %v3869_v58 = vmul.f32 %v5153_v32, %v7466_v26  ;;  %v3839_v45 = vsel %vm3837_vm8, %v3838_v12, %v3836_v36  ;;  %vm3851_vm10 = vcmp.eq.f32.partialorder %v7446_v23, 0.0  ;;  %v3857_v40 = vsel %vm3856_vm9, %v7457_v46, %v3855_v27 }
 0x345   : > { %4054 = vxpose.xlu1.b32.cont [13/16] (narrow) %v3818_v43, 8  ;;  %v5155_v37 = vpop.eup %5154  ;;  %v3853_v16 = vsel %vm3851_vm10, %v3852_v0, %v3850_v17  ;;  %v3859_v39 = vand.u32 2147483648, %v7457_v46  ;;  %vm3870_vm11 = vcmp.eq.f32.partialorder %v7466_v26, inf  ;;  %vm3858_vm12 = vcmp.eq.f32.partialorder %v7457_v46, 0.0 }
 0x346   : > { %v3876_v34 = vmul.f32 %v5155_v37, %v7477_v60  ;;  %v3871_v47 = vsel %vm3870_vm11, %v7466_v26, %v3869_v58  ;;  %vm3877_vm13 = vcmp.eq.f32.partialorder %v7477_v60, inf  ;;  %v3873_v23 = vand.u32 2147483648, %v7466_v26 }
 0x347   : > { %4023 = vxpose.xlu0.b32.cont [14/16] %v3832_v6, 128  ;;  %v3860_v11 = vsel %vm3858_vm12, %v3859_v39, %v3857_v40  ;;  %vm3872_vm14 = vcmp.eq.f32.partialorder %v7466_v26, 0.0  ;;  %v3880_v7 = vand.u32 2147483648, %v7477_v60  ;;  %vm3879_vm15 = vcmp.eq.f32.partialorder %v7477_v60, 0.0 }
 0x348   : > { %v3878_v41 = vsel %vm3877_vm13, %v7477_v60, %v3876_v34  ;;  %v3874_v21 = vsel %vm3872_vm14, %v3873_v23, %v3871_v47 }
 0x349   : > { %4055 = vxpose.xlu1.b32.cont [14/16] (narrow) %v3839_v45, 8  ;;  %v3881_v46 = vsel %vm3879_vm15, %v3880_v7, %v3878_v41 }
 0x34b   : > { %4024 = vxpose.xlu0.b32.cont [15/16] %v3853_v16, 128 }
 0x34d   : > { %4056 = vxpose.xlu1.b32.cont [15/16] (narrow) %v3860_v11, 8 }
 0x34f   : > { %4025 = vxpose.xlu0.b32.end [16/16] %v3874_v21, 128 }
 0x351   : > { %4057 = vxpose.xlu1.b32.end [16/16] (narrow) %v3881_v46, 8 }
 0x353   : > { %v3962_v49 = vpop.trf.xlu0 }
 0x354   : > { %4138 = vst [vmem:[%s7181_s12 + $0x200] sm:$0x1] %v3962_v49 }
 0x355   : > { %v3994_v44 = vpop.trf.xlu1 }
 0x356   : > { %4075 = vst [vmem:[%s7181_s12 + $0x8] sm:$0xff] %v3994_v44 }
 0x359   : > { %v3995_v35 = vpop.trf.xlu1 }
 0x35a   : > { %4077 = vst [vmem:[%s7181_s12 + $0x18] sm:$0xff] %v3995_v35 }
 0x35d   : > { %v3996_v26 = vpop.trf.xlu1 }
 0x35e   : > { %4079 = vst [vmem:[%s7181_s12 + $0x28] sm:$0xff] %v3996_v26 }
 0x361   : > { %v3997_v50 = vpop.trf.xlu1 }
 0x362   : > { %4081 = vst [vmem:[%s7181_s12 + $0x38] sm:$0xff] %v3997_v50 }
 0x365   : > { %v3998_v60 = vpop.trf.xlu1 }
 0x366   : > { %4083 = vst [vmem:[%s7181_s12 + $0x48] sm:$0xff] %v3998_v60 }
 0x369   : > { %v3999_v19 = vpop.trf.xlu1 }
 0x36a   : > { %4085 = vst [vmem:[%s7181_s12 + $0x58] sm:$0xff] %v3999_v19 }
 0x36d   : > { %v4000_v2 = vpop.trf.xlu1 }
 0x36e   : > { %4087 = vst [vmem:[%s7181_s12 + $0x68] sm:$0xff] %v4000_v2 }
 0x371   : > { %v4001_v62 = vpop.trf.xlu1 }
 0x372   : > { %4089 = vst [vmem:[%s7181_s12 + $0x78] sm:$0xff] %v4001_v62 }
 0x375   : > { %v4002_v31 = vpop.trf.xlu1 }
 0x376   : > { %4091 = vst [vmem:[%s7181_s12 + $0x88] sm:$0xff] %v4002_v31 }
 0x379   : > { %v4003_v30 = vpop.trf.xlu1 }
 0x37a   : > { %4093 = vst [vmem:[%s7181_s12 + $0x98] sm:$0xff] %v4003_v30 }
 0x37d   : > { %v4004_v4 = vpop.trf.xlu1 }
 0x37e   : > { %4095 = vst [vmem:[%s7181_s12 + $0xa8] sm:$0xff] %v4004_v4 }
 0x381   : > { %v4005_v53 = vpop.trf.xlu1 }
 0x382   : > { %4097 = vst [vmem:[%s7181_s12 + $0xb8] sm:$0xff] %v4005_v53 }
 0x385   : > { %v4006_v61 = vpop.trf.xlu1 }
 0x386   : > { %4099 = vst [vmem:[%s7181_s12 + $0xc8] sm:$0xff] %v4006_v61 }
 0x389   : > { %v4007_v38 = vpop.trf.xlu1 }
 0x38a   : > { %4101 = vst [vmem:[%s7181_s12 + $0xd8] sm:$0xff] %v4007_v38 }
 0x38d   : > { %v4008_v56 = vpop.trf.xlu1 }
 0x38e   : > { %4103 = vst [vmem:[%s7181_s12 + $0xe8] sm:$0xff] %v4008_v56 }
 0x391   : > { %v4009_v63 = vpop.trf.xlu1 }
 0x392   : > { %4105 = vst [vmem:[%s7181_s12 + $0xf8] sm:$0xff] %v4009_v63 }
 0x393   : > { %v4026_v20 = vpop.trf.xlu0 }
 0x394   : > { %4107 = vst [vmem:[%s7181_s12 + $0x108] sm:$0xff] %v4026_v20 }
 0x395   : > { %v4058_v14 = vpop.trf.xlu1 }
 0x396   : > { %4139 = vst [vmem:[%s7181_s12 + $0x208] sm:$0x1] %v4058_v14 }
 0x397   : > { %v4027_v25 = vpop.trf.xlu0 }
 0x398   : > { %4109 = vst [vmem:[%s7181_s12 + $0x118] sm:$0xff] %v4027_v25 }
 0x39b   : > { %v4028_v5 = vpop.trf.xlu0 }
 0x39c   : > { %4111 = vst [vmem:[%s7181_s12 + $0x128] sm:$0xff] %v4028_v5 }
 0x39f   : > { %v4029_v10 = vpop.trf.xlu0 }
 0x3a0   : > { %4113 = vst [vmem:[%s7181_s12 + $0x138] sm:$0xff] %v4029_v10 }
 0x3a3   : > { %v4030_v54 = vpop.trf.xlu0 }
 0x3a4   : > { %4115 = vst [vmem:[%s7181_s12 + $0x148] sm:$0xff] %v4030_v54 }
 0x3a7   : > { %v4031_v52 = vpop.trf.xlu0 }
 0x3a8   : > { %4117 = vst [vmem:[%s7181_s12 + $0x158] sm:$0xff] %v4031_v52 }
 0x3ab   : > { %v4032_v48 = vpop.trf.xlu0 }
 0x3ac   : > { %4119 = vst [vmem:[%s7181_s12 + $0x168] sm:$0xff] %v4032_v48 }
 0x3af   : > { %v4033_v28 = vpop.trf.xlu0 }
 0x3b0   : > { %4121 = vst [vmem:[%s7181_s12 + $0x178] sm:$0xff] %v4033_v28 }
 0x3b3   : > { %v4034_v13 = vpop.trf.xlu0 }
 0x3b4   : > { %4123 = vst [vmem:[%s7181_s12 + $0x188] sm:$0xff] %v4034_v13 }
 0x3b7   : > { %v4035_v55 = vpop.trf.xlu0 }
 0x3b8   : > { %4125 = vst [vmem:[%s7181_s12 + $0x198] sm:$0xff] %v4035_v55 }
 0x3bb   : > { %v4036_v9 = vpop.trf.xlu0 }
 0x3bc   : > { %4127 = vst [vmem:[%s7181_s12 + $0x1a8] sm:$0xff] %v4036_v9 }
 0x3bf   : > { %v4037_v24 = vpop.trf.xlu0 }
 0x3c0   : > { %4129 = vst [vmem:[%s7181_s12 + $0x1b8] sm:$0xff] %v4037_v24 }
 0x3c3   : > { %v4038_v42 = vpop.trf.xlu0 }
 0x3c4   : > { %4131 = vst [vmem:[%s7181_s12 + $0x1c8] sm:$0xff] %v4038_v42 }
 0x3c7   : > { %v4039_v15 = vpop.trf.xlu0 }
 0x3c8   : > { %4133 = vst [vmem:[%s7181_s12 + $0x1d8] sm:$0xff] %v4039_v15 }
 0x3cb   : > { %v4040_v3 = vpop.trf.xlu0 }
 0x3cc   : > { %4135 = vst [vmem:[%s7181_s12 + $0x1e8] sm:$0xff] %v4040_v3 }
 0x3cf   : > { %v4041_v18 = vpop.trf.xlu0 }
 0x3d0   : > { %4137 = vst [vmem:[%s7181_s12 + $0x1f8] sm:$0xff] %v4041_v18 }
 0x3d1 PF: > { %s13_s11 = sadd.s32 1, %s5210_s11   ;;  %s7749_s9 = smov %s5206_s10 }
 0x3d2   : > { %p10_p4 = scmp.ge.s32.totalorder %s13_s11, 4   ;;  %s7750_s10 = smov %s7752_s13 }
 0x3d4   :  { %12 = sbr.rel (!%p10_p4) target bundleno = 2 (0x2), region = 63 }
 0x3db   :  { %4170 = vsyncpa [#allocation4], 1 }
 0x3dc   :  { %4172 = vsyncpa [#allocation4 + $0x1], 1 }

</bundles_post_ra>
